<compile_context>
chip_gen: v7x
topology: tpu7x:2x2x1
jax: 0.10.0
libtpu: 0.0.40
codegen_flags: <defaults>
</compile_context>

<pallas_src>
import functools

import jax
import jax.numpy as jnp
from jax.experimental import pallas as pl
from jax.experimental.pallas import tpu as pltpu


# -----------------------------------------------------------------------------
# Pallas kernel
# -----------------------------------------------------------------------------
def _encoder_block_kernel(x_ref, wf_ref, bf_ref, wg_ref, bg_ref, out_ref,
                          *, blocks, layers, ksize, cin, fuse_gates):
    Bb, Tp, Cp = x_ref.shape                  # (batch block, padded time, padded channels)
    K = ksize
    M = Bb * Tp

    x = x_ref[...]                            # f32, fully resident
    s = jnp.zeros_like(x)

    # Hoisted constants (single materialization, reused by every layer).
    zpad = jnp.zeros((Bb, K - 1, Cp), jnp.bfloat16)      # causal left zero pad
    wzero = jnp.zeros((max(Cp - cin, 0), Cp), jnp.bfloat16)  # Cin zero-expansion rows

    def causal_slab(h):
        """im2col: (Bb, Tp, Cp) f32 -> (Bb*Tp, K*Cp) bf16 with causal left-zero pad."""
        hp = jnp.concatenate([zpad, h.astype(jnp.bfloat16)], axis=1)   # (Bb, Tp+K-1, Cp)
        slab = jnp.concatenate([hp[:, j:j + Tp, :] for j in range(K)], axis=-1)
        return slab.reshape(M, K * Cp)        # pure relabel (Tp is a sublane multiple)

    def expand_w(wc):
        """Zero-expand compact-Cin weights (K*cin, Cp) -> (K*Cp, Cp).

        HBM ships the compact layout (dominant DMA term); the inserted zero rows
        line up with the slab's zero padded-channel lanes, so results are identical
        while the MXU contraction stays lane-dense."""
        if Cp == cin:
            return wc
        parts = []
        for k in range(K):
            parts.append(wc[k * cin:(k + 1) * cin, :])
            parts.append(wzero)
        return jnp.concatenate(parts, axis=0)

    for blk in range(blocks):
        residual = x
        f = x
        g = x
        for l in range(layers):
            lin = blk * layers + l
            wfe = expand_w(wf_ref[lin])
            wge = expand_w(wg_ref[lin])
            bfl = bf_ref[lin][None, :]
            bgl = bg_ref[lin][None, :]
            if fuse_gates:
                # One MXU matmul per layer (v6e/v7x 256-wide MXU): stack the f and g
                # rows and lane-concat [wf | wg].  f lives in the top-left quadrant,
                # g in the bottom-right; the discarded cross-quadrants are free
                # (the kernel is nowhere near the MXU roofline).
                slab = jnp.concatenate([causal_slab(f), causal_slab(g)], axis=0)
                w2 = jnp.concatenate([wfe, wge], axis=-1)                 # (K*Cp, 2*Cp)
                r = jnp.dot(slab, w2, preferred_element_type=jnp.float32)  # (2M, 2*Cp) f32
                f = (r[:M, :Cp] + bfl).reshape(Bb, Tp, Cp)
                g = (r[M:, Cp:] + bgl).reshape(Bb, Tp, Cp)
            else:
                # <= v5 path (128-wide MXU): keep one matmul per gate per layer.
                f = (jnp.dot(causal_slab(f), wfe, preferred_element_type=jnp.float32)
                     + bfl).reshape(Bb, Tp, Cp)
                g = (jnp.dot(causal_slab(g), wge, preferred_element_type=jnp.float32)
                     + bgl).reshape(Bb, Tp, Cp)
        # Padded channels stay exactly 0: padded bias is 0 and tanh(0) = 0 gates them.
        x = residual + jax.nn.sigmoid(f) * jnp.tanh(g)
        s = s + x
    out_ref[...] = s


# -----------------------------------------------------------------------------
# Wrapper: layout plumbing (NCT -> BTC, channel/time padding, weight reordering)
# -----------------------------------------------------------------------------
def _round_up(n, m):
    return ((n + m - 1) // m) * m


def _prep_conv_weights(w, Cp):
    """PyTorch Conv1d weights (n_conv, Cout, Cin, K) -> (n_conv, K*Cin, Cp) bf16.

    Cin stays compact in HBM (weight bytes dominate this kernel's DMA traffic);
    only Cout is lane-padded.  The kernel zero-expands Cin on the fly."""
    n_conv, Cout, Cin, K = w.shape
    w = jnp.transpose(w, (0, 3, 2, 1))                                  # (n_conv, K, Cin, Cout)
    w = jnp.pad(w, ((0, 0), (0, 0), (0, 0), (0, Cp - Cout)))
    return w.reshape(n_conv, K * Cin, Cp).astype(jnp.bfloat16)


def _default_fuse_gates():
    # f/g fusion fills the 256-wide MXU on v6e/v7x.  On the 128-wide MXU
    # generations (<= v5) it would double real MXU passes, so keep gates split.
    try:
        kind = jax.devices()[0].device_kind.lower()
    except Exception:
        return True
    return not any(t in kind for t in ("v2", "v3", "v4", "v5"))


def encoder_block_pallas(x_nct, wf, bf, wg, bg, *, blocks, layers, ksize,
                         fuse_gates=None):
    """x_nct: (B, C, T) like PyTorch; wf/wg: (blocks*layers, Cout, Cin, K); returns (B, C, T)."""
    B, C, T = x_nct.shape
    n_conv, Cout, Cin, K = wf.shape
    if not (Cin == C and Cout == C):
        raise ValueError("EncoderBlock requires fin == fout (residual add).")
    assert K == ksize and n_conv == blocks * layers
    if fuse_gates is None:
        fuse_gates = _default_fuse_gates()

    # Lane-dense channel padding + sublane-aligned time padding.
    Cp = _round_up(C, 128)
    Tp = _round_up(T, 8)
    x_btc = jnp.transpose(x_nct, (0, 2, 1)).astype(jnp.float32)         # (B, T, C)
    x_p = jnp.pad(x_btc, ((0, 0), (0, Tp - T), (0, Cp - C)))

    wf_p = _prep_conv_weights(wf, Cp)
    wg_p = _prep_conv_weights(wg, Cp)
    bf_p = jnp.pad(bf.astype(jnp.float32), ((0, 0), (0, Cp - C)))
    bg_p = jnp.pad(bg.astype(jnp.float32), ((0, 0), (0, Cp - C)))

    # Batch grid: only split when each core gets enough matmul rows (>= 256) to be
    # worth duplicating the weight DMA (v7x) / the extra grid step (v5e/v6e).
    nb = 2 if (B % 2 == 0 and (B // 2) * Tp >= 256) else 1
    bblk = B // nb

    kern = functools.partial(_encoder_block_kernel, blocks=blocks, layers=layers,
                             ksize=ksize, cin=C, fuse_gates=fuse_gates)
    y_p = pl.pallas_call(
        kern,
        out_shape=jax.ShapeDtypeStruct((B, Tp, Cp), jnp.float32),
        grid=(nb,),
        in_specs=[
            pl.BlockSpec((bblk, Tp, Cp), lambda i: (i, 0, 0)),
            pl.BlockSpec((n_conv, K * C, Cp), lambda i: (0, 0, 0)),
            pl.BlockSpec((n_conv, Cp), lambda i: (0, 0)),
            pl.BlockSpec((n_conv, K * C, Cp), lambda i: (0, 0, 0)),
            pl.BlockSpec((n_conv, Cp), lambda i: (0, 0)),
        ],
        out_specs=pl.BlockSpec((bblk, Tp, Cp), lambda i: (i, 0, 0)),
        compiler_params=pltpu.CompilerParams(
            dimension_semantics=("parallel",)),
    )(x_p, wf_p, bf_p, wg_p, bg_p)

    # Slice off padded timesteps/channels and return PyTorch layout (B, C, T).
    return jnp.transpose(y_p[:, :T, :C], (0, 2, 1))


# -----------------------------------------------------------------------------
# Pure-JAX reference (mirrors the PyTorch module exactly, f32 end-to-end)
# -----------------------------------------------------------------------------
def _ref_causal_conv(h_btc, w_oik, b_o, ksize):
    B, T, Cin = h_btc.shape
    Cout = w_oik.shape[0]
    hp = jnp.pad(h_btc, ((0, 0), (ksize - 1, 0), (0, 0)))
    y = jnp.zeros((B, T, Cout), jnp.float32)
    for k in range(ksize):
        y = y + jnp.einsum('btc,oc->bto', hp[:, k:k + T, :], w_oik[:, :, k])
    return y + b_o[None, None, :]


def encoder_block_ref(x_nct, wf, bf, wg, bg, *, blocks, layers, ksize):
    x = jnp.transpose(x_nct, (0, 2, 1)).astype(jnp.float32)
    s = jnp.zeros_like(x)
    for blk in range(blocks):
        residual = x
        f = x
        g = x
        for l in range(layers):
            lin = blk * layers + l
            f = _ref_causal_conv(f, wf[lin], bf[lin], ksize)
            g = _ref_causal_conv(g, wg[lin], bg[lin], ksize)
        x = residual + jax.nn.sigmoid(f) * jnp.tanh(g)
        s = s + x
    return jnp.transpose(s, (0, 2, 1))


# -----------------------------------------------------------------------------
# Main
# -----------------------------------------------------------------------------
if __name__ == "__main__":
    # GraphTCN config implies EncoderBlock(fin=fout+n_units[-1]=48, blocks=3,
    # layers=3, ksize=3) on (bs=5 pedestrians, 48 channels, obs_len=12).
    B, C, T = 5, 48, 12
    BLOCKS, LAYERS, KSIZE = 3, 3, 3
    n_conv = BLOCKS * LAYERS

    key = jax.random.PRNGKey(0)
    kx, kwf, kbf, kwg, kbg = jax.random.split(key, 5)

    # PyTorch-style input (B, C, T) and Conv1d-layout weights (Cout, Cin, K) per conv.
    x = jax.random.normal(kx, (B, C, T), jnp.float32)
    wf = 0.05 * jax.random.normal(kwf, (n_conv, C, C, KSIZE), jnp.float32)
    bf = 0.05 * jax.random.normal(kbf, (n_conv, C), jnp.float32)
    wg = 0.05 * jax.random.normal(kwg, (n_conv, C, C, KSIZE), jnp.float32)
    bg = 0.05 * jax.random.normal(kbg, (n_conv, C), jnp.float32)

    run = jax.jit(functools.partial(encoder_block_pallas,
                                    blocks=BLOCKS, layers=LAYERS, ksize=KSIZE))
    out = jax.block_until_ready(run(x, wf, bf, wg, bg))

    ref = encoder_block_ref(x, wf, bf, wg, bg,
                            blocks=BLOCKS, layers=LAYERS, ksize=KSIZE)
    assert out.shape == (B, C, T)
    # bf16 MXU operands (f32 accumulation) => loosened tolerance vs the f32 reference.
    err = jnp.max(jnp.abs(out - ref))
    assert jnp.allclose(out, ref, rtol=2e-2, atol=1e-1), f"max abs err {err}"

    print("KERNEL_OK")
</pallas_src>

<mosaic_0001>
module attributes {stable_mosaic.version = 11 : i64} {
  func.func @_encoder_block_kernel(%arg0: i32, %arg1: memref<5x16x128xf32, #tpu.memory_space<vmem>>, %arg2: memref<9x144x128xbf16, #tpu.memory_space<vmem>>, %arg3: memref<9x128xf32, #tpu.memory_space<vmem>>, %arg4: memref<9x144x128xbf16, #tpu.memory_space<vmem>>, %arg5: memref<9x128xf32, #tpu.memory_space<vmem>>, %arg6: memref<5x16x128xf32, #tpu.memory_space<vmem>>) attributes {dimension_semantics = [#tpu.dimension_semantics<parallel>], iteration_bounds = array<i64: 1>, scalar_prefetch = 0 : i64, scratch_operands = 0 : i64, tpu.core_type = #tpu.core_type<tc>, window_params = [{transform_indices = @transform_0, window_bounds = array<i64: 5, 16, 128>}, {pipeline_mode = #tpu.pipeline_mode<synchronous>, transform_indices = @transform_1, window_bounds = array<i64: 9, 144, 128>}, {pipeline_mode = #tpu.pipeline_mode<synchronous>, transform_indices = @transform_2, window_bounds = array<i64: 9, 128>}, {pipeline_mode = #tpu.pipeline_mode<synchronous>, transform_indices = @transform_3, window_bounds = array<i64: 9, 144, 128>}, {pipeline_mode = #tpu.pipeline_mode<synchronous>, transform_indices = @transform_4, window_bounds = array<i64: 9, 128>}, {transform_indices = @transform_5, window_bounds = array<i64: 5, 16, 128>}]} {
    %c0 = arith.constant 0 : index
    %c0_0 = arith.constant 0 : index
    %c0_1 = arith.constant 0 : index
    %0 = vector.load %arg1[%c0, %c0_0, %c0_1] : memref<5x16x128xf32, #tpu.memory_space<vmem>>, vector<5x16x128xf32>
    %cst = arith.constant 0.000000e+00 : f32
    %1 = vector.broadcast %cst : f32 to vector<5x16x128xf32>
    %cst_2 = arith.constant 0.000000e+00 : bf16
    %2 = vector.broadcast %cst_2 : bf16 to vector<5x2x128xbf16>
    %cst_3 = arith.constant 0.000000e+00 : bf16
    %3 = vector.broadcast %cst_3 : bf16 to vector<80x128xbf16>
    %c0_4 = arith.constant 0 : index
    %c0_5 = arith.constant 0 : index
    %c0_6 = arith.constant 0 : index
    %4 = vector.load %arg2[%c0_4, %c0_5, %c0_6] : memref<9x144x128xbf16, #tpu.memory_space<vmem>>, vector<1x144x128xbf16>
    %5 = vector.shape_cast %4 : vector<1x144x128xbf16> to vector<144x128xbf16>
    %6 = vector.extract_strided_slice %5 {offsets = [0, 0], sizes = [48, 128], strides = [1, 1]} : vector<144x128xbf16> to vector<48x128xbf16>
    %7 = vector.extract_strided_slice %5 {offsets = [48, 0], sizes = [48, 128], strides = [1, 1]} : vector<144x128xbf16> to vector<48x128xbf16>
    %8 = vector.extract_strided_slice %5 {offsets = [96, 0], sizes = [48, 128], strides = [1, 1]} : vector<144x128xbf16> to vector<48x128xbf16>
    %9 = tpu.concatenate %6, %3, %7, %3, %8, %3 in 0 : vector<48x128xbf16>, vector<80x128xbf16>, vector<48x128xbf16>, vector<80x128xbf16>, vector<48x128xbf16>, vector<80x128xbf16> -> vector<384x128xbf16>
    %c0_7 = arith.constant 0 : index
    %c0_8 = arith.constant 0 : index
    %c0_9 = arith.constant 0 : index
    %10 = vector.load %arg4[%c0_7, %c0_8, %c0_9] : memref<9x144x128xbf16, #tpu.memory_space<vmem>>, vector<1x144x128xbf16>
    %11 = vector.shape_cast %10 : vector<1x144x128xbf16> to vector<144x128xbf16>
    %12 = vector.extract_strided_slice %11 {offsets = [0, 0], sizes = [48, 128], strides = [1, 1]} : vector<144x128xbf16> to vector<48x128xbf16>
    %13 = vector.extract_strided_slice %11 {offsets = [48, 0], sizes = [48, 128], strides = [1, 1]} : vector<144x128xbf16> to vector<48x128xbf16>
    %14 = vector.extract_strided_slice %11 {offsets = [96, 0], sizes = [48, 128], strides = [1, 1]} : vector<144x128xbf16> to vector<48x128xbf16>
    %15 = tpu.concatenate %12, %3, %13, %3, %14, %3 in 0 : vector<48x128xbf16>, vector<80x128xbf16>, vector<48x128xbf16>, vector<80x128xbf16>, vector<48x128xbf16>, vector<80x128xbf16> -> vector<384x128xbf16>
    %c0_10 = arith.constant 0 : index
    %c0_11 = arith.constant 0 : index
    %16 = vector.load %arg3[%c0_10, %c0_11] : memref<9x128xf32, #tpu.memory_space<vmem>>, vector<1x128xf32>
    %17 = vector.shape_cast %16 : vector<1x128xf32> to vector<128xf32>
    %18 = vector.shape_cast %17 : vector<128xf32> to vector<1x128xf32>
    %c0_12 = arith.constant 0 : index
    %c0_13 = arith.constant 0 : index
    %19 = vector.load %arg5[%c0_12, %c0_13] : memref<9x128xf32, #tpu.memory_space<vmem>>, vector<1x128xf32>
    %20 = vector.shape_cast %19 : vector<1x128xf32> to vector<128xf32>
    %21 = vector.shape_cast %20 : vector<128xf32> to vector<1x128xf32>
    %22 = arith.truncf %0 : vector<5x16x128xf32> to vector<5x16x128xbf16>
    %23 = tpu.concatenate %2, %22 in 1 : vector<5x2x128xbf16>, vector<5x16x128xbf16> -> vector<5x18x128xbf16>
    %24 = vector.extract_strided_slice %23 {offsets = [0, 0, 0], sizes = [5, 16, 128], strides = [1, 1, 1]} : vector<5x18x128xbf16> to vector<5x16x128xbf16>
    %25 = vector.extract_strided_slice %23 {offsets = [0, 1, 0], sizes = [5, 16, 128], strides = [1, 1, 1]} : vector<5x18x128xbf16> to vector<5x16x128xbf16>
    %26 = vector.extract_strided_slice %23 {offsets = [0, 2, 0], sizes = [5, 16, 128], strides = [1, 1, 1]} : vector<5x18x128xbf16> to vector<5x16x128xbf16>
    %27 = tpu.concatenate %24, %25, %26 in 2 : vector<5x16x128xbf16>, vector<5x16x128xbf16>, vector<5x16x128xbf16> -> vector<5x16x384xbf16>
    %28 = vector.shape_cast %27 : vector<5x16x384xbf16> to vector<80x384xbf16>
    %29 = arith.truncf %0 : vector<5x16x128xf32> to vector<5x16x128xbf16>
    %30 = tpu.concatenate %2, %29 in 1 : vector<5x2x128xbf16>, vector<5x16x128xbf16> -> vector<5x18x128xbf16>
    %31 = vector.extract_strided_slice %30 {offsets = [0, 0, 0], sizes = [5, 16, 128], strides = [1, 1, 1]} : vector<5x18x128xbf16> to vector<5x16x128xbf16>
    %32 = vector.extract_strided_slice %30 {offsets = [0, 1, 0], sizes = [5, 16, 128], strides = [1, 1, 1]} : vector<5x18x128xbf16> to vector<5x16x128xbf16>
    %33 = vector.extract_strided_slice %30 {offsets = [0, 2, 0], sizes = [5, 16, 128], strides = [1, 1, 1]} : vector<5x18x128xbf16> to vector<5x16x128xbf16>
    %34 = tpu.concatenate %31, %32, %33 in 2 : vector<5x16x128xbf16>, vector<5x16x128xbf16>, vector<5x16x128xbf16> -> vector<5x16x384xbf16>
    %35 = vector.shape_cast %34 : vector<5x16x384xbf16> to vector<80x384xbf16>
    %36 = tpu.concatenate %28, %35 in 0 : vector<80x384xbf16>, vector<80x384xbf16> -> vector<160x384xbf16>
    %37 = tpu.concatenate %9, %15 in 1 : vector<384x128xbf16>, vector<384x128xbf16> -> vector<384x256xbf16>
    %cst_14 = arith.constant dense<0.000000e+00> : vector<160x256xf32>
    %38 = tpu.matmul %36, %37, %cst_14 {dimension_numbers = #tpu.dot_dimension_numbers<[1], [0], [0], [1], [0, 0, 1, 1], [], []>} : vector<160x384xbf16>, vector<384x256xbf16>, vector<160x256xf32> -> vector<160x256xf32>
    %39 = vector.extract_strided_slice %38 {offsets = [0, 0], sizes = [80, 128], strides = [1, 1]} : vector<160x256xf32> to vector<80x128xf32>
    %40 = vector.broadcast %18 : vector<1x128xf32> to vector<80x128xf32>
    %41 = arith.addf %39, %40 : vector<80x128xf32>
    %42 = vector.shape_cast %41 : vector<80x128xf32> to vector<5x16x128xf32>
    %43 = vector.extract_strided_slice %38 {offsets = [80, 128], sizes = [80, 128], strides = [1, 1]} : vector<160x256xf32> to vector<80x128xf32>
    %44 = vector.broadcast %21 : vector<1x128xf32> to vector<80x128xf32>
    %45 = arith.addf %43, %44 : vector<80x128xf32>
    %46 = vector.shape_cast %45 : vector<80x128xf32> to vector<5x16x128xf32>
    %c1 = arith.constant 1 : index
    %c0_15 = arith.constant 0 : index
    %c0_16 = arith.constant 0 : index
    %47 = vector.load %arg2[%c1, %c0_15, %c0_16] : memref<9x144x128xbf16, #tpu.memory_space<vmem>>, vector<1x144x128xbf16>
    %48 = vector.shape_cast %47 : vector<1x144x128xbf16> to vector<144x128xbf16>
    %49 = vector.extract_strided_slice %48 {offsets = [0, 0], sizes = [48, 128], strides = [1, 1]} : vector<144x128xbf16> to vector<48x128xbf16>
    %50 = vector.extract_strided_slice %48 {offsets = [48, 0], sizes = [48, 128], strides = [1, 1]} : vector<144x128xbf16> to vector<48x128xbf16>
    %51 = vector.extract_strided_slice %48 {offsets = [96, 0], sizes = [48, 128], strides = [1, 1]} : vector<144x128xbf16> to vector<48x128xbf16>
    %52 = tpu.concatenate %49, %3, %50, %3, %51, %3 in 0 : vector<48x128xbf16>, vector<80x128xbf16>, vector<48x128xbf16>, vector<80x128xbf16>, vector<48x128xbf16>, vector<80x128xbf16> -> vector<384x128xbf16>
    %c1_17 = arith.constant 1 : index
    %c0_18 = arith.constant 0 : index
    %c0_19 = arith.constant 0 : index
    %53 = vector.load %arg4[%c1_17, %c0_18, %c0_19] : memref<9x144x128xbf16, #tpu.memory_space<vmem>>, vector<1x144x128xbf16>
    %54 = vector.shape_cast %53 : vector<1x144x128xbf16> to vector<144x128xbf16>
    %55 = vector.extract_strided_slice %54 {offsets = [0, 0], sizes = [48, 128], strides = [1, 1]} : vector<144x128xbf16> to vector<48x128xbf16>
    %56 = vector.extract_strided_slice %54 {offsets = [48, 0], sizes = [48, 128], strides = [1, 1]} : vector<144x128xbf16> to vector<48x128xbf16>
    %57 = vector.extract_strided_slice %54 {offsets = [96, 0], sizes = [48, 128], strides = [1, 1]} : vector<144x128xbf16> to vector<48x128xbf16>
    %58 = tpu.concatenate %55, %3, %56, %3, %57, %3 in 0 : vector<48x128xbf16>, vector<80x128xbf16>, vector<48x128xbf16>, vector<80x128xbf16>, vector<48x128xbf16>, vector<80x128xbf16> -> vector<384x128xbf16>
    %c1_20 = arith.constant 1 : index
    %c0_21 = arith.constant 0 : index
    %59 = vector.load %arg3[%c1_20, %c0_21] : memref<9x128xf32, #tpu.memory_space<vmem>>, vector<1x128xf32>
    %60 = vector.shape_cast %59 : vector<1x128xf32> to vector<128xf32>
    %61 = vector.shape_cast %60 : vector<128xf32> to vector<1x128xf32>
    %c1_22 = arith.constant 1 : index
    %c0_23 = arith.constant 0 : index
    %62 = vector.load %arg5[%c1_22, %c0_23] : memref<9x128xf32, #tpu.memory_space<vmem>>, vector<1x128xf32>
    %63 = vector.shape_cast %62 : vector<1x128xf32> to vector<128xf32>
    %64 = vector.shape_cast %63 : vector<128xf32> to vector<1x128xf32>
    %65 = arith.truncf %42 : vector<5x16x128xf32> to vector<5x16x128xbf16>
    %66 = tpu.concatenate %2, %65 in 1 : vector<5x2x128xbf16>, vector<5x16x128xbf16> -> vector<5x18x128xbf16>
    %67 = vector.extract_strided_slice %66 {offsets = [0, 0, 0], sizes = [5, 16, 128], strides = [1, 1, 1]} : vector<5x18x128xbf16> to vector<5x16x128xbf16>
    %68 = vector.extract_strided_slice %66 {offsets = [0, 1, 0], sizes = [5, 16, 128], strides = [1, 1, 1]} : vector<5x18x128xbf16> to vector<5x16x128xbf16>
    %69 = vector.extract_strided_slice %66 {offsets = [0, 2, 0], sizes = [5, 16, 128], strides = [1, 1, 1]} : vector<5x18x128xbf16> to vector<5x16x128xbf16>
    %70 = tpu.concatenate %67, %68, %69 in 2 : vector<5x16x128xbf16>, vector<5x16x128xbf16>, vector<5x16x128xbf16> -> vector<5x16x384xbf16>
    %71 = vector.shape_cast %70 : vector<5x16x384xbf16> to vector<80x384xbf16>
    %72 = arith.truncf %46 : vector<5x16x128xf32> to vector<5x16x128xbf16>
    %73 = tpu.concatenate %2, %72 in 1 : vector<5x2x128xbf16>, vector<5x16x128xbf16> -> vector<5x18x128xbf16>
    %74 = vector.extract_strided_slice %73 {offsets = [0, 0, 0], sizes = [5, 16, 128], strides = [1, 1, 1]} : vector<5x18x128xbf16> to vector<5x16x128xbf16>
    %75 = vector.extract_strided_slice %73 {offsets = [0, 1, 0], sizes = [5, 16, 128], strides = [1, 1, 1]} : vector<5x18x128xbf16> to vector<5x16x128xbf16>
    %76 = vector.extract_strided_slice %73 {offsets = [0, 2, 0], sizes = [5, 16, 128], strides = [1, 1, 1]} : vector<5x18x128xbf16> to vector<5x16x128xbf16>
    %77 = tpu.concatenate %74, %75, %76 in 2 : vector<5x16x128xbf16>, vector<5x16x128xbf16>, vector<5x16x128xbf16> -> vector<5x16x384xbf16>
    %78 = vector.shape_cast %77 : vector<5x16x384xbf16> to vector<80x384xbf16>
    %79 = tpu.concatenate %71, %78 in 0 : vector<80x384xbf16>, vector<80x384xbf16> -> vector<160x384xbf16>
    %80 = tpu.concatenate %52, %58 in 1 : vector<384x128xbf16>, vector<384x128xbf16> -> vector<384x256xbf16>
    %cst_24 = arith.constant dense<0.000000e+00> : vector<160x256xf32>
    %81 = tpu.matmul %79, %80, %cst_24 {dimension_numbers = #tpu.dot_dimension_numbers<[1], [0], [0], [1], [0, 0, 1, 1], [], []>} : vector<160x384xbf16>, vector<384x256xbf16>, vector<160x256xf32> -> vector<160x256xf32>
    %82 = vector.extract_strided_slice %81 {offsets = [0, 0], sizes = [80, 128], strides = [1, 1]} : vector<160x256xf32> to vector<80x128xf32>
    %83 = vector.broadcast %61 : vector<1x128xf32> to vector<80x128xf32>
    %84 = arith.addf %82, %83 : vector<80x128xf32>
    %85 = vector.shape_cast %84 : vector<80x128xf32> to vector<5x16x128xf32>
    %86 = vector.extract_strided_slice %81 {offsets = [80, 128], sizes = [80, 128], strides = [1, 1]} : vector<160x256xf32> to vector<80x128xf32>
    %87 = vector.broadcast %64 : vector<1x128xf32> to vector<80x128xf32>
    %88 = arith.addf %86, %87 : vector<80x128xf32>
    %89 = vector.shape_cast %88 : vector<80x128xf32> to vector<5x16x128xf32>
    %c2 = arith.constant 2 : index
    %c0_25 = arith.constant 0 : index
    %c0_26 = arith.constant 0 : index
    %90 = vector.load %arg2[%c2, %c0_25, %c0_26] : memref<9x144x128xbf16, #tpu.memory_space<vmem>>, vector<1x144x128xbf16>
    %91 = vector.shape_cast %90 : vector<1x144x128xbf16> to vector<144x128xbf16>
    %92 = vector.extract_strided_slice %91 {offsets = [0, 0], sizes = [48, 128], strides = [1, 1]} : vector<144x128xbf16> to vector<48x128xbf16>
    %93 = vector.extract_strided_slice %91 {offsets = [48, 0], sizes = [48, 128], strides = [1, 1]} : vector<144x128xbf16> to vector<48x128xbf16>
    %94 = vector.extract_strided_slice %91 {offsets = [96, 0], sizes = [48, 128], strides = [1, 1]} : vector<144x128xbf16> to vector<48x128xbf16>
    %95 = tpu.concatenate %92, %3, %93, %3, %94, %3 in 0 : vector<48x128xbf16>, vector<80x128xbf16>, vector<48x128xbf16>, vector<80x128xbf16>, vector<48x128xbf16>, vector<80x128xbf16> -> vector<384x128xbf16>
    %c2_27 = arith.constant 2 : index
    %c0_28 = arith.constant 0 : index
    %c0_29 = arith.constant 0 : index
    %96 = vector.load %arg4[%c2_27, %c0_28, %c0_29] : memref<9x144x128xbf16, #tpu.memory_space<vmem>>, vector<1x144x128xbf16>
    %97 = vector.shape_cast %96 : vector<1x144x128xbf16> to vector<144x128xbf16>
    %98 = vector.extract_strided_slice %97 {offsets = [0, 0], sizes = [48, 128], strides = [1, 1]} : vector<144x128xbf16> to vector<48x128xbf16>
    %99 = vector.extract_strided_slice %97 {offsets = [48, 0], sizes = [48, 128], strides = [1, 1]} : vector<144x128xbf16> to vector<48x128xbf16>
    %100 = vector.extract_strided_slice %97 {offsets = [96, 0], sizes = [48, 128], strides = [1, 1]} : vector<144x128xbf16> to vector<48x128xbf16>
    %101 = tpu.concatenate %98, %3, %99, %3, %100, %3 in 0 : vector<48x128xbf16>, vector<80x128xbf16>, vector<48x128xbf16>, vector<80x128xbf16>, vector<48x128xbf16>, vector<80x128xbf16> -> vector<384x128xbf16>
    %c2_30 = arith.constant 2 : index
    %c0_31 = arith.constant 0 : index
    %102 = vector.load %arg3[%c2_30, %c0_31] : memref<9x128xf32, #tpu.memory_space<vmem>>, vector<1x128xf32>
    %103 = vector.shape_cast %102 : vector<1x128xf32> to vector<128xf32>
    %104 = vector.shape_cast %103 : vector<128xf32> to vector<1x128xf32>
    %c2_32 = arith.constant 2 : index
    %c0_33 = arith.constant 0 : index
    %105 = vector.load %arg5[%c2_32, %c0_33] : memref<9x128xf32, #tpu.memory_space<vmem>>, vector<1x128xf32>
    %106 = vector.shape_cast %105 : vector<1x128xf32> to vector<128xf32>
    %107 = vector.shape_cast %106 : vector<128xf32> to vector<1x128xf32>
    %108 = arith.truncf %85 : vector<5x16x128xf32> to vector<5x16x128xbf16>
    %109 = tpu.concatenate %2, %108 in 1 : vector<5x2x128xbf16>, vector<5x16x128xbf16> -> vector<5x18x128xbf16>
    %110 = vector.extract_strided_slice %109 {offsets = [0, 0, 0], sizes = [5, 16, 128], strides = [1, 1, 1]} : vector<5x18x128xbf16> to vector<5x16x128xbf16>
    %111 = vector.extract_strided_slice %109 {offsets = [0, 1, 0], sizes = [5, 16, 128], strides = [1, 1, 1]} : vector<5x18x128xbf16> to vector<5x16x128xbf16>
    %112 = vector.extract_strided_slice %109 {offsets = [0, 2, 0], sizes = [5, 16, 128], strides = [1, 1, 1]} : vector<5x18x128xbf16> to vector<5x16x128xbf16>
    %113 = tpu.concatenate %110, %111, %112 in 2 : vector<5x16x128xbf16>, vector<5x16x128xbf16>, vector<5x16x128xbf16> -> vector<5x16x384xbf16>
    %114 = vector.shape_cast %113 : vector<5x16x384xbf16> to vector<80x384xbf16>
    %115 = arith.truncf %89 : vector<5x16x128xf32> to vector<5x16x128xbf16>
    %116 = tpu.concatenate %2, %115 in 1 : vector<5x2x128xbf16>, vector<5x16x128xbf16> -> vector<5x18x128xbf16>
    %117 = vector.extract_strided_slice %116 {offsets = [0, 0, 0], sizes = [5, 16, 128], strides = [1, 1, 1]} : vector<5x18x128xbf16> to vector<5x16x128xbf16>
    %118 = vector.extract_strided_slice %116 {offsets = [0, 1, 0], sizes = [5, 16, 128], strides = [1, 1, 1]} : vector<5x18x128xbf16> to vector<5x16x128xbf16>
    %119 = vector.extract_strided_slice %116 {offsets = [0, 2, 0], sizes = [5, 16, 128], strides = [1, 1, 1]} : vector<5x18x128xbf16> to vector<5x16x128xbf16>
    %120 = tpu.concatenate %117, %118, %119 in 2 : vector<5x16x128xbf16>, vector<5x16x128xbf16>, vector<5x16x128xbf16> -> vector<5x16x384xbf16>
    %121 = vector.shape_cast %120 : vector<5x16x384xbf16> to vector<80x384xbf16>
    %122 = tpu.concatenate %114, %121 in 0 : vector<80x384xbf16>, vector<80x384xbf16> -> vector<160x384xbf16>
    %123 = tpu.concatenate %95, %101 in 1 : vector<384x128xbf16>, vector<384x128xbf16> -> vector<384x256xbf16>
    %cst_34 = arith.constant dense<0.000000e+00> : vector<160x256xf32>
    %124 = tpu.matmul %122, %123, %cst_34 {dimension_numbers = #tpu.dot_dimension_numbers<[1], [0], [0], [1], [0, 0, 1, 1], [], []>} : vector<160x384xbf16>, vector<384x256xbf16>, vector<160x256xf32> -> vector<160x256xf32>
    %125 = vector.extract_strided_slice %124 {offsets = [0, 0], sizes = [80, 128], strides = [1, 1]} : vector<160x256xf32> to vector<80x128xf32>
    %126 = vector.broadcast %104 : vector<1x128xf32> to vector<80x128xf32>
    %127 = arith.addf %125, %126 : vector<80x128xf32>
    %128 = vector.shape_cast %127 : vector<80x128xf32> to vector<5x16x128xf32>
    %129 = vector.extract_strided_slice %124 {offsets = [80, 128], sizes = [80, 128], strides = [1, 1]} : vector<160x256xf32> to vector<80x128xf32>
    %130 = vector.broadcast %107 : vector<1x128xf32> to vector<80x128xf32>
    %131 = arith.addf %129, %130 : vector<80x128xf32>
    %132 = vector.shape_cast %131 : vector<80x128xf32> to vector<5x16x128xf32>
    %133 = arith.negf %128 : vector<5x16x128xf32>
    %134 = math.exp %133 : vector<5x16x128xf32>
    %cst_35 = arith.constant 1.000000e+00 : f32
    %135 = vector.broadcast %cst_35 : f32 to vector<5x16x128xf32>
    %136 = arith.addf %135, %134 : vector<5x16x128xf32>
    %137 = arith.divf %135, %136 : vector<5x16x128xf32>
    %138 = math.tanh %132 : vector<5x16x128xf32>
    %139 = arith.mulf %137, %138 : vector<5x16x128xf32>
    %140 = arith.addf %0, %139 : vector<5x16x128xf32>
    %141 = arith.addf %1, %140 : vector<5x16x128xf32>
    %c3 = arith.constant 3 : index
    %c0_36 = arith.constant 0 : index
    %c0_37 = arith.constant 0 : index
    %142 = vector.load %arg2[%c3, %c0_36, %c0_37] : memref<9x144x128xbf16, #tpu.memory_space<vmem>>, vector<1x144x128xbf16>
    %143 = vector.shape_cast %142 : vector<1x144x128xbf16> to vector<144x128xbf16>
    %144 = vector.extract_strided_slice %143 {offsets = [0, 0], sizes = [48, 128], strides = [1, 1]} : vector<144x128xbf16> to vector<48x128xbf16>
    %145 = vector.extract_strided_slice %143 {offsets = [48, 0], sizes = [48, 128], strides = [1, 1]} : vector<144x128xbf16> to vector<48x128xbf16>
    %146 = vector.extract_strided_slice %143 {offsets = [96, 0], sizes = [48, 128], strides = [1, 1]} : vector<144x128xbf16> to vector<48x128xbf16>
    %147 = tpu.concatenate %144, %3, %145, %3, %146, %3 in 0 : vector<48x128xbf16>, vector<80x128xbf16>, vector<48x128xbf16>, vector<80x128xbf16>, vector<48x128xbf16>, vector<80x128xbf16> -> vector<384x128xbf16>
    %c3_38 = arith.constant 3 : index
    %c0_39 = arith.constant 0 : index
    %c0_40 = arith.constant 0 : index
    %148 = vector.load %arg4[%c3_38, %c0_39, %c0_40] : memref<9x144x128xbf16, #tpu.memory_space<vmem>>, vector<1x144x128xbf16>
    %149 = vector.shape_cast %148 : vector<1x144x128xbf16> to vector<144x128xbf16>
    %150 = vector.extract_strided_slice %149 {offsets = [0, 0], sizes = [48, 128], strides = [1, 1]} : vector<144x128xbf16> to vector<48x128xbf16>
    %151 = vector.extract_strided_slice %149 {offsets = [48, 0], sizes = [48, 128], strides = [1, 1]} : vector<144x128xbf16> to vector<48x128xbf16>
    %152 = vector.extract_strided_slice %149 {offsets = [96, 0], sizes = [48, 128], strides = [1, 1]} : vector<144x128xbf16> to vector<48x128xbf16>
    %153 = tpu.concatenate %150, %3, %151, %3, %152, %3 in 0 : vector<48x128xbf16>, vector<80x128xbf16>, vector<48x128xbf16>, vector<80x128xbf16>, vector<48x128xbf16>, vector<80x128xbf16> -> vector<384x128xbf16>
    %c3_41 = arith.constant 3 : index
    %c0_42 = arith.constant 0 : index
    %154 = vector.load %arg3[%c3_41, %c0_42] : memref<9x128xf32, #tpu.memory_space<vmem>>, vector<1x128xf32>
    %155 = vector.shape_cast %154 : vector<1x128xf32> to vector<128xf32>
    %156 = vector.shape_cast %155 : vector<128xf32> to vector<1x128xf32>
    %c3_43 = arith.constant 3 : index
    %c0_44 = arith.constant 0 : index
    %157 = vector.load %arg5[%c3_43, %c0_44] : memref<9x128xf32, #tpu.memory_space<vmem>>, vector<1x128xf32>
    %158 = vector.shape_cast %157 : vector<1x128xf32> to vector<128xf32>
    %159 = vector.shape_cast %158 : vector<128xf32> to vector<1x128xf32>
    %160 = arith.truncf %140 : vector<5x16x128xf32> to vector<5x16x128xbf16>
    %161 = tpu.concatenate %2, %160 in 1 : vector<5x2x128xbf16>, vector<5x16x128xbf16> -> vector<5x18x128xbf16>
    %162 = vector.extract_strided_slice %161 {offsets = [0, 0, 0], sizes = [5, 16, 128], strides = [1, 1, 1]} : vector<5x18x128xbf16> to vector<5x16x128xbf16>
    %163 = vector.extract_strided_slice %161 {offsets = [0, 1, 0], sizes = [5, 16, 128], strides = [1, 1, 1]} : vector<5x18x128xbf16> to vector<5x16x128xbf16>
    %164 = vector.extract_strided_slice %161 {offsets = [0, 2, 0], sizes = [5, 16, 128], strides = [1, 1, 1]} : vector<5x18x128xbf16> to vector<5x16x128xbf16>
    %165 = tpu.concatenate %162, %163, %164 in 2 : vector<5x16x128xbf16>, vector<5x16x128xbf16>, vector<5x16x128xbf16> -> vector<5x16x384xbf16>
    %166 = vector.shape_cast %165 : vector<5x16x384xbf16> to vector<80x384xbf16>
    %167 = arith.truncf %140 : vector<5x16x128xf32> to vector<5x16x128xbf16>
    %168 = tpu.concatenate %2, %167 in 1 : vector<5x2x128xbf16>, vector<5x16x128xbf16> -> vector<5x18x128xbf16>
    %169 = vector.extract_strided_slice %168 {offsets = [0, 0, 0], sizes = [5, 16, 128], strides = [1, 1, 1]} : vector<5x18x128xbf16> to vector<5x16x128xbf16>
    %170 = vector.extract_strided_slice %168 {offsets = [0, 1, 0], sizes = [5, 16, 128], strides = [1, 1, 1]} : vector<5x18x128xbf16> to vector<5x16x128xbf16>
    %171 = vector.extract_strided_slice %168 {offsets = [0, 2, 0], sizes = [5, 16, 128], strides = [1, 1, 1]} : vector<5x18x128xbf16> to vector<5x16x128xbf16>
    %172 = tpu.concatenate %169, %170, %171 in 2 : vector<5x16x128xbf16>, vector<5x16x128xbf16>, vector<5x16x128xbf16> -> vector<5x16x384xbf16>
    %173 = vector.shape_cast %172 : vector<5x16x384xbf16> to vector<80x384xbf16>
    %174 = tpu.concatenate %166, %173 in 0 : vector<80x384xbf16>, vector<80x384xbf16> -> vector<160x384xbf16>
    %175 = tpu.concatenate %147, %153 in 1 : vector<384x128xbf16>, vector<384x128xbf16> -> vector<384x256xbf16>
    %cst_45 = arith.constant dense<0.000000e+00> : vector<160x256xf32>
    %176 = tpu.matmul %174, %175, %cst_45 {dimension_numbers = #tpu.dot_dimension_numbers<[1], [0], [0], [1], [0, 0, 1, 1], [], []>} : vector<160x384xbf16>, vector<384x256xbf16>, vector<160x256xf32> -> vector<160x256xf32>
    %177 = vector.extract_strided_slice %176 {offsets = [0, 0], sizes = [80, 128], strides = [1, 1]} : vector<160x256xf32> to vector<80x128xf32>
    %178 = vector.broadcast %156 : vector<1x128xf32> to vector<80x128xf32>
    %179 = arith.addf %177, %178 : vector<80x128xf32>
    %180 = vector.shape_cast %179 : vector<80x128xf32> to vector<5x16x128xf32>
    %181 = vector.extract_strided_slice %176 {offsets = [80, 128], sizes = [80, 128], strides = [1, 1]} : vector<160x256xf32> to vector<80x128xf32>
    %182 = vector.broadcast %159 : vector<1x128xf32> to vector<80x128xf32>
    %183 = arith.addf %181, %182 : vector<80x128xf32>
    %184 = vector.shape_cast %183 : vector<80x128xf32> to vector<5x16x128xf32>
    %c4 = arith.constant 4 : index
    %c0_46 = arith.constant 0 : index
    %c0_47 = arith.constant 0 : index
    %185 = vector.load %arg2[%c4, %c0_46, %c0_47] : memref<9x144x128xbf16, #tpu.memory_space<vmem>>, vector<1x144x128xbf16>
    %186 = vector.shape_cast %185 : vector<1x144x128xbf16> to vector<144x128xbf16>
    %187 = vector.extract_strided_slice %186 {offsets = [0, 0], sizes = [48, 128], strides = [1, 1]} : vector<144x128xbf16> to vector<48x128xbf16>
    %188 = vector.extract_strided_slice %186 {offsets = [48, 0], sizes = [48, 128], strides = [1, 1]} : vector<144x128xbf16> to vector<48x128xbf16>
    %189 = vector.extract_strided_slice %186 {offsets = [96, 0], sizes = [48, 128], strides = [1, 1]} : vector<144x128xbf16> to vector<48x128xbf16>
    %190 = tpu.concatenate %187, %3, %188, %3, %189, %3 in 0 : vector<48x128xbf16>, vector<80x128xbf16>, vector<48x128xbf16>, vector<80x128xbf16>, vector<48x128xbf16>, vector<80x128xbf16> -> vector<384x128xbf16>
    %c4_48 = arith.constant 4 : index
    %c0_49 = arith.constant 0 : index
    %c0_50 = arith.constant 0 : index
    %191 = vector.load %arg4[%c4_48, %c0_49, %c0_50] : memref<9x144x128xbf16, #tpu.memory_space<vmem>>, vector<1x144x128xbf16>
    %192 = vector.shape_cast %191 : vector<1x144x128xbf16> to vector<144x128xbf16>
    %193 = vector.extract_strided_slice %192 {offsets = [0, 0], sizes = [48, 128], strides = [1, 1]} : vector<144x128xbf16> to vector<48x128xbf16>
    %194 = vector.extract_strided_slice %192 {offsets = [48, 0], sizes = [48, 128], strides = [1, 1]} : vector<144x128xbf16> to vector<48x128xbf16>
    %195 = vector.extract_strided_slice %192 {offsets = [96, 0], sizes = [48, 128], strides = [1, 1]} : vector<144x128xbf16> to vector<48x128xbf16>
    %196 = tpu.concatenate %193, %3, %194, %3, %195, %3 in 0 : vector<48x128xbf16>, vector<80x128xbf16>, vector<48x128xbf16>, vector<80x128xbf16>, vector<48x128xbf16>, vector<80x128xbf16> -> vector<384x128xbf16>
    %c4_51 = arith.constant 4 : index
    %c0_52 = arith.constant 0 : index
    %197 = vector.load %arg3[%c4_51, %c0_52] : memref<9x128xf32, #tpu.memory_space<vmem>>, vector<1x128xf32>
    %198 = vector.shape_cast %197 : vector<1x128xf32> to vector<128xf32>
    %199 = vector.shape_cast %198 : vector<128xf32> to vector<1x128xf32>
    %c4_53 = arith.constant 4 : index
    %c0_54 = arith.constant 0 : index
    %200 = vector.load %arg5[%c4_53, %c0_54] : memref<9x128xf32, #tpu.memory_space<vmem>>, vector<1x128xf32>
    %201 = vector.shape_cast %200 : vector<1x128xf32> to vector<128xf32>
    %202 = vector.shape_cast %201 : vector<128xf32> to vector<1x128xf32>
    %203 = arith.truncf %180 : vector<5x16x128xf32> to vector<5x16x128xbf16>
    %204 = tpu.concatenate %2, %203 in 1 : vector<5x2x128xbf16>, vector<5x16x128xbf16> -> vector<5x18x128xbf16>
    %205 = vector.extract_strided_slice %204 {offsets = [0, 0, 0], sizes = [5, 16, 128], strides = [1, 1, 1]} : vector<5x18x128xbf16> to vector<5x16x128xbf16>
    %206 = vector.extract_strided_slice %204 {offsets = [0, 1, 0], sizes = [5, 16, 128], strides = [1, 1, 1]} : vector<5x18x128xbf16> to vector<5x16x128xbf16>
    %207 = vector.extract_strided_slice %204 {offsets = [0, 2, 0], sizes = [5, 16, 128], strides = [1, 1, 1]} : vector<5x18x128xbf16> to vector<5x16x128xbf16>
    %208 = tpu.concatenate %205, %206, %207 in 2 : vector<5x16x128xbf16>, vector<5x16x128xbf16>, vector<5x16x128xbf16> -> vector<5x16x384xbf16>
    %209 = vector.shape_cast %208 : vector<5x16x384xbf16> to vector<80x384xbf16>
    %210 = arith.truncf %184 : vector<5x16x128xf32> to vector<5x16x128xbf16>
    %211 = tpu.concatenate %2, %210 in 1 : vector<5x2x128xbf16>, vector<5x16x128xbf16> -> vector<5x18x128xbf16>
    %212 = vector.extract_strided_slice %211 {offsets = [0, 0, 0], sizes = [5, 16, 128], strides = [1, 1, 1]} : vector<5x18x128xbf16> to vector<5x16x128xbf16>
    %213 = vector.extract_strided_slice %211 {offsets = [0, 1, 0], sizes = [5, 16, 128], strides = [1, 1, 1]} : vector<5x18x128xbf16> to vector<5x16x128xbf16>
    %214 = vector.extract_strided_slice %211 {offsets = [0, 2, 0], sizes = [5, 16, 128], strides = [1, 1, 1]} : vector<5x18x128xbf16> to vector<5x16x128xbf16>
    %215 = tpu.concatenate %212, %213, %214 in 2 : vector<5x16x128xbf16>, vector<5x16x128xbf16>, vector<5x16x128xbf16> -> vector<5x16x384xbf16>
    %216 = vector.shape_cast %215 : vector<5x16x384xbf16> to vector<80x384xbf16>
    %217 = tpu.concatenate %209, %216 in 0 : vector<80x384xbf16>, vector<80x384xbf16> -> vector<160x384xbf16>
    %218 = tpu.concatenate %190, %196 in 1 : vector<384x128xbf16>, vector<384x128xbf16> -> vector<384x256xbf16>
    %cst_55 = arith.constant dense<0.000000e+00> : vector<160x256xf32>
    %219 = tpu.matmul %217, %218, %cst_55 {dimension_numbers = #tpu.dot_dimension_numbers<[1], [0], [0], [1], [0, 0, 1, 1], [], []>} : vector<160x384xbf16>, vector<384x256xbf16>, vector<160x256xf32> -> vector<160x256xf32>
    %220 = vector.extract_strided_slice %219 {offsets = [0, 0], sizes = [80, 128], strides = [1, 1]} : vector<160x256xf32> to vector<80x128xf32>
    %221 = vector.broadcast %199 : vector<1x128xf32> to vector<80x128xf32>
    %222 = arith.addf %220, %221 : vector<80x128xf32>
    %223 = vector.shape_cast %222 : vector<80x128xf32> to vector<5x16x128xf32>
    %224 = vector.extract_strided_slice %219 {offsets = [80, 128], sizes = [80, 128], strides = [1, 1]} : vector<160x256xf32> to vector<80x128xf32>
    %225 = vector.broadcast %202 : vector<1x128xf32> to vector<80x128xf32>
    %226 = arith.addf %224, %225 : vector<80x128xf32>
    %227 = vector.shape_cast %226 : vector<80x128xf32> to vector<5x16x128xf32>
    %c5 = arith.constant 5 : index
    %c0_56 = arith.constant 0 : index
    %c0_57 = arith.constant 0 : index
    %228 = vector.load %arg2[%c5, %c0_56, %c0_57] : memref<9x144x128xbf16, #tpu.memory_space<vmem>>, vector<1x144x128xbf16>
    %229 = vector.shape_cast %228 : vector<1x144x128xbf16> to vector<144x128xbf16>
    %230 = vector.extract_strided_slice %229 {offsets = [0, 0], sizes = [48, 128], strides = [1, 1]} : vector<144x128xbf16> to vector<48x128xbf16>
    %231 = vector.extract_strided_slice %229 {offsets = [48, 0], sizes = [48, 128], strides = [1, 1]} : vector<144x128xbf16> to vector<48x128xbf16>
    %232 = vector.extract_strided_slice %229 {offsets = [96, 0], sizes = [48, 128], strides = [1, 1]} : vector<144x128xbf16> to vector<48x128xbf16>
    %233 = tpu.concatenate %230, %3, %231, %3, %232, %3 in 0 : vector<48x128xbf16>, vector<80x128xbf16>, vector<48x128xbf16>, vector<80x128xbf16>, vector<48x128xbf16>, vector<80x128xbf16> -> vector<384x128xbf16>
    %c5_58 = arith.constant 5 : index
    %c0_59 = arith.constant 0 : index
    %c0_60 = arith.constant 0 : index
    %234 = vector.load %arg4[%c5_58, %c0_59, %c0_60] : memref<9x144x128xbf16, #tpu.memory_space<vmem>>, vector<1x144x128xbf16>
    %235 = vector.shape_cast %234 : vector<1x144x128xbf16> to vector<144x128xbf16>
    %236 = vector.extract_strided_slice %235 {offsets = [0, 0], sizes = [48, 128], strides = [1, 1]} : vector<144x128xbf16> to vector<48x128xbf16>
    %237 = vector.extract_strided_slice %235 {offsets = [48, 0], sizes = [48, 128], strides = [1, 1]} : vector<144x128xbf16> to vector<48x128xbf16>
    %238 = vector.extract_strided_slice %235 {offsets = [96, 0], sizes = [48, 128], strides = [1, 1]} : vector<144x128xbf16> to vector<48x128xbf16>
    %239 = tpu.concatenate %236, %3, %237, %3, %238, %3 in 0 : vector<48x128xbf16>, vector<80x128xbf16>, vector<48x128xbf16>, vector<80x128xbf16>, vector<48x128xbf16>, vector<80x128xbf16> -> vector<384x128xbf16>
    %c5_61 = arith.constant 5 : index
    %c0_62 = arith.constant 0 : index
    %240 = vector.load %arg3[%c5_61, %c0_62] : memref<9x128xf32, #tpu.memory_space<vmem>>, vector<1x128xf32>
    %241 = vector.shape_cast %240 : vector<1x128xf32> to vector<128xf32>
    %242 = vector.shape_cast %241 : vector<128xf32> to vector<1x128xf32>
    %c5_63 = arith.constant 5 : index
    %c0_64 = arith.constant 0 : index
    %243 = vector.load %arg5[%c5_63, %c0_64] : memref<9x128xf32, #tpu.memory_space<vmem>>, vector<1x128xf32>
    %244 = vector.shape_cast %243 : vector<1x128xf32> to vector<128xf32>
    %245 = vector.shape_cast %244 : vector<128xf32> to vector<1x128xf32>
    %246 = arith.truncf %223 : vector<5x16x128xf32> to vector<5x16x128xbf16>
    %247 = tpu.concatenate %2, %246 in 1 : vector<5x2x128xbf16>, vector<5x16x128xbf16> -> vector<5x18x128xbf16>
    %248 = vector.extract_strided_slice %247 {offsets = [0, 0, 0], sizes = [5, 16, 128], strides = [1, 1, 1]} : vector<5x18x128xbf16> to vector<5x16x128xbf16>
    %249 = vector.extract_strided_slice %247 {offsets = [0, 1, 0], sizes = [5, 16, 128], strides = [1, 1, 1]} : vector<5x18x128xbf16> to vector<5x16x128xbf16>
    %250 = vector.extract_strided_slice %247 {offsets = [0, 2, 0], sizes = [5, 16, 128], strides = [1, 1, 1]} : vector<5x18x128xbf16> to vector<5x16x128xbf16>
    %251 = tpu.concatenate %248, %249, %250 in 2 : vector<5x16x128xbf16>, vector<5x16x128xbf16>, vector<5x16x128xbf16> -> vector<5x16x384xbf16>
    %252 = vector.shape_cast %251 : vector<5x16x384xbf16> to vector<80x384xbf16>
    %253 = arith.truncf %227 : vector<5x16x128xf32> to vector<5x16x128xbf16>
    %254 = tpu.concatenate %2, %253 in 1 : vector<5x2x128xbf16>, vector<5x16x128xbf16> -> vector<5x18x128xbf16>
    %255 = vector.extract_strided_slice %254 {offsets = [0, 0, 0], sizes = [5, 16, 128], strides = [1, 1, 1]} : vector<5x18x128xbf16> to vector<5x16x128xbf16>
    %256 = vector.extract_strided_slice %254 {offsets = [0, 1, 0], sizes = [5, 16, 128], strides = [1, 1, 1]} : vector<5x18x128xbf16> to vector<5x16x128xbf16>
    %257 = vector.extract_strided_slice %254 {offsets = [0, 2, 0], sizes = [5, 16, 128], strides = [1, 1, 1]} : vector<5x18x128xbf16> to vector<5x16x128xbf16>
    %258 = tpu.concatenate %255, %256, %257 in 2 : vector<5x16x128xbf16>, vector<5x16x128xbf16>, vector<5x16x128xbf16> -> vector<5x16x384xbf16>
    %259 = vector.shape_cast %258 : vector<5x16x384xbf16> to vector<80x384xbf16>
    %260 = tpu.concatenate %252, %259 in 0 : vector<80x384xbf16>, vector<80x384xbf16> -> vector<160x384xbf16>
    %261 = tpu.concatenate %233, %239 in 1 : vector<384x128xbf16>, vector<384x128xbf16> -> vector<384x256xbf16>
    %cst_65 = arith.constant dense<0.000000e+00> : vector<160x256xf32>
    %262 = tpu.matmul %260, %261, %cst_65 {dimension_numbers = #tpu.dot_dimension_numbers<[1], [0], [0], [1], [0, 0, 1, 1], [], []>} : vector<160x384xbf16>, vector<384x256xbf16>, vector<160x256xf32> -> vector<160x256xf32>
    %263 = vector.extract_strided_slice %262 {offsets = [0, 0], sizes = [80, 128], strides = [1, 1]} : vector<160x256xf32> to vector<80x128xf32>
    %264 = vector.broadcast %242 : vector<1x128xf32> to vector<80x128xf32>
    %265 = arith.addf %263, %264 : vector<80x128xf32>
    %266 = vector.shape_cast %265 : vector<80x128xf32> to vector<5x16x128xf32>
    %267 = vector.extract_strided_slice %262 {offsets = [80, 128], sizes = [80, 128], strides = [1, 1]} : vector<160x256xf32> to vector<80x128xf32>
    %268 = vector.broadcast %245 : vector<1x128xf32> to vector<80x128xf32>
    %269 = arith.addf %267, %268 : vector<80x128xf32>
    %270 = vector.shape_cast %269 : vector<80x128xf32> to vector<5x16x128xf32>
    %271 = arith.negf %266 : vector<5x16x128xf32>
    %272 = math.exp %271 : vector<5x16x128xf32>
    %cst_66 = arith.constant 1.000000e+00 : f32
    %273 = vector.broadcast %cst_66 : f32 to vector<5x16x128xf32>
    %274 = arith.addf %273, %272 : vector<5x16x128xf32>
    %275 = arith.divf %273, %274 : vector<5x16x128xf32>
    %276 = math.tanh %270 : vector<5x16x128xf32>
    %277 = arith.mulf %275, %276 : vector<5x16x128xf32>
    %278 = arith.addf %140, %277 : vector<5x16x128xf32>
    %279 = arith.addf %141, %278 : vector<5x16x128xf32>
    %c6 = arith.constant 6 : index
    %c0_67 = arith.constant 0 : index
    %c0_68 = arith.constant 0 : index
    %280 = vector.load %arg2[%c6, %c0_67, %c0_68] : memref<9x144x128xbf16, #tpu.memory_space<vmem>>, vector<1x144x128xbf16>
    %281 = vector.shape_cast %280 : vector<1x144x128xbf16> to vector<144x128xbf16>
    %282 = vector.extract_strided_slice %281 {offsets = [0, 0], sizes = [48, 128], strides = [1, 1]} : vector<144x128xbf16> to vector<48x128xbf16>
    %283 = vector.extract_strided_slice %281 {offsets = [48, 0], sizes = [48, 128], strides = [1, 1]} : vector<144x128xbf16> to vector<48x128xbf16>
    %284 = vector.extract_strided_slice %281 {offsets = [96, 0], sizes = [48, 128], strides = [1, 1]} : vector<144x128xbf16> to vector<48x128xbf16>
    %285 = tpu.concatenate %282, %3, %283, %3, %284, %3 in 0 : vector<48x128xbf16>, vector<80x128xbf16>, vector<48x128xbf16>, vector<80x128xbf16>, vector<48x128xbf16>, vector<80x128xbf16> -> vector<384x128xbf16>
    %c6_69 = arith.constant 6 : index
    %c0_70 = arith.constant 0 : index
    %c0_71 = arith.constant 0 : index
    %286 = vector.load %arg4[%c6_69, %c0_70, %c0_71] : memref<9x144x128xbf16, #tpu.memory_space<vmem>>, vector<1x144x128xbf16>
    %287 = vector.shape_cast %286 : vector<1x144x128xbf16> to vector<144x128xbf16>
    %288 = vector.extract_strided_slice %287 {offsets = [0, 0], sizes = [48, 128], strides = [1, 1]} : vector<144x128xbf16> to vector<48x128xbf16>
    %289 = vector.extract_strided_slice %287 {offsets = [48, 0], sizes = [48, 128], strides = [1, 1]} : vector<144x128xbf16> to vector<48x128xbf16>
    %290 = vector.extract_strided_slice %287 {offsets = [96, 0], sizes = [48, 128], strides = [1, 1]} : vector<144x128xbf16> to vector<48x128xbf16>
    %291 = tpu.concatenate %288, %3, %289, %3, %290, %3 in 0 : vector<48x128xbf16>, vector<80x128xbf16>, vector<48x128xbf16>, vector<80x128xbf16>, vector<48x128xbf16>, vector<80x128xbf16> -> vector<384x128xbf16>
    %c6_72 = arith.constant 6 : index
    %c0_73 = arith.constant 0 : index
    %292 = vector.load %arg3[%c6_72, %c0_73] : memref<9x128xf32, #tpu.memory_space<vmem>>, vector<1x128xf32>
    %293 = vector.shape_cast %292 : vector<1x128xf32> to vector<128xf32>
    %294 = vector.shape_cast %293 : vector<128xf32> to vector<1x128xf32>
    %c6_74 = arith.constant 6 : index
    %c0_75 = arith.constant 0 : index
    %295 = vector.load %arg5[%c6_74, %c0_75] : memref<9x128xf32, #tpu.memory_space<vmem>>, vector<1x128xf32>
    %296 = vector.shape_cast %295 : vector<1x128xf32> to vector<128xf32>
    %297 = vector.shape_cast %296 : vector<128xf32> to vector<1x128xf32>
    %298 = arith.truncf %278 : vector<5x16x128xf32> to vector<5x16x128xbf16>
    %299 = tpu.concatenate %2, %298 in 1 : vector<5x2x128xbf16>, vector<5x16x128xbf16> -> vector<5x18x128xbf16>
    %300 = vector.extract_strided_slice %299 {offsets = [0, 0, 0], sizes = [5, 16, 128], strides = [1, 1, 1]} : vector<5x18x128xbf16> to vector<5x16x128xbf16>
    %301 = vector.extract_strided_slice %299 {offsets = [0, 1, 0], sizes = [5, 16, 128], strides = [1, 1, 1]} : vector<5x18x128xbf16> to vector<5x16x128xbf16>
    %302 = vector.extract_strided_slice %299 {offsets = [0, 2, 0], sizes = [5, 16, 128], strides = [1, 1, 1]} : vector<5x18x128xbf16> to vector<5x16x128xbf16>
    %303 = tpu.concatenate %300, %301, %302 in 2 : vector<5x16x128xbf16>, vector<5x16x128xbf16>, vector<5x16x128xbf16> -> vector<5x16x384xbf16>
    %304 = vector.shape_cast %303 : vector<5x16x384xbf16> to vector<80x384xbf16>
    %305 = arith.truncf %278 : vector<5x16x128xf32> to vector<5x16x128xbf16>
    %306 = tpu.concatenate %2, %305 in 1 : vector<5x2x128xbf16>, vector<5x16x128xbf16> -> vector<5x18x128xbf16>
    %307 = vector.extract_strided_slice %306 {offsets = [0, 0, 0], sizes = [5, 16, 128], strides = [1, 1, 1]} : vector<5x18x128xbf16> to vector<5x16x128xbf16>
    %308 = vector.extract_strided_slice %306 {offsets = [0, 1, 0], sizes = [5, 16, 128], strides = [1, 1, 1]} : vector<5x18x128xbf16> to vector<5x16x128xbf16>
    %309 = vector.extract_strided_slice %306 {offsets = [0, 2, 0], sizes = [5, 16, 128], strides = [1, 1, 1]} : vector<5x18x128xbf16> to vector<5x16x128xbf16>
    %310 = tpu.concatenate %307, %308, %309 in 2 : vector<5x16x128xbf16>, vector<5x16x128xbf16>, vector<5x16x128xbf16> -> vector<5x16x384xbf16>
    %311 = vector.shape_cast %310 : vector<5x16x384xbf16> to vector<80x384xbf16>
    %312 = tpu.concatenate %304, %311 in 0 : vector<80x384xbf16>, vector<80x384xbf16> -> vector<160x384xbf16>
    %313 = tpu.concatenate %285, %291 in 1 : vector<384x128xbf16>, vector<384x128xbf16> -> vector<384x256xbf16>
    %cst_76 = arith.constant dense<0.000000e+00> : vector<160x256xf32>
    %314 = tpu.matmul %312, %313, %cst_76 {dimension_numbers = #tpu.dot_dimension_numbers<[1], [0], [0], [1], [0, 0, 1, 1], [], []>} : vector<160x384xbf16>, vector<384x256xbf16>, vector<160x256xf32> -> vector<160x256xf32>
    %315 = vector.extract_strided_slice %314 {offsets = [0, 0], sizes = [80, 128], strides = [1, 1]} : vector<160x256xf32> to vector<80x128xf32>
    %316 = vector.broadcast %294 : vector<1x128xf32> to vector<80x128xf32>
    %317 = arith.addf %315, %316 : vector<80x128xf32>
    %318 = vector.shape_cast %317 : vector<80x128xf32> to vector<5x16x128xf32>
    %319 = vector.extract_strided_slice %314 {offsets = [80, 128], sizes = [80, 128], strides = [1, 1]} : vector<160x256xf32> to vector<80x128xf32>
    %320 = vector.broadcast %297 : vector<1x128xf32> to vector<80x128xf32>
    %321 = arith.addf %319, %320 : vector<80x128xf32>
    %322 = vector.shape_cast %321 : vector<80x128xf32> to vector<5x16x128xf32>
    %c7 = arith.constant 7 : index
    %c0_77 = arith.constant 0 : index
    %c0_78 = arith.constant 0 : index
    %323 = vector.load %arg2[%c7, %c0_77, %c0_78] : memref<9x144x128xbf16, #tpu.memory_space<vmem>>, vector<1x144x128xbf16>
    %324 = vector.shape_cast %323 : vector<1x144x128xbf16> to vector<144x128xbf16>
    %325 = vector.extract_strided_slice %324 {offsets = [0, 0], sizes = [48, 128], strides = [1, 1]} : vector<144x128xbf16> to vector<48x128xbf16>
    %326 = vector.extract_strided_slice %324 {offsets = [48, 0], sizes = [48, 128], strides = [1, 1]} : vector<144x128xbf16> to vector<48x128xbf16>
    %327 = vector.extract_strided_slice %324 {offsets = [96, 0], sizes = [48, 128], strides = [1, 1]} : vector<144x128xbf16> to vector<48x128xbf16>
    %328 = tpu.concatenate %325, %3, %326, %3, %327, %3 in 0 : vector<48x128xbf16>, vector<80x128xbf16>, vector<48x128xbf16>, vector<80x128xbf16>, vector<48x128xbf16>, vector<80x128xbf16> -> vector<384x128xbf16>
    %c7_79 = arith.constant 7 : index
    %c0_80 = arith.constant 0 : index
    %c0_81 = arith.constant 0 : index
    %329 = vector.load %arg4[%c7_79, %c0_80, %c0_81] : memref<9x144x128xbf16, #tpu.memory_space<vmem>>, vector<1x144x128xbf16>
    %330 = vector.shape_cast %329 : vector<1x144x128xbf16> to vector<144x128xbf16>
    %331 = vector.extract_strided_slice %330 {offsets = [0, 0], sizes = [48, 128], strides = [1, 1]} : vector<144x128xbf16> to vector<48x128xbf16>
    %332 = vector.extract_strided_slice %330 {offsets = [48, 0], sizes = [48, 128], strides = [1, 1]} : vector<144x128xbf16> to vector<48x128xbf16>
    %333 = vector.extract_strided_slice %330 {offsets = [96, 0], sizes = [48, 128], strides = [1, 1]} : vector<144x128xbf16> to vector<48x128xbf16>
    %334 = tpu.concatenate %331, %3, %332, %3, %333, %3 in 0 : vector<48x128xbf16>, vector<80x128xbf16>, vector<48x128xbf16>, vector<80x128xbf16>, vector<48x128xbf16>, vector<80x128xbf16> -> vector<384x128xbf16>
    %c7_82 = arith.constant 7 : index
    %c0_83 = arith.constant 0 : index
    %335 = vector.load %arg3[%c7_82, %c0_83] : memref<9x128xf32, #tpu.memory_space<vmem>>, vector<1x128xf32>
    %336 = vector.shape_cast %335 : vector<1x128xf32> to vector<128xf32>
    %337 = vector.shape_cast %336 : vector<128xf32> to vector<1x128xf32>
    %c7_84 = arith.constant 7 : index
    %c0_85 = arith.constant 0 : index
    %338 = vector.load %arg5[%c7_84, %c0_85] : memref<9x128xf32, #tpu.memory_space<vmem>>, vector<1x128xf32>
    %339 = vector.shape_cast %338 : vector<1x128xf32> to vector<128xf32>
    %340 = vector.shape_cast %339 : vector<128xf32> to vector<1x128xf32>
    %341 = arith.truncf %318 : vector<5x16x128xf32> to vector<5x16x128xbf16>
    %342 = tpu.concatenate %2, %341 in 1 : vector<5x2x128xbf16>, vector<5x16x128xbf16> -> vector<5x18x128xbf16>
    %343 = vector.extract_strided_slice %342 {offsets = [0, 0, 0], sizes = [5, 16, 128], strides = [1, 1, 1]} : vector<5x18x128xbf16> to vector<5x16x128xbf16>
    %344 = vector.extract_strided_slice %342 {offsets = [0, 1, 0], sizes = [5, 16, 128], strides = [1, 1, 1]} : vector<5x18x128xbf16> to vector<5x16x128xbf16>
    %345 = vector.extract_strided_slice %342 {offsets = [0, 2, 0], sizes = [5, 16, 128], strides = [1, 1, 1]} : vector<5x18x128xbf16> to vector<5x16x128xbf16>
    %346 = tpu.concatenate %343, %344, %345 in 2 : vector<5x16x128xbf16>, vector<5x16x128xbf16>, vector<5x16x128xbf16> -> vector<5x16x384xbf16>
    %347 = vector.shape_cast %346 : vector<5x16x384xbf16> to vector<80x384xbf16>
    %348 = arith.truncf %322 : vector<5x16x128xf32> to vector<5x16x128xbf16>
    %349 = tpu.concatenate %2, %348 in 1 : vector<5x2x128xbf16>, vector<5x16x128xbf16> -> vector<5x18x128xbf16>
    %350 = vector.extract_strided_slice %349 {offsets = [0, 0, 0], sizes = [5, 16, 128], strides = [1, 1, 1]} : vector<5x18x128xbf16> to vector<5x16x128xbf16>
    %351 = vector.extract_strided_slice %349 {offsets = [0, 1, 0], sizes = [5, 16, 128], strides = [1, 1, 1]} : vector<5x18x128xbf16> to vector<5x16x128xbf16>
    %352 = vector.extract_strided_slice %349 {offsets = [0, 2, 0], sizes = [5, 16, 128], strides = [1, 1, 1]} : vector<5x18x128xbf16> to vector<5x16x128xbf16>
    %353 = tpu.concatenate %350, %351, %352 in 2 : vector<5x16x128xbf16>, vector<5x16x128xbf16>, vector<5x16x128xbf16> -> vector<5x16x384xbf16>
    %354 = vector.shape_cast %353 : vector<5x16x384xbf16> to vector<80x384xbf16>
    %355 = tpu.concatenate %347, %354 in 0 : vector<80x384xbf16>, vector<80x384xbf16> -> vector<160x384xbf16>
    %356 = tpu.concatenate %328, %334 in 1 : vector<384x128xbf16>, vector<384x128xbf16> -> vector<384x256xbf16>
    %cst_86 = arith.constant dense<0.000000e+00> : vector<160x256xf32>
    %357 = tpu.matmul %355, %356, %cst_86 {dimension_numbers = #tpu.dot_dimension_numbers<[1], [0], [0], [1], [0, 0, 1, 1], [], []>} : vector<160x384xbf16>, vector<384x256xbf16>, vector<160x256xf32> -> vector<160x256xf32>
    %358 = vector.extract_strided_slice %357 {offsets = [0, 0], sizes = [80, 128], strides = [1, 1]} : vector<160x256xf32> to vector<80x128xf32>
    %359 = vector.broadcast %337 : vector<1x128xf32> to vector<80x128xf32>
    %360 = arith.addf %358, %359 : vector<80x128xf32>
    %361 = vector.shape_cast %360 : vector<80x128xf32> to vector<5x16x128xf32>
    %362 = vector.extract_strided_slice %357 {offsets = [80, 128], sizes = [80, 128], strides = [1, 1]} : vector<160x256xf32> to vector<80x128xf32>
    %363 = vector.broadcast %340 : vector<1x128xf32> to vector<80x128xf32>
    %364 = arith.addf %362, %363 : vector<80x128xf32>
    %365 = vector.shape_cast %364 : vector<80x128xf32> to vector<5x16x128xf32>
    %c8 = arith.constant 8 : index
    %c0_87 = arith.constant 0 : index
    %c0_88 = arith.constant 0 : index
    %366 = vector.load %arg2[%c8, %c0_87, %c0_88] : memref<9x144x128xbf16, #tpu.memory_space<vmem>>, vector<1x144x128xbf16>
    %367 = vector.shape_cast %366 : vector<1x144x128xbf16> to vector<144x128xbf16>
    %368 = vector.extract_strided_slice %367 {offsets = [0, 0], sizes = [48, 128], strides = [1, 1]} : vector<144x128xbf16> to vector<48x128xbf16>
    %369 = vector.extract_strided_slice %367 {offsets = [48, 0], sizes = [48, 128], strides = [1, 1]} : vector<144x128xbf16> to vector<48x128xbf16>
    %370 = vector.extract_strided_slice %367 {offsets = [96, 0], sizes = [48, 128], strides = [1, 1]} : vector<144x128xbf16> to vector<48x128xbf16>
    %371 = tpu.concatenate %368, %3, %369, %3, %370, %3 in 0 : vector<48x128xbf16>, vector<80x128xbf16>, vector<48x128xbf16>, vector<80x128xbf16>, vector<48x128xbf16>, vector<80x128xbf16> -> vector<384x128xbf16>
    %c8_89 = arith.constant 8 : index
    %c0_90 = arith.constant 0 : index
    %c0_91 = arith.constant 0 : index
    %372 = vector.load %arg4[%c8_89, %c0_90, %c0_91] : memref<9x144x128xbf16, #tpu.memory_space<vmem>>, vector<1x144x128xbf16>
    %373 = vector.shape_cast %372 : vector<1x144x128xbf16> to vector<144x128xbf16>
    %374 = vector.extract_strided_slice %373 {offsets = [0, 0], sizes = [48, 128], strides = [1, 1]} : vector<144x128xbf16> to vector<48x128xbf16>
    %375 = vector.extract_strided_slice %373 {offsets = [48, 0], sizes = [48, 128], strides = [1, 1]} : vector<144x128xbf16> to vector<48x128xbf16>
    %376 = vector.extract_strided_slice %373 {offsets = [96, 0], sizes = [48, 128], strides = [1, 1]} : vector<144x128xbf16> to vector<48x128xbf16>
    %377 = tpu.concatenate %374, %3, %375, %3, %376, %3 in 0 : vector<48x128xbf16>, vector<80x128xbf16>, vector<48x128xbf16>, vector<80x128xbf16>, vector<48x128xbf16>, vector<80x128xbf16> -> vector<384x128xbf16>
    %c8_92 = arith.constant 8 : index
    %c0_93 = arith.constant 0 : index
    %378 = vector.load %arg3[%c8_92, %c0_93] : memref<9x128xf32, #tpu.memory_space<vmem>>, vector<1x128xf32>
    %379 = vector.shape_cast %378 : vector<1x128xf32> to vector<128xf32>
    %380 = vector.shape_cast %379 : vector<128xf32> to vector<1x128xf32>
    %c8_94 = arith.constant 8 : index
    %c0_95 = arith.constant 0 : index
    %381 = vector.load %arg5[%c8_94, %c0_95] : memref<9x128xf32, #tpu.memory_space<vmem>>, vector<1x128xf32>
    %382 = vector.shape_cast %381 : vector<1x128xf32> to vector<128xf32>
    %383 = vector.shape_cast %382 : vector<128xf32> to vector<1x128xf32>
    %384 = arith.truncf %361 : vector<5x16x128xf32> to vector<5x16x128xbf16>
    %385 = tpu.concatenate %2, %384 in 1 : vector<5x2x128xbf16>, vector<5x16x128xbf16> -> vector<5x18x128xbf16>
    %386 = vector.extract_strided_slice %385 {offsets = [0, 0, 0], sizes = [5, 16, 128], strides = [1, 1, 1]} : vector<5x18x128xbf16> to vector<5x16x128xbf16>
    %387 = vector.extract_strided_slice %385 {offsets = [0, 1, 0], sizes = [5, 16, 128], strides = [1, 1, 1]} : vector<5x18x128xbf16> to vector<5x16x128xbf16>
    %388 = vector.extract_strided_slice %385 {offsets = [0, 2, 0], sizes = [5, 16, 128], strides = [1, 1, 1]} : vector<5x18x128xbf16> to vector<5x16x128xbf16>
    %389 = tpu.concatenate %386, %387, %388 in 2 : vector<5x16x128xbf16>, vector<5x16x128xbf16>, vector<5x16x128xbf16> -> vector<5x16x384xbf16>
    %390 = vector.shape_cast %389 : vector<5x16x384xbf16> to vector<80x384xbf16>
    %391 = arith.truncf %365 : vector<5x16x128xf32> to vector<5x16x128xbf16>
    %392 = tpu.concatenate %2, %391 in 1 : vector<5x2x128xbf16>, vector<5x16x128xbf16> -> vector<5x18x128xbf16>
    %393 = vector.extract_strided_slice %392 {offsets = [0, 0, 0], sizes = [5, 16, 128], strides = [1, 1, 1]} : vector<5x18x128xbf16> to vector<5x16x128xbf16>
    %394 = vector.extract_strided_slice %392 {offsets = [0, 1, 0], sizes = [5, 16, 128], strides = [1, 1, 1]} : vector<5x18x128xbf16> to vector<5x16x128xbf16>
    %395 = vector.extract_strided_slice %392 {offsets = [0, 2, 0], sizes = [5, 16, 128], strides = [1, 1, 1]} : vector<5x18x128xbf16> to vector<5x16x128xbf16>
    %396 = tpu.concatenate %393, %394, %395 in 2 : vector<5x16x128xbf16>, vector<5x16x128xbf16>, vector<5x16x128xbf16> -> vector<5x16x384xbf16>
    %397 = vector.shape_cast %396 : vector<5x16x384xbf16> to vector<80x384xbf16>
    %398 = tpu.concatenate %390, %397 in 0 : vector<80x384xbf16>, vector<80x384xbf16> -> vector<160x384xbf16>
    %399 = tpu.concatenate %371, %377 in 1 : vector<384x128xbf16>, vector<384x128xbf16> -> vector<384x256xbf16>
    %cst_96 = arith.constant dense<0.000000e+00> : vector<160x256xf32>
    %400 = tpu.matmul %398, %399, %cst_96 {dimension_numbers = #tpu.dot_dimension_numbers<[1], [0], [0], [1], [0, 0, 1, 1], [], []>} : vector<160x384xbf16>, vector<384x256xbf16>, vector<160x256xf32> -> vector<160x256xf32>
    %401 = vector.extract_strided_slice %400 {offsets = [0, 0], sizes = [80, 128], strides = [1, 1]} : vector<160x256xf32> to vector<80x128xf32>
    %402 = vector.broadcast %380 : vector<1x128xf32> to vector<80x128xf32>
    %403 = arith.addf %401, %402 : vector<80x128xf32>
    %404 = vector.shape_cast %403 : vector<80x128xf32> to vector<5x16x128xf32>
    %405 = vector.extract_strided_slice %400 {offsets = [80, 128], sizes = [80, 128], strides = [1, 1]} : vector<160x256xf32> to vector<80x128xf32>
    %406 = vector.broadcast %383 : vector<1x128xf32> to vector<80x128xf32>
    %407 = arith.addf %405, %406 : vector<80x128xf32>
    %408 = vector.shape_cast %407 : vector<80x128xf32> to vector<5x16x128xf32>
    %409 = arith.negf %404 : vector<5x16x128xf32>
    %410 = math.exp %409 : vector<5x16x128xf32>
    %cst_97 = arith.constant 1.000000e+00 : f32
    %411 = vector.broadcast %cst_97 : f32 to vector<5x16x128xf32>
    %412 = arith.addf %411, %410 : vector<5x16x128xf32>
    %413 = arith.divf %411, %412 : vector<5x16x128xf32>
    %414 = math.tanh %408 : vector<5x16x128xf32>
    %415 = arith.mulf %413, %414 : vector<5x16x128xf32>
    %416 = arith.addf %278, %415 : vector<5x16x128xf32>
    %417 = arith.addf %279, %416 : vector<5x16x128xf32>
    %c0_98 = arith.constant 0 : index
    %c0_99 = arith.constant 0 : index
    %c0_100 = arith.constant 0 : index
    %418 = vector.load %arg6[%c0_98, %c0_99, %c0_100] : memref<5x16x128xf32, #tpu.memory_space<vmem>>, vector<5x16x128xf32>
    tpu.vector_store %arg6[%c0_98, %c0_99, %c0_100], %417 {strides = array<i32>} : memref<5x16x128xf32, #tpu.memory_space<vmem>>, vector<5x16x128xf32>,
    return
  }
  func.func @transform_0(%arg0: i32) -> (i32, i32, i32) {
    %c0_i32 = arith.constant 0 : i32
    %c0_i32_0 = arith.constant 0 : i32
    %c0_i32_1 = arith.constant 0 : i32
    return %arg0, %c0_i32, %c0_i32_0 : i32, i32, i32
  }
  func.func @transform_1(%arg0: i32) -> (i32, i32, i32) {
    %c0_i32 = arith.constant 0 : i32
    %c0_i32_0 = arith.constant 0 : i32
    %c0_i32_1 = arith.constant 0 : i32
    %c0_i32_2 = arith.constant 0 : i32
    return %c0_i32, %c0_i32_0, %c0_i32_1 : i32, i32, i32
  }
  func.func @transform_2(%arg0: i32) -> (i32, i32) {
    %c0_i32 = arith.constant 0 : i32
    %c0_i32_0 = arith.constant 0 : i32
    %c0_i32_1 = arith.constant 0 : i32
    return %c0_i32, %c0_i32_0 : i32, i32
  }
  func.func @transform_3(%arg0: i32) -> (i32, i32, i32) {
    %c0_i32 = arith.constant 0 : i32
    %c0_i32_0 = arith.constant 0 : i32
    %c0_i32_1 = arith.constant 0 : i32
    %c0_i32_2 = arith.constant 0 : i32
    return %c0_i32, %c0_i32_0, %c0_i32_1 : i32, i32, i32
  }
  func.func @transform_4(%arg0: i32) -> (i32, i32) {
    %c0_i32 = arith.constant 0 : i32
    %c0_i32_0 = arith.constant 0 : i32
    %c0_i32_1 = arith.constant 0 : i32
    return %c0_i32, %c0_i32_0 : i32, i32
  }
  func.func @transform_5(%arg0: i32) -> (i32, i32, i32) {
    %c0_i32 = arith.constant 0 : i32
    %c0_i32_0 = arith.constant 0 : i32
    %c0_i32_1 = arith.constant 0 : i32
    return %arg0, %c0_i32, %c0_i32_0 : i32, i32, i32
  }
}

</mosaic_0001>

<bundles_post_ra>
// kernel: encoder_block_pallas.1
= control target key start
LH: loop header
LB: loop body
LE: loop exit
PB: predicated region body
PF: predicated region fallthrough
CT: control target
= control target key end

     0   :  { %v6652_v1 = vmov 0   ;;  %vm192_vm0 = vcmask 1040384   ;;  %vm270_vm1 = vcmask 1046528   ;;  %vm209_vm2 = vsmask.f32 7424  ;;  %s8457_s3 = inlined_call_operand.vmem [shape: bf16[9,144,128], index: 3, kind: input, shape index: {}]   ;;  %s8458_s1 = inlined_call_operand.vmem [shape: bf16[9,144,128], index: 1, kind: input, shape index: {}]   ;;  %s8459_s0 = inlined_call_operand.vmem [shape: f32[5,16,128], index: 0, kind: input, shape index: {}]   ;;  %s8460_s2 = inlined_call_operand.vmem [shape: f32[9,128], index: 2, kind: input, shape index: {}]   ;;  %s8461_s4 = inlined_call_operand.vmem [shape: f32[9,128], index: 4, kind: input, shape index: {}]   ;;  %s8462_s5 = inlined_call_operand.vmem [shape: f32[5,16,128], index: 5, kind: output, shape index: {}]  }
   0x1   :  { %v6300_v0 = vld [vmem:[%s8457_s3] sm:$0xff]   ;;  %436 = vmatprep.mubr.bf16.mxu1 %v6652_v1  ;;  %v6302_v3 = vld [vmem:[%s8457_s3 + $0x8] sm:$0xff]   ;;  %v6304_v5 = vld [vmem:[%s8457_s3 + $0x10] sm:$0xff]  }
   0x2   :  { %v6301_v2 = vld [vmem:[%s8458_s1] sm:$0xff]   ;;  %291 = vmatprep.subr.bf16.mxu0 %v6300_v0  ;;  %v6303_v4 = vld [vmem:[%s8458_s1 + $0x8] sm:$0xff]   ;;  %v6305_v6 = vld [vmem:[%s8458_s1 + $0x10] sm:$0xff]  }
   0x3   :  { %292 = vmatpush1.bf16.msra.mxu0 %v6301_v2  ;;  %v6306_v7 = vld [vmem:[%s8457_s3 + $0x30] sm:$0xff]   ;;  %v6310_v9 = vld [vmem:[%s8457_s3 + $0x38] sm:$0xff]   ;;  %v6314_v11 = vld [vmem:[%s8457_s3 + $0x40] sm:$0xff]  }
   0x4   :  { %293 = vmatprep.subr.bf16.mxu0 %v6302_v3  ;;  %v6307_v8 = vld [vmem:[%s8458_s1 + $0x30] sm:$0xff]   ;;  %404 = vmatprep.subr.bf16.mxu1 %v6306_v7  ;;  %v6311_v10 = vld [vmem:[%s8458_s1 + $0x38] sm:$0xff]   ;;  %v6315_v12 = vld [vmem:[%s8458_s1 + $0x40] sm:$0xff]  }
   0x5   :  { %405 = vmatpush1.bf16.msra.mxu1 %v6307_v8  ;;  %v21_v13 = vld [vmem:[%s8459_s0] sm:$0xff]  ;;  %v22_v14 = vld [vmem:[%s8459_s0 + $0x8] sm:$0xff]  ;;  %v23_v16 = vld [vmem:[%s8459_s0 + $0x10] sm:$0xff] }
   0x6   :  { %406 = vmatprep.subr.bf16.mxu1 %v6310_v9  ;;  %v177_v15 = vpack.c.bf16 %v22_v14, %v21_v13  ;;  %v24_v17 = vld [vmem:[%s8459_s0 + $0x18] sm:$0xff]  ;;  %v25_v18 = vld [vmem:[%s8459_s0 + $0x20] sm:$0xff]  ;;  %v26_v20 = vld [vmem:[%s8459_s0 + $0x28] sm:$0xff] }
   0x7   :  { %294 = vmatpush1.bf16.msra.mxu0 %v6303_v4  ;;  %v178_v19 = vpack.c.bf16 %v24_v17, %v23_v16  ;;  %v27_v21 = vld [vmem:[%s8459_s0 + $0x30] sm:$0xff]  ;;  %v28_v22 = vld [vmem:[%s8459_s0 + $0x38] sm:$0xff]  ;;  %v179_v24 = vpack.c.bf16 %v26_v20, %v25_v18  ;;  %v29_v25 = vld [vmem:[%s8459_s0 + $0x40] sm:$0xff] }
   0x8   :  { %295 = vmatprep.subr.bf16.mxu0 %v6304_v5  ;;  %v6749_v23 = vrot.slane %v177_v15, 7  ;;  %v30_v26 = vld [vmem:[%s8459_s0 + $0x48] sm:$0xff]  ;;  %v180_v38 = vpack.c.bf16 %v28_v22, %v27_v21  ;;  %v6322_v47 = vld [vmem:[%s8457_s3 + $0x50] sm:$0xff]   ;;  %v6308_v48 = vld [vmem:[%s8457_s3 + $0x18] sm:$0xff]  }
   0x9   :  { %407 = vmatpush1.bf16.msra.mxu1 %v6311_v10  ;;  %v6757_v27 = vrot.slane %v178_v19, 7  ;;  %v6318_v28 = vld [vmem:[%s8457_s3 + $0x48] sm:$0xff]   ;;  %v6767_v32 = vrot.slane %v179_v24, 7  ;;  %v181_v39 = vpack.c.bf16 %v30_v26, %v29_v25  ;;  %v6309_v52 = vld [vmem:[%s8458_s1 + $0x18] sm:$0xff]   ;;  %v6323_v56 = vld [vmem:[%s8458_s1 + $0x50] sm:$0xff]  }
   0xa   :  { %408 = vmatprep.subr.bf16.mxu1 %v6314_v11  ;;  %v195_v29 = vsel %vm192_vm0, 0, %v6749_v23  ;;  %v272_v30 = vrot.slane %v6749_v23, 1  ;;  %v216_v31 = vshll.u32 %v6749_v23, 16  ;;  %v6320_v40 = vld [vmem:[%s8458_s1 + $0x48] sm:$0xff]   ;;  %v6804_v55 = vrot.slane %v180_v38, 7  ;;  %v6312_v57 = vld [vmem:[%s8457_s3 + $0x20] sm:$0xff]   ;;  %vm6865_vm3 = vmneg %vm192_vm0 }
   0xb   :  { %296 = vmatpush1.bf16.msra.mxu0 %v6305_v6  ;;  %v271_v33 = vrot.slane %v195_v29, 1  ;;  %v210_v34 = vshrl.u32 %v195_v29, 16  ;;  %v212_v35 = vshll.u32 %v195_v29, 16  ;;  %v6772_v36 = vsel %vm192_vm0, 0, %v6757_v27  ;;  %v6324_v61 = vld [vmem:[%s8457_s3 + $0x58] sm:$0xff]   ;;  %v6313_v7 = vld [vmem:[%s8458_s1 + $0x20] sm:$0xff]  }
   0xc   :  { %297 = vmatprep.subr.bf16.mxu0 %v6652_v1  ;;  %v218_v37 = vrot.slane %v216_v31, 1  ;;  %v274_v43 = vrot.slane %v6772_v36, 1  ;;  %v275_v44 = vrot.slane %v6757_v27, 1  ;;  %v222_v45 = vshll.u32 %v6772_v36, 16  ;;  %v6325_v11 = vld [vmem:[%s8458_s1 + $0x58] sm:$0xff]   ;;  %v6317_v19 = vld [vmem:[%s8458_s1 + $0x28] sm:$0xff]  }
   0xd   :  { %409 = vmatpush1.bf16.msra.mxu1 %v6315_v12  ;;  %v6778_v41 = vsel %vm270_vm1, %v271_v33, %v272_v30  ;;  %v214_v42 = vrot.slane %v212_v35, 1  ;;  %v6787_v46 = vsel %vm192_vm0, 0, %v6767_v32  ;;  %v226_v50 = vshll.u32 %v6757_v27, 16  ;;  %v6316_v12 = vld [vmem:[%s8457_s3 + $0x28] sm:$0xff]   ;;  %v6319_v25 = vld [vmem:[%s8457_s3 + $0x78] sm:$0xff]  }
   0xe   :  { %913 = vmatprep.subr.bf16.mxu1 %v6318_v28  ;;  %v236_v51 = vshll.u32 %v6767_v32, 16  ;;  %v220_v53 = vshrl.u32 %v6772_v36, 16  ;;  %v232_v54 = vshll.u32 %v6787_v46, 16  ;;  %v6816_v59 = vsel %vm270_vm1, %v274_v43, %v275_v44  ;;  %v6321_v33 = vld [vmem:[%s8458_s1 + $0x78] sm:$0xff]   ;;  %v6327_v36 = vld [vmem:[%s8458_s1 + $0x80] sm:$0xff]  }
   0xf   :  { %298 = vmatpush1.bf16.msra.mxu0 %v6652_v1  ;;  %v215_v49 = vor.u32 %v214_v42, %v210_v34  ;;  %v6818_v60 = vrot.slane %v181_v39, 7  ;;  %v224_v62 = vrot.slane %v222_v45, 1  ;;  %v278_v63 = vrot.slane %v6767_v32, 1  ;;  %v6326_v34 = vld [vmem:[%s8457_s3 + $0x80] sm:$0xff]  }
  0x10   :  { %299 = vmatprep.subr.bf16.mxu0 %v6652_v1  ;;  %437 = vmatmul.mubr.bf16.vlgmr.msra.gmra.mrb[0].mxu1 %v6778_v41  ;;  %v6828_v0 = vsel %vm192_vm0, 0, %v6804_v55  ;;  %v246_v2 = vshll.u32 %v6804_v55, 16  ;;  %v228_v3 = vrot.slane %v226_v50, 1  ;;  %v277_v4 = vrot.slane %v6787_v46, 1  ;;  %v6336_v50 = vld [vmem:[%s8457_s3 + $0x90] sm:$0xff]  }
  0x11   :  { %444 = vmatprep.mubr.bf16.mxu1 %v6652_v1  ;;  %914 = vmatpush1.bf16.msra.mxu1 %v6320_v40  ;;  %v6813_v58 = vsel %vm209_vm2, %v215_v49, %v218_v37  ;;  %v230_v5 = vshrl.u32 %v6787_v46, 16  ;;  %v238_v6 = vrot.slane %v236_v51, 1  ;;  %v234_v8 = vrot.slane %v232_v54, 1  ;;  %v6328_v37 = vld [vmem:[%s8457_s3 + $0x88] sm:$0xff]   ;;  %v6335_v49 = vld [vmem:[%s8458_s1 + $0x70] sm:$0xff]   ;;  %v6337_v51 = vld [vmem:[%s8457_s3 + $0xc0] sm:$0xff]  }
  0x12   :  { %915 = vmatprep.subr.bf16.mxu1 %v6322_v47  ;;  %323 = vmatprep.mubr.bf16.mxu0 %v6813_v58  ;;  %v242_v9 = vshll.u32 %v6828_v0, 16  ;;  %v6839_v10 = vsel %vm192_vm0, 0, %v6818_v60  ;;  %v280_v13 = vrot.slane %v6828_v0, 1  ;;  %v281_v14 = vrot.slane %v6804_v55, 1  ;;  %v6329_v40 = vld [vmem:[%s8458_s1 + $0x88] sm:$0xff]  }
  0x13   :  { %300 = vmatpush1.bf16.msra.mxu0 %v6652_v1  ;;  %v240_v15 = vshrl.u32 %v6828_v0, 16  ;;  %v248_v16 = vrot.slane %v246_v2, 1  ;;  %v252_v17 = vshll.u32 %v6839_v10, 16  ;;  %v256_v18 = vshll.u32 %v6818_v60, 16 }
  0x14   :  { %301 = vmatprep.subr.bf16.mxu0 %v6652_v1  ;;  %v244_v20 = vrot.slane %v242_v9, 1  ;;  %v284_v21 = vrot.slane %v6818_v60, 1  ;;  %v283_v22 = vrot.slane %v6839_v10, 1  ;;  %v250_v24 = vshrl.u32 %v6839_v10, 16 }
  0x15   :  { %916 = vmatpush1.bf16.msra.mxu1 %v6323_v56  ;;  %v254_v28 = vrot.slane %v252_v17, 1  ;;  %v258_v29 = vrot.slane %v256_v18, 1  ;;  %v225_v30 = vor.u32 %v224_v62, %v220_v53  ;;  %v279_v31 = vsel %vm270_vm1, %v277_v4, %v278_v63  ;;  %v6968_v4 = vld [vmem:[%s8460_s2] ss:$0 sm:$0xff] }
  0x16   :  { %917 = vmatprep.subr.bf16.mxu1 %v6324_v61  ;;  %v235_v38 = vor.u32 %v234_v8, %v230_v5  ;;  %v282_v39 = vsel %vm270_vm1, %v280_v13, %v281_v14  ;;  %v245_v43 = vor.u32 %v244_v20, %v240_v15  ;;  %v285_v44 = vsel %vm270_vm1, %v283_v22, %v284_v21 }
  0x17   :  { %302 = vmatpush1.bf16.msra.mxu0 %v6652_v1  ;;  %v229_v35 = vsel %vm209_vm2, %v225_v30, %v228_v3  ;;  %v255_v46 = vor.u32 %v254_v28, %v250_v24  ;;  %v6339_v30 = vld [vmem:[%s8458_s1 + $0xc0] sm:$0xff]  }
  0x18   :  { %303 = vmatprep.subr.bf16.mxu0 %v6652_v1  ;;  %445 = vmatmul.mubr.bf16.gmra.mrb[4].mxu1 %v6816_v59  ;;  %v239_v42 = vsel %vm209_vm2, %v235_v38, %v238_v6  ;;  %v249_v45 = vsel %vm209_vm2, %v245_v43, %v248_v16 }
  0x19   :  { %452 = vmatprep.mubr.bf16.mxu1 %v6652_v1  ;;  %918 = vmatpush1.bf16.msra.mxu1 %v6325_v11  ;;  %v259_v47 = vsel %vm209_vm2, %v255_v46, %v258_v29 }
  0x1a   :  { %919 = vmatprep.subr.bf16.mxu1 %v6652_v1 }
  0x1b   :  { %304 = vmatpush1.bf16.msra.mxu0 %v6652_v1 }
  0x1c   :  { %305 = vmatprep.subr.bf16.mxu0 %v6652_v1 }
  0x1d   :  { %920 = vmatpush1.bf16.msra.mxu1 %v6652_v1 }
  0x1e   :  { %921 = vmatprep.subr.bf16.mxu1 %v6652_v1 }
  0x1f   :  { %306 = vmatpush1.bf16.msra.mxu0 %v6652_v1 }
  0x20   :  { %307 = vmatprep.subr.bf16.mxu0 %v6308_v48  ;;  %453 = vmatmul.mubr.bf16.gmra.mrb[8].mxu1 %v279_v31  ;;  %v6334_v48 = vld [vmem:[%s8457_s3 + $0x70] sm:$0xff]  }
  0x21   :  { %460 = vmatprep.mubr.bf16.mxu1 %v6652_v1  ;;  %922 = vmatpush1.bf16.msra.mxu1 %v6652_v1 }
  0x22   :  { %923 = vmatprep.subr.bf16.mxu1 %v6652_v1 }
  0x23   :  { %308 = vmatpush1.bf16.msra.mxu0 %v6309_v52 }
  0x24   :  { %309 = vmatprep.subr.bf16.mxu0 %v6312_v57 }
  0x25   :  { %924 = vmatpush1.bf16.msra.mxu1 %v6652_v1 }
  0x26   :  { %925 = vmatprep.subr.bf16.mxu1 %v6652_v1 }
  0x27   :  { %310 = vmatpush1.bf16.msra.mxu0 %v6313_v7 }
  0x28   :  { %311 = vmatprep.subr.bf16.mxu0 %v6316_v12  ;;  %461 = vmatmul.mubr.bf16.gmra.mrb[12].mxu1 %v282_v39 }
  0x29   :  { %468 = vmatprep.mubr.bf16.mxu1 %v6652_v1  ;;  %926 = vmatpush1.bf16.msra.mxu1 %v6652_v1 }
  0x2a   :  { %927 = vmatprep.subr.bf16.mxu1 %v6652_v1 }
  0x2b   :  { %312 = vmatpush1.bf16.msra.mxu0 %v6317_v19 }
  0x2c   :  { %1026 = vmatprep.subr.bf16.mxu0 %v6319_v25 }
  0x2d   :  { %928 = vmatpush1.bf16.msra.mxu1 %v6652_v1 }
  0x2e   :  { %5634 = vmatmul.mubr.msk.bf16.vlgmr.msra.gmra.mrb[0].mxu0 %vm6865_vm3, %v6749_v23 }
  0x2f   :  { %331 = vmatprep.mubr.bf16.mxu0 %v229_v35  ;;  %1027 = vmatpush1.bf16.msra.mxu0 %v6321_v33 }
  0x30   :  { %1028 = vmatprep.subr.bf16.mxu0 %v6326_v34  ;;  %469 = vmatmul.mubr.bf16.gmra.mrb[16].mxu1 %v285_v44 }
  0x31   :  { %476 = vmatprep.mubr.bf16.mxu1 %v6652_v1 }
  0x33   :  { %1029 = vmatpush1.bf16.msra.mxu0 %v6327_v36 }
  0x34   :  { %1030 = vmatprep.subr.bf16.mxu0 %v6328_v37 }
  0x36   :  { %5636 = vmatmul.mubr.msk.bf16.gmra.mrb[4].mxu0 %vm6865_vm3, %v6757_v27 }
  0x37   :  { %339 = vmatprep.mubr.bf16.mxu0 %v239_v42  ;;  %1031 = vmatpush1.bf16.msra.mxu0 %v6329_v40 }
  0x38   :  { %477 = vmatmul.mubr.bf16.gmra.mrb[20].mxu1 %v6778_v41  ;;  %v6333_v41 = vld [vmem:[%s8458_s1 + $0x68] sm:$0xff]   ;;  %1648 = vmatprep.subr.bf16.mxu0 %v6337_v51 }
  0x39   :  { %484 = vmatprep.mubr.bf16.mxu1 %v6652_v1 }
  0x3e   :  { %5638 = vmatmul.mubr.msk.bf16.gmra.mrb[8].mxu0 %vm6865_vm3, %v6767_v32 }
  0x3f   :  { %347 = vmatprep.mubr.bf16.mxu0 %v249_v45 }
  0x40   :  { %485 = vmatmul.mubr.bf16.gmra.mrb[24].mxu1 %v6816_v59 }
  0x41   :  { %492 = vmatprep.mubr.bf16.mxu1 %v6652_v1 }
  0x46   :  { %5640 = vmatmul.mubr.msk.bf16.gmra.mrb[12].mxu0 %vm6865_vm3, %v6804_v55 }
  0x47   :  { %355 = vmatprep.mubr.bf16.mxu0 %v259_v47 }
  0x48   :  { %493 = vmatmul.mubr.bf16.gmra.mrb[28].mxu1 %v279_v31 }
  0x49   :  { %500 = vmatprep.mubr.bf16.mxu1 %v6652_v1 }
  0x4e   :  { %5642 = vmatmul.mubr.msk.bf16.gmra.mrb[16].mxu0 %vm6865_vm3, %v6818_v60 }
  0x4f   :  { %363 = vmatprep.mubr.bf16.mxu0 %v6813_v58 }
  0x50   :  { %501 = vmatmul.mubr.bf16.gmra.mrb[32].mxu1 %v282_v39 }
  0x51   :  { %508 = vmatprep.mubr.bf16.mxu1 %v6652_v1 }
  0x56   :  { %5644 = vmatmul.mubr.msk.bf16.gmra.mrb[20].mxu0 %vm6865_vm3, %v6749_v23  ;;  %v6330_v23 = vld [vmem:[%s8457_s3 + $0x60] sm:$0xff]  }
  0x57   :  { %371 = vmatprep.mubr.bf16.mxu0 %v229_v35  ;;  %929 = vmatprep.subr.bf16.mxu1 %v6330_v23  ;;  %v6344_v35 = vld [vmem:[%s8457_s3 + $0xc8] sm:$0xff]  }
  0x58   :  { %509 = vmatmul.mubr.bf16.gmra.mrb[36].mxu1 %v285_v44 }
  0x5e   :  { %5646 = vmatmul.mubr.msk.bf16.gmra.mrb[24].mxu0 %vm6865_vm3, %v6757_v27  ;;  %v6331_v27 = vld [vmem:[%s8458_s1 + $0x60] sm:$0xff]  }
  0x5f   :  { %379 = vmatprep.mubr.bf16.mxu0 %v239_v42  ;;  %930 = vmatpush1.bf16.msra.mxu1 %v6331_v27 }
  0x66   :  { %5648 = vmatmul.mubr.msk.bf16.gmra.mrb[28].mxu0 %vm6865_vm3, %v6767_v32  ;;  %v6332_v32 = vld [vmem:[%s8457_s3 + $0x68] sm:$0xff]  }
  0x67   :  { %387 = vmatprep.mubr.bf16.mxu0 %v249_v45  ;;  %931 = vmatprep.subr.bf16.mxu1 %v6332_v32 }
  0x68   :  { %932 = vmatpush1.bf16.msra.mxu1 %v6333_v41  ;;  %v6338_v41 = vld [vmem:[%s8458_s1 + $0x90] sm:$0xff]  }
  0x69   :  { %933 = vmatprep.subr.bf16.mxu1 %v6334_v48 }
  0x6c   :  { %934 = vmatpush1.bf16.msra.mxu1 %v6335_v49 }
  0x6d   :  { %1535 = vmatprep.subr.bf16.mxu1 %v6336_v50  ;;  %v6340_v50 = vld [vmem:[%s8457_s3 + $0x98] sm:$0xff]  }
  0x6e   :  { %5650 = vmatmul.mubr.msk.bf16.gmra.mrb[32].mxu0 %vm6865_vm3, %v6804_v55 }
  0x6f   :  { %395 = vmatprep.mubr.bf16.mxu0 %v259_v47  ;;  %v6345_v47 = vld [vmem:[%s8458_s1 + $0xc8] sm:$0xff]  }
  0x76   :  { %5652 = vmatmul.mubr.msk.bf16.gmra.mrb[36].mxu0 %vm6865_vm3, %v6818_v60 }
  0x77   :  { %1058 = vmatprep.mubr.bf16.mxu0 %v6652_v1 }
  0xe3   :  { %v438_v52 = vpop.f32.mrb[0].mxu1 }
  0xe4   :  { %v440_v53 = vpop.f32.mrb[1].mxu1 }
  0xe5   :  { %v441_v54 = vpop.f32.mrb[2].mxu1 }
  0xe6   :  { %v443_v55 = vpop.f32.mrb[3].mxu1 }
  0xeb   :  { %v446_v56 = vpop.f32.mrb[4].mxu1 }
  0xec   :  { %v448_v57 = vpop.f32.mrb[5].mxu1 }
  0xed   :  { %v449_v58 = vpop.f32.mrb[6].mxu1 }
  0xee   :  { %v451_v59 = vpop.f32.mrb[7].mxu1 }
  0xf3   :  { %v454_v60 = vpop.f32.mrb[8].mxu1 }
  0xf4   :  { %v456_v61 = vpop.f32.mrb[9].mxu1 }
  0xf5   :  { %v457_v62 = vpop.f32.mrb[10].mxu1  ;;  %v6341_v61 = vld [vmem:[%s8458_s1 + $0x98] sm:$0xff]  }
  0xf6   :  { %v459_v0 = vpop.f32.mrb[11].mxu1 }
  0xfb   :  { %v6972_v10 = vpop.f32.mrb[12].mxu1 }
  0xfc   :  { %v464_v11 = vpop.f32.mrb[13].mxu1 }
  0xfd   :  { %v6974_v13 = vpop.f32.mrb[14].mxu1 }
  0xfe   :  { %v467_v15 = vpop.f32.mrb[15].mxu1 }
 0x101   :  { %v325_v63 = vpop.f32.mrb[0].mxu0 }
 0x102   :  { %v439_v2 = vadd.f32 %v438_v52, %v325_v63  ;;  %v327_v3 = vpop.f32.mrb[1].mxu0 }
 0x103   :  { %v328_v5 = vpop.f32.mrb[2].mxu0  ;;  %v6982_v34 = vpop.f32.mrb[16].mxu1  ;;  %v6342_v3 = vld [vmem:[%s8457_s3 + $0xa0] sm:$0xff]  }
 0x104   :  { %v442_v6 = vadd.f32 %v441_v54, %v328_v5  ;;  %v330_v7 = vpop.f32.mrb[3].mxu0  ;;  %v521_v8 = vadd.f32 %v6968_v4, %v439_v2  ;;  %v472_v39 = vpop.f32.mrb[17].mxu1 }
 0x105   :  { %v6988_v42 = vpop.f32.mrb[18].mxu1 }
 0x106   :  { %v522_v9 = vadd.f32 %v6968_v4, %v442_v6  ;;  %v475_v46 = vpop.f32.mrb[19].mxu1 }
 0x108   :  { %v693_v12 = vpack.c.bf16 %v522_v9, %v521_v8 }
 0x109   :  { %v333_v14 = vpop.f32.mrb[4].mxu0 }
 0x10a   :  { %v703_v16 = vrot.slane %v693_v12, 7  ;;  %v447_v17 = vadd.f32 %v446_v56, %v333_v14  ;;  %v335_v18 = vpop.f32.mrb[5].mxu0 }
 0x10b   :  { %v336_v19 = vpop.f32.mrb[6].mxu0 }
 0x10c   :  { %v450_v20 = vadd.f32 %v449_v58, %v336_v19  ;;  %v338_v21 = vpop.f32.mrb[7].mxu0  ;;  %v709_v22 = vsel %vm192_vm0, 0, %v703_v16  ;;  %v784_v24 = vrot.slane %v703_v16, 1  ;;  %v729_v29 = vshll.u32 %v703_v16, 16 }
 0x10d   :  { %v783_v25 = vrot.slane %v709_v22, 1  ;;  %v725_v28 = vshll.u32 %v709_v22, 16  ;;  %v523_v31 = vadd.f32 %v6968_v4, %v447_v17  ;;  %v723_v37 = vshrl.u32 %v709_v22, 16 }
 0x10e   :  { %v524_v33 = vadd.f32 %v6968_v4, %v450_v20  ;;  %v731_v45 = vrot.slane %v729_v29, 1 }
 0x10f   :  { %v785_v36 = vsel %vm270_vm1, %v783_v25, %v784_v24  ;;  %v727_v38 = vrot.slane %v725_v28, 1 }
 0x110   :  { %v694_v40 = vpack.c.bf16 %v524_v33, %v523_v31  ;;  %1059 = vmatmul.mubr.bf16.vlgmr.msra.gmra.mrb[40].mxu0 %v785_v36 }
 0x111   :  { %v341_v43 = vpop.f32.mrb[8].mxu0  ;;  %v728_v44 = vor.u32 %v727_v38, %v723_v37  ;;  %1066 = vmatprep.mubr.bf16.mxu0 %v6652_v1  ;;  %1649 = vmatpush1.bf16.msra.mxu0 %v6339_v30 }
 0x112   :  { %v704_v23 = vrot.slane %v694_v40, 7  ;;  %v455_v27 = vadd.f32 %v454_v60, %v341_v43  ;;  %v343_v32 = vpop.f32.mrb[9].mxu0  ;;  %1650 = vmatprep.subr.bf16.mxu0 %v6344_v35  ;;  %v478_v60 = vpop.f32.mrb[20].mxu1 }
 0x113   :  { %v344_v48 = vpop.f32.mrb[10].mxu0  ;;  %v732_v49 = vsel %vm209_vm2, %v728_v44, %v731_v45  ;;  %v7010_v2 = vpop.f32.mrb[21].mxu1 }
 0x114   :  { %v458_v51 = vadd.f32 %v457_v62, %v344_v48  ;;  %v346_v52 = vpop.f32.mrb[11].mxu0  ;;  %945 = vmatprep.mubr.bf16.mxu1 %v732_v49  ;;  %v712_v53 = vsel %vm192_vm0, 0, %v704_v23  ;;  %v787_v54 = vrot.slane %v704_v23, 1  ;;  %v739_v57 = vshll.u32 %v704_v23, 16  ;;  %v481_v6 = vpop.f32.mrb[22].mxu1 }
 0x115   :  { %5710 = vmatmul.mubr.msk.bf16.vlgmr.msra.gmra.mrb[40].mxu1 %vm6865_vm3, %v703_v16  ;;  %v786_v55 = vrot.slane %v712_v53, 1  ;;  %v735_v56 = vshll.u32 %v712_v53, 16  ;;  %1651 = vmatpush1.bf16.msra.mxu0 %v6345_v47  ;;  %v525_v58 = vadd.f32 %v6968_v4, %v455_v27  ;;  %v733_v63 = vshrl.u32 %v712_v53, 16  ;;  %v7016_v11 = vpop.f32.mrb[23].mxu1  ;;  %v6343_v16 = vld [vmem:[%s8458_s1 + $0xa0] sm:$0xff]  }
 0x116   :  { %v526_v59 = vadd.f32 %v6968_v4, %v458_v51  ;;  %1536 = vmatpush1.bf16.msra.mxu1 %v6338_v41  ;;  %v741_v9 = vrot.slane %v739_v57, 1  ;;  %v486_v30 = vpop.f32.mrb[24].mxu1  ;;  %v7061_v6 = vld [vmem:[%s8461_s4] ss:$0 sm:$0xff] }
 0x117   :  { %v788_v62 = vsel %vm270_vm1, %v786_v55, %v787_v54  ;;  %v737_v0 = vrot.slane %v735_v56, 1  ;;  %1537 = vmatprep.subr.bf16.mxu1 %v6340_v50  ;;  %v7030_v35 = vpop.f32.mrb[25].mxu1 }
 0x118   :  { %v695_v5 = vpack.c.bf16 %v526_v59, %v525_v58  ;;  %1067 = vmatmul.mubr.bf16.gmra.mrb[44].mxu0 %v788_v62  ;;  %v489_v37 = vpop.f32.mrb[26].mxu1 }
 0x119   :  { %v349_v7 = vpop.f32.mrb[12].mxu0  ;;  %v738_v8 = vor.u32 %v737_v0, %v733_v63  ;;  %1074 = vmatprep.mubr.bf16.mxu0 %v6652_v1  ;;  %v7034_v43 = vpop.f32.mrb[27].mxu1 }
 0x11a   :  { %v705_v12 = vrot.slane %v695_v5, 7  ;;  %v463_v14 = vadd.f32 %v6972_v10, %v349_v7  ;;  %v351_v15 = vpop.f32.mrb[13].mxu0  ;;  %1538 = vmatpush1.bf16.msra.mxu1 %v6341_v61 }
 0x11b   :  { %v352_v17 = vpop.f32.mrb[14].mxu0  ;;  %v742_v18 = vsel %vm209_vm2, %v738_v8, %v741_v9  ;;  %1539 = vmatprep.subr.bf16.mxu1 %v6342_v3  ;;  %v494_v53 = vpop.f32.mrb[28].mxu1 }
 0x11c   :  { %v466_v19 = vadd.f32 %v6974_v13, %v352_v17  ;;  %v354_v20 = vpop.f32.mrb[15].mxu0  ;;  %953 = vmatprep.mubr.bf16.mxu1 %v742_v18  ;;  %v715_v21 = vsel %vm192_vm0, 0, %v705_v12  ;;  %v790_v22 = vrot.slane %v705_v12, 1  ;;  %v749_v25 = vshll.u32 %v705_v12, 16  ;;  %v7048_v56 = vpop.f32.mrb[29].mxu1 }
 0x11d   :  { %5712 = vmatmul.mubr.msk.bf16.gmra.mrb[44].mxu1 %vm6865_vm3, %v704_v23  ;;  %v789_v10 = vrot.slane %v715_v21, 1  ;;  %v745_v24 = vshll.u32 %v715_v21, 16  ;;  %v527_v28 = vadd.f32 %v6968_v4, %v463_v14  ;;  %v743_v13 = vshrl.u32 %v715_v21, 16  ;;  %v497_v58 = vpop.f32.mrb[30].mxu1 }
 0x11e   :  { %v528_v29 = vadd.f32 %v6968_v4, %v466_v19  ;;  %1540 = vmatpush1.bf16.msra.mxu1 %v6343_v16  ;;  %v751_v40 = vrot.slane %v749_v25, 1 }
 0x11f   :  { %v791_v31 = vsel %vm270_vm1, %v789_v10, %v790_v22  ;;  %v747_v33 = vrot.slane %v745_v24, 1  ;;  %1541 = vmatprep.subr.bf16.mxu1 %v6652_v1 }
 0x120   :  { %v696_v36 = vpack.c.bf16 %v528_v29, %v527_v28  ;;  %1075 = vmatmul.mubr.bf16.gmra.mrb[48].mxu0 %v791_v31 }
 0x121   :  { %v357_v38 = vpop.f32.mrb[16].mxu0  ;;  %v748_v39 = vor.u32 %v747_v33, %v743_v13  ;;  %1082 = vmatprep.mubr.bf16.mxu0 %v6652_v1 }
 0x122   :  { %v706_v44 = vrot.slane %v696_v36, 7  ;;  %v471_v45 = vadd.f32 %v6982_v34, %v357_v38  ;;  %v359_v46 = vpop.f32.mrb[17].mxu0  ;;  %1542 = vmatpush1.bf16.msra.mxu1 %v6652_v1 }
 0x123   :  { %v360_v47 = vpop.f32.mrb[18].mxu0  ;;  %v752_v23 = vsel %vm209_vm2, %v748_v39, %v751_v40  ;;  %1543 = vmatprep.subr.bf16.mxu1 %v6652_v1 }
 0x124   :  { %v474_v27 = vadd.f32 %v6988_v42, %v360_v47  ;;  %v362_v32 = vpop.f32.mrb[19].mxu0  ;;  %961 = vmatprep.mubr.bf16.mxu1 %v752_v23  ;;  %v718_v41 = vsel %vm192_vm0, 0, %v706_v44  ;;  %v793_v48 = vrot.slane %v706_v44, 1  ;;  %v759_v50 = vshll.u32 %v706_v44, 16 }
 0x125   :  { %5714 = vmatmul.mubr.msk.bf16.gmra.mrb[48].mxu1 %vm6865_vm3, %v705_v12  ;;  %v792_v49 = vrot.slane %v718_v41, 1  ;;  %v755_v34 = vshll.u32 %v718_v41, 16  ;;  %v529_v51 = vadd.f32 %v6968_v4, %v471_v45  ;;  %v753_v54 = vshrl.u32 %v718_v41, 16 }
 0x126   :  { %v530_v52 = vadd.f32 %v6968_v4, %v474_v27  ;;  %1544 = vmatpush1.bf16.msra.mxu1 %v6652_v1  ;;  %v761_v61 = vrot.slane %v759_v50, 1  ;;  %v7052_v4 = vpop.f32.mrb[31].mxu1 }
 0x127   :  { %v794_v42 = vsel %vm270_vm1, %v792_v49, %v793_v48  ;;  %v757_v55 = vrot.slane %v755_v34, 1  ;;  %1545 = vmatprep.subr.bf16.mxu1 %v6652_v1  ;;  %v502_v16 = vpop.f32.mrb[32].mxu1 }
 0x128   :  { %v697_v57 = vpack.c.bf16 %v530_v52, %v529_v51  ;;  %1083 = vmatmul.mubr.bf16.gmra.mrb[52].mxu0 %v794_v42  ;;  %v7071_v20 = vpop.f32.mrb[33].mxu1 }
 0x129   :  { %v365_v59 = vpop.f32.mrb[20].mxu0  ;;  %v758_v60 = vor.u32 %v757_v55, %v753_v54  ;;  %1090 = vmatprep.mubr.bf16.mxu0 %v6652_v1  ;;  %v505_v22 = vpop.f32.mrb[34].mxu1 }
 0x12a   :  { %v707_v62 = vrot.slane %v697_v57, 7  ;;  %v366_v63 = vpop.f32.mrb[21].mxu0  ;;  %1546 = vmatpush1.bf16.msra.mxu1 %v6652_v1  ;;  %v7075_v25 = vpop.f32.mrb[35].mxu1 }
 0x12b   :  { %v480_v0 = vadd.f32 %v7010_v2, %v366_v63  ;;  %v368_v3 = vpop.f32.mrb[22].mxu0  ;;  %v762_v5 = vsel %vm209_vm2, %v758_v60, %v761_v61  ;;  %1547 = vmatprep.subr.bf16.mxu1 %v6652_v1  ;;  %v510_v47 = vpop.f32.mrb[36].mxu1 }
 0x12c   :  { %v369_v7 = vpop.f32.mrb[23].mxu0  ;;  %969 = vmatprep.mubr.bf16.mxu1 %v762_v5  ;;  %v721_v8 = vsel %vm192_vm0, 0, %v707_v62  ;;  %v796_v9 = vrot.slane %v707_v62, 1  ;;  %v769_v15 = vshll.u32 %v707_v62, 16  ;;  %v7086_v27 = vpop.f32.mrb[37].mxu1 }
 0x12d   :  { %v483_v12 = vadd.f32 %v7016_v11, %v369_v7  ;;  %5716 = vmatmul.mubr.msk.bf16.gmra.mrb[52].mxu1 %vm6865_vm3, %v706_v44  ;;  %v795_v2 = vrot.slane %v721_v8, 1  ;;  %v765_v14 = vshll.u32 %v721_v8, 16  ;;  %v535_v17 = vadd.f32 %v7061_v6, %v480_v0  ;;  %v513_v48 = vpop.f32.mrb[38].mxu1 }
 0x12e   :  { %1548 = vmatpush1.bf16.msra.mxu1 %v6652_v1  ;;  %v763_v11 = vshrl.u32 %v721_v8, 16  ;;  %v771_v30 = vrot.slane %v769_v15, 1  ;;  %v514_v50 = vpop.f32.mrb[39].mxu1 }
 0x12f   :  { %v536_v18 = vadd.f32 %v7061_v6, %v483_v12  ;;  %v797_v19 = vsel %vm270_vm1, %v795_v2, %v796_v9  ;;  %1549 = vmatprep.subr.bf16.mxu1 %v6652_v1  ;;  %v767_v21 = vrot.slane %v765_v14, 1 }
 0x130   :  { %1091 = vmatmul.mubr.bf16.gmra.mrb[56].mxu0 %v797_v19 }
 0x131   :  { %v803_v10 = vpack.c.bf16 %v536_v18, %v535_v17  ;;  %v373_v24 = vpop.f32.mrb[24].mxu0  ;;  %1098 = vmatprep.mubr.bf16.mxu0 %v6652_v1  ;;  %v768_v29 = vor.u32 %v767_v21, %v763_v11 }
 0x132   :  { %v374_v28 = vpop.f32.mrb[25].mxu0  ;;  %1550 = vmatpush1.bf16.msra.mxu1 %v6652_v1 }
 0x133   :  { %v813_v31 = vrot.slane %v803_v10, 7  ;;  %v488_v13 = vadd.f32 %v7030_v35, %v374_v28  ;;  %v376_v33 = vpop.f32.mrb[26].mxu0  ;;  %v772_v37 = vsel %vm209_vm2, %v768_v29, %v771_v30 }
 0x134   :  { %v377_v36 = vpop.f32.mrb[27].mxu0  ;;  %977 = vmatprep.mubr.bf16.mxu1 %v772_v37 }
 0x135   :  { %v491_v38 = vadd.f32 %v7034_v43, %v377_v36  ;;  %v819_v39 = vsel %vm192_vm0, 0, %v813_v31  ;;  %v894_v40 = vrot.slane %v813_v31, 1  ;;  %5718 = vmatmul.mubr.msk.bf16.gmra.mrb[56].mxu1 %vm6865_vm3, %v707_v62  ;;  %v839_v46 = vshll.u32 %v813_v31, 16 }
 0x136   :  { %v893_v44 = vrot.slane %v819_v39, 1  ;;  %v835_v45 = vshll.u32 %v819_v39, 16  ;;  %v537_v23 = vadd.f32 %v7061_v6, %v488_v13  ;;  %v833_v43 = vshrl.u32 %v819_v39, 16 }
 0x137   :  { %v538_v35 = vadd.f32 %v7061_v6, %v491_v38  ;;  %v841_v53 = vrot.slane %v839_v46, 1 }
 0x138   :  { %v895_v32 = vsel %vm270_vm1, %v893_v44, %v894_v40  ;;  %v837_v41 = vrot.slane %v835_v45, 1 }
 0x139   :  { %v804_v49 = vpack.c.bf16 %v538_v35, %v537_v23  ;;  %v381_v34 = vpop.f32.mrb[28].mxu0  ;;  %1099 = vmatmul.mubr.bf16.gmra.mrb[60].mxu0 %v895_v32 }
 0x13a   :  { %v382_v51 = vpop.f32.mrb[29].mxu0  ;;  %v838_v52 = vor.u32 %v837_v41, %v833_v43  ;;  %1106 = vmatprep.mubr.bf16.mxu0 %v6652_v1 }
 0x13b   :  { %v814_v42 = vrot.slane %v804_v49, 7  ;;  %v496_v54 = vadd.f32 %v7048_v56, %v382_v51  ;;  %v384_v55 = vpop.f32.mrb[30].mxu0 }
 0x13c   :  { %v385_v57 = vpop.f32.mrb[31].mxu0  ;;  %v842_v58 = vsel %vm209_vm2, %v838_v52, %v841_v53 }
 0x13d   :  { %v499_v59 = vadd.f32 %v7052_v4, %v385_v57  ;;  %985 = vmatprep.mubr.bf16.mxu1 %v842_v58  ;;  %v822_v60 = vsel %vm192_vm0, 0, %v814_v42  ;;  %v897_v61 = vrot.slane %v814_v42, 1  ;;  %v849_v0 = vshll.u32 %v814_v42, 16 }
 0x13e   :  { %5720 = vmatmul.mubr.msk.bf16.gmra.mrb[60].mxu1 %vm6865_vm3, %v813_v31  ;;  %v896_v62 = vrot.slane %v822_v60, 1  ;;  %v845_v63 = vshll.u32 %v822_v60, 16  ;;  %v539_v3 = vadd.f32 %v7061_v6, %v496_v54  ;;  %v843_v7 = vshrl.u32 %v822_v60, 16 }
 0x13f   :  { %v540_v56 = vadd.f32 %v7061_v6, %v499_v59  ;;  %v851_v14 = vrot.slane %v849_v0, 1 }
 0x140   :  { %v898_v5 = vsel %vm270_vm1, %v896_v62, %v897_v61  ;;  %v847_v8 = vrot.slane %v845_v63, 1 }
 0x141   :  { %v805_v9 = vpack.c.bf16 %v540_v56, %v539_v3  ;;  %v389_v4 = vpop.f32.mrb[32].mxu0  ;;  %1107 = vmatmul.mubr.bf16.gmra.mrb[64].mxu0 %v898_v5  ;;  %v6346_v56 = vld [vmem:[%s8457_s3 + $0xd0] sm:$0xff]  }
 0x142   :  { %v390_v12 = vpop.f32.mrb[33].mxu0  ;;  %v848_v2 = vor.u32 %v847_v8, %v843_v7  ;;  %1114 = vmatprep.mubr.bf16.mxu0 %v6652_v1  ;;  %v6347_v5 = vld [vmem:[%s8458_s1 + $0xd0] sm:$0xff]   ;;  %1652 = vmatprep.subr.bf16.mxu0 %v6346_v56  ;;  %v6348_v7 = vld [vmem:[%s8457_s3 + $0xa8] sm:$0xff]  }
 0x143   :  { %v815_v15 = vrot.slane %v805_v9, 7  ;;  %v504_v16 = vadd.f32 %v7071_v20, %v390_v12  ;;  %v392_v17 = vpop.f32.mrb[34].mxu0  ;;  %1653 = vmatpush1.bf16.msra.mxu0 %v6347_v5  ;;  %v6349_v8 = vld [vmem:[%s8458_s1 + $0xa8] sm:$0xff]   ;;  %1551 = vmatprep.subr.bf16.mxu1 %v6348_v7  ;;  %v6350_v9 = vld [vmem:[%s8457_s3 + $0xb0] sm:$0xff]   ;;  %v6352_v12 = vld [vmem:[%s8457_s3 + $0xb8] sm:$0xff]  }
 0x144   :  { %v393_v18 = vpop.f32.mrb[35].mxu0  ;;  %v852_v19 = vsel %vm209_vm2, %v848_v2, %v851_v14  ;;  %1552 = vmatpush1.bf16.msra.mxu1 %v6349_v8  ;;  %v6351_v4 = vld [vmem:[%s8458_s1 + $0xb0] sm:$0xff]   ;;  %v6353_v2 = vld [vmem:[%s8458_s1 + $0xb8] sm:$0xff]  }
 0x145   :  { %v507_v11 = vadd.f32 %v7075_v25, %v393_v18  ;;  %993 = vmatprep.mubr.bf16.mxu1 %v852_v19  ;;  %v825_v21 = vsel %vm192_vm0, 0, %v815_v15  ;;  %v900_v22 = vrot.slane %v815_v15, 1  ;;  %v859_v28 = vshll.u32 %v815_v15, 16  ;;  %1553 = vmatprep.subr.bf16.mxu1 %v6350_v9 }
 0x146   :  { %5722 = vmatmul.mubr.msk.bf16.gmra.mrb[64].mxu1 %vm6865_vm3, %v814_v42  ;;  %v899_v10 = vrot.slane %v825_v21, 1  ;;  %v855_v24 = vshll.u32 %v825_v21, 16  ;;  %v541_v29 = vadd.f32 %v7061_v6, %v504_v16  ;;  %v853_v31 = vshrl.u32 %v825_v21, 16  ;;  %v7155_v21 = vld [vmem:[%s8460_s2 + $0x1] ss:$0 sm:$0xff] }
 0x147   :  { %v542_v20 = vadd.f32 %v7061_v6, %v507_v11  ;;  %v861_v38 = vrot.slane %v859_v28, 1 }
 0x148   :  { %v901_v30 = vsel %vm270_vm1, %v899_v10, %v900_v22  ;;  %v857_v13 = vrot.slane %v855_v24, 1  ;;  %1554 = vmatpush1.bf16.msra.mxu1 %v6351_v4 }
 0x149   :  { %v806_v33 = vpack.c.bf16 %v542_v20, %v541_v29  ;;  %v397_v25 = vpop.f32.mrb[36].mxu0  ;;  %1115 = vmatmul.mubr.bf16.gmra.mrb[68].mxu0 %v901_v30  ;;  %1555 = vmatprep.subr.bf16.mxu1 %v6352_v12 }
 0x14a   :  { %v398_v36 = vpop.f32.mrb[37].mxu0  ;;  %v858_v37 = vor.u32 %v857_v13, %v853_v31  ;;  %1122 = vmatprep.mubr.bf16.mxu0 %v6652_v1 }
 0x14b   :  { %v816_v39 = vrot.slane %v806_v33, 7  ;;  %v512_v40 = vadd.f32 %v7086_v27, %v398_v36  ;;  %v400_v44 = vpop.f32.mrb[38].mxu0 }
 0x14c   :  { %v401_v45 = vpop.f32.mrb[39].mxu0  ;;  %v862_v46 = vsel %vm209_vm2, %v858_v37, %v861_v38  ;;  %1556 = vmatpush1.bf16.msra.mxu1 %v6353_v2 }
 0x14d   :  { %v515_v47 = vadd.f32 %v514_v50, %v401_v45  ;;  %1001 = vmatprep.mubr.bf16.mxu1 %v862_v46  ;;  %v828_v23 = vsel %vm192_vm0, 0, %v816_v39  ;;  %v903_v35 = vrot.slane %v816_v39, 1  ;;  %v869_v41 = vshll.u32 %v816_v39, 16 }
 0x14e   :  { %5724 = vmatmul.mubr.msk.bf16.gmra.mrb[68].mxu1 %vm6865_vm3, %v815_v15  ;;  %v902_v32 = vrot.slane %v828_v23, 1  ;;  %v865_v43 = vshll.u32 %v828_v23, 16  ;;  %v543_v48 = vadd.f32 %v7061_v6, %v512_v40  ;;  %v863_v34 = vshrl.u32 %v828_v23, 16 }
 0x14f   :  { %v544_v49 = vadd.f32 %v7061_v6, %v515_v47  ;;  %v871_v53 = vrot.slane %v869_v41, 1 }
 0x150   :  { %v904_v27 = vsel %vm270_vm1, %v902_v32, %v903_v35  ;;  %v867_v51 = vrot.slane %v865_v43, 1 }
 0x151   :  { %v807_v52 = vpack.c.bf16 %v544_v49, %v543_v48  ;;  %1123 = vmatmul.mubr.bf16.gmra.mrb[72].mxu0 %v904_v27 }
 0x152   :  { %v868_v50 = vor.u32 %v867_v51, %v863_v34  ;;  %1130 = vmatprep.mubr.bf16.mxu0 %v6652_v1 }
 0x153   :  { %v817_v42 = vrot.slane %v807_v52, 7 }
 0x154   :  { %v872_v54 = vsel %vm209_vm2, %v868_v50, %v871_v53 }
 0x155   :  { %1009 = vmatprep.mubr.bf16.mxu1 %v872_v54  ;;  %v831_v55 = vsel %vm192_vm0, 0, %v817_v42  ;;  %v906_v57 = vrot.slane %v817_v42, 1  ;;  %v879_v59 = vshll.u32 %v817_v42, 16 }
 0x156   :  { %5726 = vmatmul.mubr.msk.bf16.gmra.mrb[72].mxu1 %vm6865_vm3, %v816_v39  ;;  %v905_v6 = vrot.slane %v831_v55, 1  ;;  %v875_v58 = vshll.u32 %v831_v55, 16  ;;  %v873_v61 = vshrl.u32 %v831_v55, 16 }
 0x157   :  { %v881_v0 = vrot.slane %v879_v59, 1 }
 0x158   :  { %v907_v60 = vsel %vm270_vm1, %v905_v6, %v906_v57  ;;  %v877_v62 = vrot.slane %v875_v58, 1 }
 0x159   :  { %1131 = vmatmul.mubr.bf16.gmra.mrb[76].mxu0 %v907_v60 }
 0x15a   :  { %v878_v63 = vor.u32 %v877_v62, %v873_v61  ;;  %1680 = vmatprep.mubr.bf16.mxu0 %v6652_v1 }
 0x15c   :  { %v882_v3 = vsel %vm209_vm2, %v878_v63, %v881_v0 }
 0x15d   :  { %1017 = vmatprep.mubr.bf16.mxu1 %v882_v3 }
 0x15e   :  { %5728 = vmatmul.mubr.msk.bf16.gmra.mrb[76].mxu1 %vm6865_vm3, %v817_v42 }
 0x1e3   :  { %v1060_v14 = vpop.f32.mrb[40].mxu0 }
 0x1e4   :  { %v1062_v15 = vpop.f32.mrb[41].mxu0 }
 0x1e5   :  { %v1063_v16 = vpop.f32.mrb[42].mxu0 }
 0x1e6   :  { %v1065_v17 = vpop.f32.mrb[43].mxu0 }
 0x1e8   :  { %v947_v18 = vpop.f32.mrb[40].mxu1 }
 0x1e9   :  { %v1061_v19 = vadd.f32 %v1060_v14, %v947_v18  ;;  %v949_v11 = vpop.f32.mrb[41].mxu1 }
 0x1ea   :  { %v950_v22 = vpop.f32.mrb[42].mxu1 }
 0x1eb   :  { %v1064_v10 = vadd.f32 %v1063_v16, %v950_v22  ;;  %v952_v24 = vpop.f32.mrb[43].mxu1  ;;  %v1068_v28 = vpop.f32.mrb[44].mxu0  ;;  %v1143_v20 = vadd.f32 %v7155_v21, %v1061_v19 }
 0x1ec   :  { %v1070_v29 = vpop.f32.mrb[45].mxu0 }
 0x1ed   :  { %v1144_v30 = vadd.f32 %v7155_v21, %v1064_v10  ;;  %v1071_v31 = vpop.f32.mrb[46].mxu0 }
 0x1ee   :  { %v1073_v13 = vpop.f32.mrb[47].mxu0 }
 0x1ef   :  { %v1315_v33 = vpack.c.bf16 %v1144_v30, %v1143_v20 }
 0x1f0   :  { %v955_v25 = vpop.f32.mrb[44].mxu1 }
 0x1f1   :  { %v1325_v36 = vrot.slane %v1315_v33, 7  ;;  %v1069_v37 = vadd.f32 %v1068_v28, %v955_v25  ;;  %v957_v38 = vpop.f32.mrb[45].mxu1 }
 0x1f2   :  { %v958_v39 = vpop.f32.mrb[46].mxu1 }
 0x1f3   :  { %v1072_v40 = vadd.f32 %v1071_v31, %v958_v39  ;;  %v960_v44 = vpop.f32.mrb[47].mxu1  ;;  %v1076_v45 = vpop.f32.mrb[48].mxu0  ;;  %v1331_v46 = vsel %vm192_vm0, 0, %v1325_v36  ;;  %v1406_v47 = vrot.slane %v1325_v36, 1  ;;  %v1351_v43 = vshll.u32 %v1325_v36, 16 }
 0x1f4   :  { %v1078_v23 = vpop.f32.mrb[49].mxu0  ;;  %v1405_v35 = vrot.slane %v1331_v46, 1  ;;  %v1347_v32 = vshll.u32 %v1331_v46, 16  ;;  %v1145_v41 = vadd.f32 %v7155_v21, %v1069_v37  ;;  %v1345_v51 = vshrl.u32 %v1331_v46, 16 }
 0x1f5   :  { %v1146_v48 = vadd.f32 %v7155_v21, %v1072_v40  ;;  %v1079_v49 = vpop.f32.mrb[50].mxu0  ;;  %v1353_v54 = vrot.slane %v1351_v43, 1 }
 0x1f6   :  { %v1081_v27 = vpop.f32.mrb[51].mxu0  ;;  %v1407_v34 = vsel %vm270_vm1, %v1405_v35, %v1406_v47  ;;  %v1349_v52 = vrot.slane %v1347_v32, 1 }
 0x1f7   :  { %v1316_v50 = vpack.c.bf16 %v1146_v48, %v1145_v41  ;;  %1681 = vmatmul.mubr.bf16.vlgmr.msra.gmra.mrb[80].mxu0 %v1407_v34 }
 0x1f8   :  { %v963_v53 = vpop.f32.mrb[48].mxu1  ;;  %v1350_v42 = vor.u32 %v1349_v52, %v1345_v51  ;;  %1688 = vmatprep.mubr.bf16.mxu0 %v6652_v1 }
 0x1f9   :  { %v1326_v55 = vrot.slane %v1316_v50, 7  ;;  %v1077_v57 = vadd.f32 %v1076_v45, %v963_v53  ;;  %v965_v6 = vpop.f32.mrb[49].mxu1 }
 0x1fa   :  { %v966_v58 = vpop.f32.mrb[50].mxu1  ;;  %v1354_v59 = vsel %vm209_vm2, %v1350_v42, %v1353_v54 }
 0x1fb   :  { %v1080_v60 = vadd.f32 %v1079_v49, %v966_v58  ;;  %v968_v61 = vpop.f32.mrb[51].mxu1  ;;  %v1084_v62 = vpop.f32.mrb[52].mxu0  ;;  %1567 = vmatprep.mubr.bf16.mxu1 %v1354_v59  ;;  %v1334_v63 = vsel %vm192_vm0, 0, %v1326_v55  ;;  %v1409_v0 = vrot.slane %v1326_v55, 1  ;;  %v1361_v7 = vshll.u32 %v1326_v55, 16 }
 0x1fc   :  { %v1086_v3 = vpop.f32.mrb[53].mxu0  ;;  %5786 = vmatmul.mubr.msk.bf16.vlgmr.msra.gmra.mrb[80].mxu1 %vm6865_vm3, %v1325_v36  ;;  %v1408_v56 = vrot.slane %v1334_v63, 1  ;;  %v1357_v5 = vshll.u32 %v1334_v63, 16  ;;  %v1147_v8 = vadd.f32 %v7155_v21, %v1077_v57  ;;  %v1355_v14 = vshrl.u32 %v1334_v63, 16 }
 0x1fd   :  { %v1148_v9 = vadd.f32 %v7155_v21, %v1080_v60  ;;  %v1087_v4 = vpop.f32.mrb[54].mxu0  ;;  %v1363_v19 = vrot.slane %v1361_v7, 1 }
 0x1fe   :  { %v1089_v12 = vpop.f32.mrb[55].mxu0  ;;  %v1410_v2 = vsel %vm270_vm1, %v1408_v56, %v1409_v0  ;;  %v1359_v15 = vrot.slane %v1357_v5, 1 }
 0x1ff   :  { %v1317_v16 = vpack.c.bf16 %v1148_v9, %v1147_v8  ;;  %1689 = vmatmul.mubr.bf16.gmra.mrb[84].mxu0 %v1410_v2 }
 0x200   :  { %v971_v17 = vpop.f32.mrb[52].mxu1  ;;  %v1360_v18 = vor.u32 %v1359_v15, %v1355_v14  ;;  %1696 = vmatprep.mubr.bf16.mxu0 %v6652_v1 }
 0x201   :  { %v1327_v11 = vrot.slane %v1317_v16, 7  ;;  %v1085_v22 = vadd.f32 %v1084_v62, %v971_v17  ;;  %v973_v10 = vpop.f32.mrb[53].mxu1 }
 0x202   :  { %v974_v24 = vpop.f32.mrb[54].mxu1  ;;  %v1364_v28 = vsel %vm209_vm2, %v1360_v18, %v1363_v19 }
 0x203   :  { %v1088_v29 = vadd.f32 %v1087_v4, %v974_v24  ;;  %v976_v20 = vpop.f32.mrb[55].mxu1  ;;  %v1092_v30 = vpop.f32.mrb[56].mxu0  ;;  %1575 = vmatprep.mubr.bf16.mxu1 %v1364_v28  ;;  %v1337_v31 = vsel %vm192_vm0, 0, %v1327_v11  ;;  %v1412_v13 = vrot.slane %v1327_v11, 1  ;;  %v1371_v37 = vshll.u32 %v1327_v11, 16 }
 0x204   :  { %v1094_v33 = vpop.f32.mrb[57].mxu0  ;;  %5788 = vmatmul.mubr.msk.bf16.gmra.mrb[84].mxu1 %vm6865_vm3, %v1326_v55  ;;  %v1411_v25 = vrot.slane %v1337_v31, 1  ;;  %v1367_v36 = vshll.u32 %v1337_v31, 16  ;;  %v1149_v38 = vadd.f32 %v7155_v21, %v1085_v22  ;;  %v1365_v46 = vshrl.u32 %v1337_v31, 16 }
 0x205   :  { %v1150_v39 = vadd.f32 %v7155_v21, %v1088_v29  ;;  %v1095_v40 = vpop.f32.mrb[58].mxu0  ;;  %v1373_v32 = vrot.slane %v1371_v37, 1 }
 0x206   :  { %v1097_v44 = vpop.f32.mrb[59].mxu0  ;;  %v1413_v45 = vsel %vm270_vm1, %v1411_v25, %v1412_v13  ;;  %v1369_v47 = vrot.slane %v1367_v36, 1 }
 0x207   :  { %v1318_v23 = vpack.c.bf16 %v1150_v39, %v1149_v38  ;;  %1697 = vmatmul.mubr.bf16.gmra.mrb[88].mxu0 %v1413_v45 }
 0x208   :  { %v1370_v35 = vor.u32 %v1369_v47, %v1365_v46  ;;  %1704 = vmatprep.mubr.bf16.mxu0 %v6652_v1  ;;  %v979_v41 = vpop.f32.mrb[56].mxu1 }
 0x209   :  { %v1328_v43 = vrot.slane %v1318_v23, 7  ;;  %v1093_v48 = vadd.f32 %v1092_v30, %v979_v41  ;;  %v981_v49 = vpop.f32.mrb[57].mxu1 }
 0x20a   :  { %v1374_v27 = vsel %vm209_vm2, %v1370_v35, %v1373_v32  ;;  %v982_v34 = vpop.f32.mrb[58].mxu1 }
 0x20b   :  { %1583 = vmatprep.mubr.bf16.mxu1 %v1374_v27  ;;  %v1340_v51 = vsel %vm192_vm0, 0, %v1328_v43  ;;  %v1415_v52 = vrot.slane %v1328_v43, 1  ;;  %v1096_v50 = vadd.f32 %v1095_v40, %v982_v34  ;;  %v984_v53 = vpop.f32.mrb[59].mxu1  ;;  %v1381_v6 = vshll.u32 %v1328_v43, 16 }
 0x20c   :  { %v1100_v42 = vpop.f32.mrb[60].mxu0  ;;  %5790 = vmatmul.mubr.msk.bf16.gmra.mrb[88].mxu1 %vm6865_vm3, %v1327_v11  ;;  %v1414_v54 = vrot.slane %v1340_v51, 1  ;;  %v1377_v57 = vshll.u32 %v1340_v51, 16  ;;  %v1151_v58 = vadd.f32 %v7155_v21, %v1093_v48  ;;  %v1375_v63 = vshrl.u32 %v1340_v51, 16 }
 0x20d   :  { %v1101_v55 = vpop.f32.mrb[61].mxu0  ;;  %v1152_v59 = vadd.f32 %v7155_v21, %v1096_v50  ;;  %v1383_v7 = vrot.slane %v1381_v6, 1  ;;  %v7192_v21 = vld [vmem:[%s8461_s4 + $0x1] ss:$0 sm:$0xff] }
 0x20e   :  { %v1103_v60 = vpop.f32.mrb[62].mxu0  ;;  %v1416_v61 = vsel %vm270_vm1, %v1414_v54, %v1415_v52  ;;  %v1379_v0 = vrot.slane %v1377_v57, 1 }
 0x20f   :  { %v1104_v62 = vpop.f32.mrb[63].mxu0  ;;  %1705 = vmatmul.mubr.bf16.gmra.mrb[92].mxu0 %v1416_v61  ;;  %v1319_v3 = vpack.c.bf16 %v1152_v59, %v1151_v58 }
 0x210   :  { %1712 = vmatprep.mubr.bf16.mxu0 %v6652_v1  ;;  %v1380_v5 = vor.u32 %v1379_v0, %v1375_v63 }
 0x211   :  { %v987_v56 = vpop.f32.mrb[60].mxu1  ;;  %v1329_v8 = vrot.slane %v1319_v3, 7 }
 0x212   :  { %v988_v9 = vpop.f32.mrb[61].mxu1  ;;  %v1384_v2 = vsel %vm209_vm2, %v1380_v5, %v1383_v7 }
 0x213   :  { %v1102_v4 = vadd.f32 %v1101_v55, %v988_v9  ;;  %v990_v12 = vpop.f32.mrb[62].mxu1  ;;  %1591 = vmatprep.mubr.bf16.mxu1 %v1384_v2  ;;  %v1343_v16 = vsel %vm192_vm0, 0, %v1329_v8  ;;  %v1418_v17 = vrot.slane %v1329_v8, 1  ;;  %v1391_v24 = vshll.u32 %v1329_v8, 16 }
 0x214   :  { %v991_v14 = vpop.f32.mrb[63].mxu1  ;;  %v1108_v15 = vpop.f32.mrb[64].mxu0  ;;  %5792 = vmatmul.mubr.msk.bf16.gmra.mrb[92].mxu1 %vm6865_vm3, %v1328_v43  ;;  %v1417_v11 = vrot.slane %v1343_v16, 1  ;;  %v1387_v10 = vshll.u32 %v1343_v16, 16  ;;  %v1385_v31 = vshrl.u32 %v1343_v16, 16 }
 0x215   :  { %v1105_v18 = vadd.f32 %v1104_v62, %v991_v14  ;;  %v1109_v19 = vpop.f32.mrb[65].mxu0  ;;  %v1157_v28 = vadd.f32 %v7192_v21, %v1102_v4  ;;  %v1393_v38 = vrot.slane %v1391_v24, 1 }
 0x216   :  { %v1111_v22 = vpop.f32.mrb[66].mxu0  ;;  %v1419_v30 = vsel %vm270_vm1, %v1417_v11, %v1418_v17  ;;  %v1389_v13 = vrot.slane %v1387_v10, 1 }
 0x217   :  { %v1158_v29 = vadd.f32 %v7192_v21, %v1105_v18  ;;  %v1112_v20 = vpop.f32.mrb[67].mxu0  ;;  %1713 = vmatmul.mubr.bf16.gmra.mrb[96].mxu0 %v1419_v30 }
 0x218   :  { %1720 = vmatprep.mubr.bf16.mxu0 %v6652_v1  ;;  %v1390_v37 = vor.u32 %v1389_v13, %v1385_v31 }
 0x219   :  { %v1425_v33 = vpack.c.bf16 %v1158_v29, %v1157_v28  ;;  %v995_v25 = vpop.f32.mrb[64].mxu1 }
 0x21a   :  { %v996_v36 = vpop.f32.mrb[65].mxu1  ;;  %v1394_v45 = vsel %vm209_vm2, %v1390_v37, %v1393_v38 }
 0x21b   :  { %v1435_v39 = vrot.slane %v1425_v33, 7  ;;  %v1110_v40 = vadd.f32 %v1109_v19, %v996_v36  ;;  %v998_v44 = vpop.f32.mrb[66].mxu1  ;;  %1599 = vmatprep.mubr.bf16.mxu1 %v1394_v45 }
 0x21c   :  { %v999_v46 = vpop.f32.mrb[67].mxu1  ;;  %v1116_v47 = vpop.f32.mrb[68].mxu0  ;;  %5794 = vmatmul.mubr.msk.bf16.gmra.mrb[96].mxu1 %vm6865_vm3, %v1329_v8 }
 0x21d   :  { %v1113_v23 = vadd.f32 %v1112_v20, %v999_v46  ;;  %v1117_v35 = vpop.f32.mrb[69].mxu0  ;;  %v1441_v32 = vsel %vm192_vm0, 0, %v1435_v39  ;;  %v1516_v43 = vrot.slane %v1435_v39, 1  ;;  %v1461_v27 = vshll.u32 %v1435_v39, 16 }
 0x21e   :  { %v1119_v41 = vpop.f32.mrb[70].mxu0  ;;  %v1515_v48 = vrot.slane %v1441_v32, 1  ;;  %v1457_v49 = vshll.u32 %v1441_v32, 16  ;;  %v1159_v34 = vadd.f32 %v7192_v21, %v1110_v40  ;;  %v1455_v53 = vshrl.u32 %v1441_v32, 16 }
 0x21f   :  { %v1160_v51 = vadd.f32 %v7192_v21, %v1113_v23  ;;  %v1120_v52 = vpop.f32.mrb[71].mxu0  ;;  %v1463_v58 = vrot.slane %v1461_v27, 1 }
 0x220   :  { %v1517_v50 = vsel %vm270_vm1, %v1515_v48, %v1516_v43  ;;  %v1459_v42 = vrot.slane %v1457_v49, 1 }
 0x221   :  { %v1426_v54 = vpack.c.bf16 %v1160_v51, %v1159_v34  ;;  %v1003_v55 = vpop.f32.mrb[68].mxu1  ;;  %1721 = vmatmul.mubr.bf16.gmra.mrb[100].mxu0 %v1517_v50 }
 0x222   :  { %v1004_v57 = vpop.f32.mrb[69].mxu1  ;;  %v1460_v6 = vor.u32 %v1459_v42, %v1455_v53  ;;  %1728 = vmatprep.mubr.bf16.mxu0 %v6652_v1 }
 0x223   :  { %v1436_v59 = vrot.slane %v1426_v54, 7  ;;  %v1118_v60 = vadd.f32 %v1117_v35, %v1004_v57  ;;  %v1006_v61 = vpop.f32.mrb[70].mxu1 }
 0x224   :  { %v1007_v62 = vpop.f32.mrb[71].mxu1  ;;  %v1124_v63 = vpop.f32.mrb[72].mxu0  ;;  %v1464_v0 = vsel %vm209_vm2, %v1460_v6, %v1463_v58 }
 0x225   :  { %v1121_v3 = vadd.f32 %v1120_v52, %v1007_v62  ;;  %v1125_v56 = vpop.f32.mrb[73].mxu0  ;;  %1607 = vmatprep.mubr.bf16.mxu1 %v1464_v0  ;;  %v1444_v5 = vsel %vm192_vm0, 0, %v1436_v59  ;;  %v1519_v7 = vrot.slane %v1436_v59, 1  ;;  %v1471_v12 = vshll.u32 %v1436_v59, 16 }
 0x226   :  { %v1127_v8 = vpop.f32.mrb[74].mxu0  ;;  %5796 = vmatmul.mubr.msk.bf16.gmra.mrb[100].mxu1 %vm6865_vm3, %v1435_v39  ;;  %v1518_v9 = vrot.slane %v1444_v5, 1  ;;  %v1467_v4 = vshll.u32 %v1444_v5, 16  ;;  %v1161_v2 = vadd.f32 %v7192_v21, %v1118_v60  ;;  %v1465_v17 = vshrl.u32 %v1444_v5, 16 }
 0x227   :  { %v1162_v14 = vadd.f32 %v7192_v21, %v1121_v3  ;;  %v1128_v15 = vpop.f32.mrb[75].mxu0  ;;  %v1473_v24 = vrot.slane %v1471_v12, 1 }
 0x228   :  { %v1520_v16 = vsel %vm270_vm1, %v1518_v9, %v1519_v7  ;;  %v1469_v18 = vrot.slane %v1467_v4, 1 }
 0x229   :  { %v1427_v19 = vpack.c.bf16 %v1162_v14, %v1161_v2  ;;  %v1011_v11 = vpop.f32.mrb[72].mxu1  ;;  %1729 = vmatmul.mubr.bf16.gmra.mrb[104].mxu0 %v1520_v16 }
 0x22a   :  { %v1012_v22 = vpop.f32.mrb[73].mxu1  ;;  %v1470_v10 = vor.u32 %v1469_v18, %v1465_v17  ;;  %1736 = vmatprep.mubr.bf16.mxu0 %v6652_v1  ;;  %v6355_v11 = vld [vmem:[%s8457_s3 + $0x108] sm:$0xff]  }
 0x22b   :  { %v1437_v28 = vrot.slane %v1427_v19, 7  ;;  %v1126_v29 = vadd.f32 %v1125_v56, %v1012_v22  ;;  %v1014_v20 = vpop.f32.mrb[74].mxu1  ;;  %v6354_v19 = vld [vmem:[%s8457_s3 + $0xd8] sm:$0xff]   ;;  %2260 = vmatprep.subr.bf16.mxu0 %v6355_v11 }
 0x22c   :  { %v1015_v30 = vpop.f32.mrb[75].mxu1  ;;  %v1132_v31 = vpop.f32.mrb[76].mxu0  ;;  %v1474_v13 = vsel %vm209_vm2, %v1470_v10, %v1473_v24  ;;  %v6356_v22 = vld [vmem:[%s8458_s1 + $0xd8] sm:$0xff]   ;;  %v6357_v10 = vld [vmem:[%s8458_s1 + $0x108] sm:$0xff]   ;;  %2147 = vmatprep.subr.bf16.mxu1 %v6354_v19  ;;  %v6358_v24 = vld [vmem:[%s8457_s3 + $0xe0] sm:$0xff]  }
 0x22d   :  { %v1129_v33 = vadd.f32 %v1128_v15, %v1015_v30  ;;  %v1133_v25 = vpop.f32.mrb[77].mxu0  ;;  %1615 = vmatprep.mubr.bf16.mxu1 %v1474_v13  ;;  %v1447_v36 = vsel %vm192_vm0, 0, %v1437_v28  ;;  %v1522_v37 = vrot.slane %v1437_v28, 1  ;;  %v1481_v44 = vshll.u32 %v1437_v28, 16  ;;  %2148 = vmatpush1.bf16.msra.mxu1 %v6356_v22  ;;  %v6361_v20 = vld [vmem:[%s8458_s1 + $0xe8] sm:$0xff]   ;;  %v6362_v30 = vld [vmem:[%s8457_s3 + $0x110] sm:$0xff]  }
 0x22e   :  { %v1135_v38 = vpop.f32.mrb[78].mxu0  ;;  %5798 = vmatmul.mubr.msk.bf16.gmra.mrb[104].mxu1 %vm6865_vm3, %v1436_v59  ;;  %v1521_v39 = vrot.slane %v1447_v36, 1  ;;  %v1477_v40 = vshll.u32 %v1447_v36, 16  ;;  %v1163_v45 = vadd.f32 %v7192_v21, %v1126_v29  ;;  %v1475_v35 = vshrl.u32 %v1447_v36, 16  ;;  %2261 = vmatpush1.bf16.msra.mxu0 %v6357_v10  ;;  %v6360_v29 = vld [vmem:[%s8457_s3 + $0xe8] sm:$0xff]   ;;  %v6363_v31 = vld [vmem:[%s8458_s1 + $0x110] sm:$0xff]  }
 0x22f   :  { %v1164_v46 = vadd.f32 %v7192_v21, %v1129_v33  ;;  %v1136_v47 = vpop.f32.mrb[79].mxu0  ;;  %v1483_v27 = vrot.slane %v1481_v44, 1  ;;  %2149 = vmatprep.subr.bf16.mxu1 %v6358_v24  ;;  %2262 = vmatprep.subr.bf16.mxu0 %v6362_v30  ;;  %v6366_v13 = vld [vmem:[%s8457_s3 + $0xf0] sm:$0xff]   ;;  %v6365_v36 = vld [vmem:[%s8458_s1 + $0x118] sm:$0xff]  }
 0x230   :  { %v1523_v23 = vsel %vm270_vm1, %v1521_v39, %v1522_v37  ;;  %v1479_v32 = vrot.slane %v1477_v40, 1  ;;  %v6367_v33 = vld [vmem:[%s8458_s1 + $0xf0] sm:$0xff]   ;;  %v6368_v37 = vld [vmem:[%s8457_s3 + $0xf8] sm:$0xff]   ;;  %v6370_v39 = vld [vmem:[%s8457_s3 + $0x100] sm:$0xff]  }
 0x231   :  { %v1428_v43 = vpack.c.bf16 %v1164_v46, %v1163_v45  ;;  %v1019_v41 = vpop.f32.mrb[76].mxu1  ;;  %1737 = vmatmul.mubr.bf16.gmra.mrb[108].mxu0 %v1523_v23  ;;  %v6369_v38 = vld [vmem:[%s8458_s1 + $0xf8] sm:$0xff]   ;;  %v6371_v40 = vld [vmem:[%s8458_s1 + $0x100] sm:$0xff]  }
 0x232   :  { %v1020_v48 = vpop.f32.mrb[77].mxu1  ;;  %v1480_v49 = vor.u32 %v1479_v32, %v1475_v35  ;;  %1744 = vmatprep.mubr.bf16.mxu0 %v6652_v1  ;;  %2263 = vmatpush1.bf16.msra.mxu0 %v6363_v31 }
 0x233   :  { %v1438_v34 = vrot.slane %v1428_v43, 7  ;;  %v1134_v51 = vadd.f32 %v1133_v25, %v1020_v48  ;;  %v1022_v52 = vpop.f32.mrb[78].mxu1  ;;  %v6364_v25 = vld [vmem:[%s8457_s3 + $0x118] sm:$0xff]  }
 0x234   :  { %v1023_v50 = vpop.f32.mrb[79].mxu1  ;;  %v1484_v53 = vsel %vm209_vm2, %v1480_v49, %v1483_v27  ;;  %2264 = vmatprep.subr.bf16.mxu0 %v6364_v25 }
 0x235   :  { %v1137_v42 = vadd.f32 %v1136_v47, %v1023_v50  ;;  %1623 = vmatprep.mubr.bf16.mxu1 %v1484_v53  ;;  %v1450_v54 = vsel %vm192_vm0, 0, %v1438_v34  ;;  %v1525_v55 = vrot.slane %v1438_v34, 1  ;;  %v1491_v58 = vshll.u32 %v1438_v34, 16 }
 0x236   :  { %5800 = vmatmul.mubr.msk.bf16.gmra.mrb[108].mxu1 %vm6865_vm3, %v1437_v28  ;;  %v1524_v57 = vrot.slane %v1450_v54, 1  ;;  %v1487_v6 = vshll.u32 %v1450_v54, 16  ;;  %v1165_v59 = vadd.f32 %v7192_v21, %v1134_v51  ;;  %v1485_v62 = vshrl.u32 %v1450_v54, 16  ;;  %v6359_v28 = vld [vmem:[%s8458_s1 + $0xe0] sm:$0xff]   ;;  %2265 = vmatpush1.bf16.msra.mxu0 %v6365_v36 }
 0x237   :  { %v1166_v60 = vadd.f32 %v7192_v21, %v1137_v42  ;;  %v1493_v56 = vrot.slane %v1491_v58, 1  ;;  %2150 = vmatpush1.bf16.msra.mxu1 %v6359_v28 }
 0x238   :  { %v1526_v61 = vsel %vm270_vm1, %v1524_v57, %v1525_v55  ;;  %v1489_v63 = vrot.slane %v1487_v6, 1  ;;  %2151 = vmatprep.subr.bf16.mxu1 %v6360_v29 }
 0x239   :  { %v1429_v0 = vpack.c.bf16 %v1166_v60, %v1165_v59  ;;  %1745 = vmatmul.mubr.bf16.gmra.mrb[112].mxu0 %v1526_v61 }
 0x23a   :  { %v1490_v3 = vor.u32 %v1489_v63, %v1485_v62  ;;  %1752 = vmatprep.mubr.bf16.mxu0 %v6652_v1  ;;  %v7309_v63 = vld [vmem:[%s8460_s2 + $0x2] ss:$0 sm:$0xff] }
 0x23b   :  { %v1439_v5 = vrot.slane %v1429_v0, 7  ;;  %2152 = vmatpush1.bf16.msra.mxu1 %v6361_v20 }
 0x23c   :  { %v1494_v7 = vsel %vm209_vm2, %v1490_v3, %v1493_v56  ;;  %2153 = vmatprep.subr.bf16.mxu1 %v6652_v1 }
 0x23d   :  { %1631 = vmatprep.mubr.bf16.mxu1 %v1494_v7  ;;  %v1453_v8 = vsel %vm192_vm0, 0, %v1439_v5  ;;  %v1528_v9 = vrot.slane %v1439_v5, 1  ;;  %v1501_v12 = vshll.u32 %v1439_v5, 16 }
 0x23e   :  { %5802 = vmatmul.mubr.msk.bf16.gmra.mrb[112].mxu1 %vm6865_vm3, %v1438_v34  ;;  %v1527_v21 = vrot.slane %v1453_v8, 1  ;;  %v1497_v4 = vshll.u32 %v1453_v8, 16  ;;  %v1495_v14 = vshrl.u32 %v1453_v8, 16 }
 0x23f   :  { %v1503_v17 = vrot.slane %v1501_v12, 1  ;;  %2154 = vmatpush1.bf16.msra.mxu1 %v6652_v1  ;;  %v6373_v12 = vld [vmem:[%s8457_s3 + $0x150] sm:$0xff]  }
 0x240   :  { %v1529_v2 = vsel %vm270_vm1, %v1527_v21, %v1528_v9  ;;  %v1499_v15 = vrot.slane %v1497_v4, 1  ;;  %2155 = vmatprep.subr.bf16.mxu1 %v6652_v1  ;;  %v6372_v4 = vld [vmem:[%s8457_s3 + $0x120] sm:$0xff]   ;;  %2882 = vmatprep.subr.bf16.mxu0 %v6373_v12 }
 0x241   :  { %1753 = vmatmul.mubr.bf16.gmra.mrb[116].mxu0 %v1529_v2 }
 0x242   :  { %v1500_v16 = vor.u32 %v1499_v15, %v1495_v14  ;;  %2292 = vmatprep.mubr.bf16.mxu0 %v6652_v1 }
 0x243   :  { %2156 = vmatpush1.bf16.msra.mxu1 %v6652_v1 }
 0x244   :  { %v1504_v18 = vsel %vm209_vm2, %v1500_v16, %v1503_v17  ;;  %2157 = vmatprep.subr.bf16.mxu1 %v6652_v1 }
 0x245   :  { %1639 = vmatprep.mubr.bf16.mxu1 %v1504_v18 }
 0x246   :  { %5804 = vmatmul.mubr.msk.bf16.gmra.mrb[116].mxu1 %vm6865_vm3, %v1439_v5 }
 0x247   :  { %2158 = vmatpush1.bf16.msra.mxu1 %v6652_v1 }
 0x248   :  { %2159 = vmatprep.subr.bf16.mxu1 %v6652_v1 }
 0x24b   :  { %2160 = vmatpush1.bf16.msra.mxu1 %v6652_v1 }
 0x24c   :  { %2161 = vmatprep.subr.bf16.mxu1 %v6652_v1 }
 0x24f   :  { %2162 = vmatpush1.bf16.msra.mxu1 %v6652_v1 }
 0x250   :  { %2163 = vmatprep.subr.bf16.mxu1 %v6366_v13 }
 0x253   :  { %2164 = vmatpush1.bf16.msra.mxu1 %v6367_v33 }
 0x254   :  { %2165 = vmatprep.subr.bf16.mxu1 %v6368_v37 }
 0x257   :  { %2166 = vmatpush1.bf16.msra.mxu1 %v6369_v38 }
 0x258   :  { %2167 = vmatprep.subr.bf16.mxu1 %v6370_v39 }
 0x25b   :  { %2168 = vmatpush1.bf16.msra.mxu1 %v6371_v40 }
 0x25c   :  { %2769 = vmatprep.subr.bf16.mxu1 %v6372_v4 }
 0x2ca   :  { %v1682_v44 = vpop.f32.mrb[80].mxu0 }
 0x2cb   :  { %v1684_v45 = vpop.f32.mrb[81].mxu0 }
 0x2cc   :  { %v1685_v46 = vpop.f32.mrb[82].mxu0 }
 0x2cd   :  { %v1687_v47 = vpop.f32.mrb[83].mxu0 }
 0x2cf   :  { %v1569_v23 = vpop.f32.mrb[80].mxu1 }
 0x2d0   :  { %v1683_v35 = vadd.f32 %v1682_v44, %v1569_v23  ;;  %v1571_v32 = vpop.f32.mrb[81].mxu1 }
 0x2d1   :  { %v1572_v43 = vpop.f32.mrb[82].mxu1 }
 0x2d2   :  { %v1686_v41 = vadd.f32 %v1685_v46, %v1572_v43  ;;  %v1574_v48 = vpop.f32.mrb[83].mxu1  ;;  %v1690_v49 = vpop.f32.mrb[84].mxu0  ;;  %v1765_v8 = vadd.f32 %v7309_v63, %v1683_v35 }
 0x2d3   :  { %v1692_v27 = vpop.f32.mrb[85].mxu0 }
 0x2d4   :  { %v1693_v34 = vpop.f32.mrb[86].mxu0  ;;  %v1766_v2 = vadd.f32 %v7309_v63, %v1686_v41  ;;  %v5807_v14 = vmul.f32 -1.442695, %v1765_v8  ;;  %v7326_v27 = vld [vmem:[%s8461_s4 + $0x2] ss:$0 sm:$0xff] }
 0x2d5   :  { %v1695_v51 = vpop.f32.mrb[87].mxu0 }
 0x2d6   :  { %v5808_v19 = vmul.f32 -1.442695, %v1766_v2  ;;  %6462 = vpow2.f32 %v5807_v14 }
 0x2d7   :  { %v1577_v52 = vpop.f32.mrb[84].mxu1 }
 0x2d8   :  { %v1691_v50 = vadd.f32 %v1690_v49, %v1577_v52  ;;  %v1579_v53 = vpop.f32.mrb[85].mxu1  ;;  %6464 = vpow2.f32 %v5808_v19 }
 0x2d9   :  { %v1580_v42 = vpop.f32.mrb[86].mxu1 }
 0x2da   :  { %v1694_v54 = vadd.f32 %v1693_v34, %v1580_v42  ;;  %v1582_v55 = vpop.f32.mrb[87].mxu1  ;;  %v1698_v57 = vpop.f32.mrb[88].mxu0  ;;  %v1767_v24 = vadd.f32 %v7309_v63, %v1691_v50 }
 0x2db   :  { %v1700_v6 = vpop.f32.mrb[89].mxu0 }
 0x2dc   :  { %v1701_v58 = vpop.f32.mrb[90].mxu0  ;;  %v1768_v29 = vadd.f32 %v7309_v63, %v1694_v54  ;;  %v5809_v31 = vmul.f32 -1.442695, %v1767_v24 }
 0x2dd   :  { %v1703_v59 = vpop.f32.mrb[91].mxu0 }
 0x2de   :  { %v5810_v13 = vmul.f32 -1.442695, %v1768_v29  ;;  %6466 = vpow2.f32 %v5809_v31 }
 0x2df   :  { %v1585_v60 = vpop.f32.mrb[88].mxu1 }
 0x2e0   :  { %v1699_v61 = vadd.f32 %v1698_v57, %v1585_v60  ;;  %v1587_v62 = vpop.f32.mrb[89].mxu1  ;;  %6468 = vpow2.f32 %v5810_v13  ;;  %v6463_v46 = vpop.eup %6462 }
 0x2e1   :  { %v1588_v0 = vpop.f32.mrb[90].mxu1  ;;  %v1819_v41 = vadd.f32 1.0, %v6463_v46 }
 0x2e2   :  { %v1702_v3 = vadd.f32 %v1701_v58, %v1588_v0  ;;  %v1590_v56 = vpop.f32.mrb[91].mxu1  ;;  %v1706_v5 = vpop.f32.mrb[92].mxu0  ;;  %v1769_v38 = vadd.f32 %v7309_v63, %v1699_v61 }
 0x2e3   :  { %v1708_v7 = vpop.f32.mrb[93].mxu0  ;;  %v6465_v43 = vpop.eup %6464 }
 0x2e4   :  { %v1709_v9 = vpop.f32.mrb[94].mxu0  ;;  %v1770_v47 = vadd.f32 %v7309_v63, %v1702_v3  ;;  %v5811_v32 = vmul.f32 -1.442695, %v1769_v38  ;;  %v1820_v50 = vadd.f32 1.0, %v6465_v43 }
 0x2e5   :  { %v1711_v21 = vpop.f32.mrb[95].mxu0 }
 0x2e6   :  { %v5812_v49 = vmul.f32 -1.442695, %v1770_v47  ;;  %6470 = vpow2.f32 %v5811_v32  ;;  %v6642_v32 = vld [vmem:[%s8459_s0] sm:$0xff] }
 0x2e7   :  { %v1593_v15 = vpop.f32.mrb[92].mxu1  ;;  %6472 = vrcp.f32 %v1819_v41  ;;  %v6643_v41 = vld [vmem:[%s8459_s0 + $0x8] sm:$0xff] }
 0x2e8   :  { %v1707_v16 = vadd.f32 %v1706_v5, %v1593_v15  ;;  %v1595_v17 = vpop.f32.mrb[93].mxu1  ;;  %v6467_v58 = vpop.eup %6466  ;;  %6474 = vpow2.f32 %v5812_v49 }
 0x2e9   :  { %v1596_v18 = vpop.f32.mrb[94].mxu1  ;;  %v1821_v56 = vadd.f32 1.0, %v6467_v58 }
 0x2ea   :  { %v1710_v11 = vadd.f32 %v1709_v9, %v1596_v18  ;;  %v1598_v22 = vpop.f32.mrb[95].mxu1  ;;  %v1714_v10 = vpop.f32.mrb[96].mxu0  ;;  %v1771_v53 = vadd.f32 %v7309_v63, %v1707_v16 }
 0x2eb   :  { %v1716_v28 = vpop.f32.mrb[97].mxu0  ;;  %v6469_v60 = vpop.eup %6468 }
 0x2ec   :  { %v1717_v20 = vpop.f32.mrb[98].mxu0  ;;  %v1772_v61 = vadd.f32 %v7309_v63, %v1710_v11  ;;  %v5813_v3 = vmul.f32 -1.442695, %v1771_v53  ;;  %v1822_v7 = vadd.f32 1.0, %v6469_v60 }
 0x2ed   :  { %v1719_v30 = vpop.f32.mrb[99].mxu0 }
 0x2ee   :  { %v5814_v21 = vmul.f32 -1.442695, %v1772_v61 }
 0x2ef   :  { %v1601_v33 = vpop.f32.mrb[96].mxu1 }
 0x2f0   :  { %v1715_v25 = vadd.f32 %v1714_v10, %v1601_v33  ;;  %v1603_v36 = vpop.f32.mrb[97].mxu1  ;;  %v6471_v18 = vpop.eup %6470 }
 0x2f1   :  { %v1604_v37 = vpop.f32.mrb[98].mxu1  ;;  %v6473_v10 = vpop.eup %6472  ;;  %v1823_v30 = vadd.f32 1.0, %v6471_v18 }
 0x2f2   :  { %v1718_v39 = vadd.f32 %v1717_v20, %v1604_v37  ;;  %v1606_v40 = vpop.f32.mrb[99].mxu1  ;;  %v1773_v8 = vadd.f32 %v7309_v63, %v1715_v25  ;;  %v6475_v29 = vpop.eup %6474 }
 0x2f4   :  { %v1722_v44 = vpop.f32.mrb[100].mxu0  ;;  %v5815_v19 = vmul.f32 -1.442695, %v1773_v8  ;;  %v1774_v11 = vadd.f32 %v7309_v63, %v1718_v39  ;;  %v1824_v39 = vadd.f32 1.0, %v6475_v29 }
 0x2f5   :  { %v1723_v45 = vpop.f32.mrb[101].mxu0 }
 0x2f6   :  { %v1725_v23 = vpop.f32.mrb[102].mxu0  ;;  %v5816_v33 = vmul.f32 -1.442695, %v1774_v11 }
 0x2f7   :  { %v1726_v35 = vpop.f32.mrb[103].mxu0 }
 0x2f9   :  { %v1609_v48 = vpop.f32.mrb[100].mxu1 }
 0x2fa   :  { %v1610_v34 = vpop.f32.mrb[101].mxu1 }
 0x2fb   :  { %v1724_v51 = vadd.f32 %v1723_v45, %v1610_v34  ;;  %v1612_v52 = vpop.f32.mrb[102].mxu1 }
 0x2fc   :  { %v1613_v42 = vpop.f32.mrb[103].mxu1  ;;  %v1730_v54 = vpop.f32.mrb[104].mxu0 }
 0x2fd   :  { %v1779_v55 = vadd.f32 %v7326_v27, %v1724_v51  ;;  %v1727_v57 = vadd.f32 %v1726_v35, %v1613_v42  ;;  %v1731_v6 = vpop.f32.mrb[105].mxu0 }
 0x2fe   :  { %v1733_v59 = vpop.f32.mrb[106].mxu0 }
 0x2ff   :  { %6476 = vtanh.f32 %v1779_v55  ;;  %v1780_v62 = vadd.f32 %v7326_v27, %v1727_v57  ;;  %v1734_v0 = vpop.f32.mrb[107].mxu0 }
 0x300   :  { %6478 = vrcp.f32 %v1820_v50 }
 0x301   :  { %6480 = vtanh.f32 %v1780_v62  ;;  %v1617_v5 = vpop.f32.mrb[104].mxu1 }
 0x302   :  { %v1618_v9 = vpop.f32.mrb[105].mxu1  ;;  %6482 = vpow2.f32 %v5813_v3 }
 0x303   :  { %v1732_v4 = vadd.f32 %v1731_v6, %v1618_v9  ;;  %v1620_v12 = vpop.f32.mrb[106].mxu1  ;;  %6484 = vrcp.f32 %v1821_v56 }
 0x304   :  { %v1621_v2 = vpop.f32.mrb[107].mxu1  ;;  %v1738_v14 = vpop.f32.mrb[108].mxu0  ;;  %6486 = vrcp.f32 %v1822_v7 }
 0x305   :  { %v1781_v15 = vadd.f32 %v7326_v27, %v1732_v4  ;;  %v1735_v16 = vadd.f32 %v1734_v0, %v1621_v2  ;;  %v1739_v17 = vpop.f32.mrb[109].mxu0  ;;  %6488 = vpow2.f32 %v5814_v21  ;;  %v6375_v14 = vld [vmem:[%s8458_s1 + $0x150] sm:$0xff]  }
 0x306   :  { %v1741_v22 = vpop.f32.mrb[110].mxu0 }
 0x307   :  { %v1782_v24 = vadd.f32 %v7326_v27, %v1735_v16  ;;  %v1742_v28 = vpop.f32.mrb[111].mxu0  ;;  %6490 = vtanh.f32 %v1781_v15  ;;  %v6644_v15 = vld [vmem:[%s8459_s0 + $0x10] sm:$0xff] }
 0x309   :  { %v6477_v20 = vpop.eup %6476  ;;  %6492 = vtanh.f32 %v1782_v24  ;;  %v1625_v31 = vpop.f32.mrb[108].mxu1 }
 0x30a   :  { %v6479_v13 = vpop.eup %6478  ;;  %6494 = vpow2.f32 %v5815_v19  ;;  %v1859_v25 = vmul.f32 %v6477_v20, %v6473_v10  ;;  %v1626_v36 = vpop.f32.mrb[109].mxu1  ;;  %v6380_v10 = vld [vmem:[%s8457_s3 + $0x158] sm:$0xff]  }
 0x30b   :  { %v6481_v37 = vpop.eup %6480  ;;  %v1740_v38 = vadd.f32 %v1739_v17, %v1626_v36  ;;  %v1628_v63 = vpop.f32.mrb[110].mxu1  ;;  %6496 = vrcp.f32 %v1823_v30  ;;  %v6645_v17 = vld [vmem:[%s8459_s0 + $0x18] sm:$0xff] }
 0x30c   :  { %v1860_v40 = vmul.f32 %v6481_v37, %v6479_v13  ;;  %v1629_v44 = vpop.f32.mrb[111].mxu1  ;;  %v1746_v45 = vpop.f32.mrb[112].mxu0  ;;  %6498 = vpow2.f32 %v5816_v33  ;;  %v7340_v43 = vadd.f32 %v6642_v32, %v1859_v25 }
 0x30d   :  { %v1783_v46 = vadd.f32 %v7326_v27, %v1740_v38  ;;  %v1743_v47 = vadd.f32 %v1742_v28, %v1629_v44  ;;  %v1747_v23 = vpop.f32.mrb[113].mxu0  ;;  %v6483_v35 = vpop.eup %6482  ;;  %v6381_v38 = vld [vmem:[%s8458_s1 + $0x158] sm:$0xff]  }
 0x30e   :  { %v7345_v48 = vadd.f32 %v6643_v41, %v1860_v40  ;;  %v1749_v49 = vpop.f32.mrb[114].mxu0  ;;  %v6485_v34 = vpop.eup %6484  ;;  %v1825_v54 = vadd.f32 1.0, %v6483_v35  ;;  %v6374_v41 = vld [vmem:[%s8458_s1 + $0x120] sm:$0xff]  }
 0x30f   :  { %6500 = vtanh.f32 %v1783_v46  ;;  %v1784_v51 = vadd.f32 %v7326_v27, %v1743_v47  ;;  %v1750_v52 = vpop.f32.mrb[115].mxu0  ;;  %v6487_v50 = vpop.eup %6486  ;;  %v6382_v47 = vld [vmem:[%s8457_s3 + $0x160] sm:$0xff]  }
 0x310   :  { %6502 = vrcp.f32 %v1824_v39  ;;  %v2037_v53 = vpack.c.bf16 %v7345_v48, %v7340_v43  ;;  %v6489_v42 = vpop.eup %6488 }
 0x311   :  { %6504 = vtanh.f32 %v1784_v51  ;;  %v1633_v55 = vpop.f32.mrb[112].mxu1  ;;  %v6491_v57 = vpop.eup %6490  ;;  %v1826_v3 = vadd.f32 1.0, %v6489_v42 }
 0x312   :  { %v1634_v6 = vpop.f32.mrb[113].mxu1  ;;  %v7350_v58 = vrot.slane %v2037_v53, 7  ;;  %v1861_v60 = vmul.f32 %v6491_v57, %v6485_v34  ;;  %6506 = vrcp.f32 %v1825_v54  ;;  %v6376_v53 = vld [vmem:[%s8457_s3 + $0x128] sm:$0xff]  }
 0x313   :  { %v6493_v59 = vpop.eup %6492  ;;  %v1748_v61 = vadd.f32 %v1747_v23, %v1634_v6  ;;  %v1636_v62 = vpop.f32.mrb[114].mxu1  ;;  %v6646_v6 = vld [vmem:[%s8459_s0 + $0x20] sm:$0xff] }
 0x314   :  { %v6495_v0 = vpop.eup %6494  ;;  %v1862_v56 = vmul.f32 %v6493_v59, %v6487_v50  ;;  %v1637_v5 = vpop.f32.mrb[115].mxu1  ;;  %v2053_v8 = vsel %vm192_vm0, 0, %v7350_v58  ;;  %v2128_v9 = vrot.slane %v7350_v58, 1  ;;  %v7362_v16 = vadd.f32 %v6644_v15, %v1861_v60  ;;  %v6647_v60 = vld [vmem:[%s8459_s0 + $0x28] sm:$0xff] }
 0x315   :  { %v1754_v7 = vpop.f32.mrb[116].mxu0  ;;  %v1785_v21 = vadd.f32 %v7326_v27, %v1748_v61  ;;  %v1751_v4 = vadd.f32 %v1750_v52, %v1637_v5  ;;  %v2127_v2 = vrot.slane %v2053_v8, 1  ;;  %v2069_v11 = vshll.u32 %v2053_v8, 16  ;;  %v6497_v24 = vpop.eup %6496 }
 0x316   :  { %v1755_v12 = vpop.f32.mrb[117].mxu0  ;;  %v7367_v18 = vadd.f32 %v6645_v17, %v1862_v56  ;;  %v2073_v22 = vshll.u32 %v7350_v58, 16  ;;  %v1827_v28 = vadd.f32 1.0, %v6495_v0  ;;  %v6499_v31 = vpop.eup %6498  ;;  %v2067_v13 = vshrl.u32 %v2053_v8, 16  ;;  %v6377_v7 = vld [vmem:[%s8458_s1 + $0x128] sm:$0xff]  }
 0x317   :  { %v1757_v19 = vpop.f32.mrb[118].mxu0  ;;  %6508 = vtanh.f32 %v1785_v21  ;;  %v1786_v29 = vadd.f32 %v7326_v27, %v1751_v4  ;;  %v7375_v30 = vsel %vm270_vm1, %v2127_v2, %v2128_v9  ;;  %v2071_v33 = vrot.slane %v2069_v11, 1  ;;  %v6379_v11 = vld [vmem:[%s8458_s1 + $0x130] sm:$0xff]  }
 0x318   :  { %v1758_v20 = vpop.f32.mrb[119].mxu0  ;;  %6510 = vrcp.f32 %v1826_v3  ;;  %2293 = vmatmul.mubr.bf16.vlgmr.msra.gmra.mrb[120].mxu0 %v7375_v30  ;;  %v2038_v25 = vpack.c.bf16 %v7367_v18, %v7362_v16  ;;  %v2075_v45 = vrot.slane %v2073_v22, 1  ;;  %v1828_v49 = vadd.f32 1.0, %v6499_v31 }
 0x319   :  { %v6501_v36 = vpop.eup %6500  ;;  %6512 = vtanh.f32 %v1786_v29  ;;  %v1641_v37 = vpop.f32.mrb[116].mxu1  ;;  %2300 = vmatprep.mubr.bf16.mxu0 %v6652_v1  ;;  %2883 = vmatpush1.bf16.msra.mxu0 %v6375_v14  ;;  %v2072_v44 = vor.u32 %v2071_v33, %v2067_v13  ;;  %v6648_v13 = vld [vmem:[%s8459_s0 + $0x30] sm:$0xff] }
 0x31a   :  { %v6503_v63 = vpop.eup %6502  ;;  %v1863_v39 = vmul.f32 %v6501_v36, %v6497_v24  ;;  %v1642_v40 = vpop.f32.mrb[117].mxu1  ;;  %v7384_v46 = vrot.slane %v2038_v25, 7  ;;  %2884 = vmatprep.subr.bf16.mxu0 %v6380_v10  ;;  %6514 = vrcp.f32 %v1827_v28  ;;  %v6649_v25 = vld [vmem:[%s8459_s0 + $0x38] sm:$0xff] }
 0x31b   :  { %v6505_v23 = vpop.eup %6504  ;;  %v1756_v35 = vadd.f32 %v1755_v12, %v1642_v40  ;;  %v1644_v32 = vpop.f32.mrb[118].mxu1  ;;  %v7393_v52 = vsel %vm209_vm2, %v2072_v44, %v2075_v45 }
 0x31c   :  { %v1864_v34 = vmul.f32 %v6505_v23, %v6503_v63  ;;  %v1645_v51 = vpop.f32.mrb[119].mxu1  ;;  %v2056_v50 = vsel %vm192_vm0, 0, %v7384_v46  ;;  %2179 = vmatprep.mubr.bf16.mxu1 %v7393_v52  ;;  %v2131_v57 = vrot.slane %v7384_v46, 1  ;;  %v7406_v59 = vadd.f32 %v6646_v6, %v1863_v39  ;;  %v6507_v3 = vpop.eup %6506  ;;  %v6651_v6 = vld [vmem:[%s8459_s0 + $0x48] sm:$0xff] }
 0x31d   :  { %v1787_v42 = vadd.f32 %v7326_v27, %v1756_v35  ;;  %v1759_v54 = vadd.f32 %v1758_v20, %v1645_v51  ;;  %v2130_v55 = vrot.slane %v2056_v50, 1  ;;  %2885 = vmatpush1.bf16.msra.mxu0 %v6381_v38  ;;  %5872 = vmatmul.mubr.msk.bf16.vlgmr.msra.gmra.mrb[120].mxu1 %vm6865_vm3, %v7350_v58  ;;  %v2079_v62 = vshll.u32 %v2056_v50, 16 }
 0x31e   :  { %v7411_v61 = vadd.f32 %v6647_v60, %v1864_v34  ;;  %v2083_v0 = vshll.u32 %v7384_v46, 16  ;;  %2886 = vmatprep.subr.bf16.mxu0 %v6382_v47  ;;  %2770 = vmatpush1.bf16.msra.mxu1 %v6374_v41  ;;  %v2077_v8 = vshrl.u32 %v2056_v50, 16 }
 0x31f   :  { %6516 = vtanh.f32 %v1787_v42  ;;  %v1788_v56 = vadd.f32 %v7326_v27, %v1759_v54  ;;  %v7419_v5 = vsel %vm270_vm1, %v2130_v55, %v2131_v57  ;;  %v2081_v9 = vrot.slane %v2079_v62, 1  ;;  %2771 = vmatprep.subr.bf16.mxu1 %v6376_v53  ;;  %v6378_v27 = vld [vmem:[%s8457_s3 + $0x130] sm:$0xff]   ;;  %v6650_v55 = vld [vmem:[%s8459_s0 + $0x40] sm:$0xff] }
 0x320   :  { %6518 = vrcp.f32 %v1828_v49  ;;  %2301 = vmatmul.mubr.bf16.gmra.mrb[124].mxu0 %v7419_v5  ;;  %v2039_v21 = vpack.c.bf16 %v7411_v61, %v7406_v59  ;;  %v2085_v15 = vrot.slane %v2083_v0, 1 }
 0x321   :  { %v6509_v4 = vpop.eup %6508  ;;  %6520 = vtanh.f32 %v1788_v56  ;;  %2308 = vmatprep.mubr.bf16.mxu0 %v6652_v1  ;;  %v2082_v14 = vor.u32 %v2081_v9, %v2077_v8 }
 0x322   :  { %v6511_v12 = vpop.eup %6510  ;;  %v1865_v2 = vmul.f32 %v6509_v4, %v6507_v3  ;;  %v7431_v17 = vrot.slane %v2039_v21, 7  ;;  %2772 = vmatpush1.bf16.msra.mxu1 %v6377_v7 }
 0x323   :  { %v6513_v19 = vpop.eup %6512  ;;  %v7437_v10 = vsel %vm209_vm2, %v2082_v14, %v2085_v15  ;;  %2773 = vmatprep.subr.bf16.mxu1 %v6378_v27 }
 0x324   :  { %v1866_v22 = vmul.f32 %v6513_v19, %v6511_v12  ;;  %v2059_v24 = vsel %vm192_vm0, 0, %v7431_v17  ;;  %v6515_v28 = vpop.eup %6514  ;;  %2187 = vmatprep.mubr.bf16.mxu1 %v7437_v10  ;;  %v2134_v20 = vrot.slane %v7431_v17, 1  ;;  %v7446_v33 = vadd.f32 %v6648_v13, %v1865_v2 }
 0x325   :  { %v2133_v29 = vrot.slane %v2059_v24, 1  ;;  %v2089_v31 = vshll.u32 %v2059_v24, 16  ;;  %5874 = vmatmul.mubr.msk.bf16.gmra.mrb[124].mxu1 %vm6865_vm3, %v7384_v46  ;;  %v2093_v37 = vshll.u32 %v7431_v17, 16  ;;  %v2087_v63 = vshrl.u32 %v2059_v24, 16 }
 0x326   :  { %v7451_v36 = vadd.f32 %v6649_v25, %v1866_v22  ;;  %2774 = vmatpush1.bf16.msra.mxu1 %v6379_v11 }
 0x327   :  { %v7458_v38 = vsel %vm270_vm1, %v2133_v29, %v2134_v20  ;;  %v2091_v39 = vrot.slane %v2089_v31, 1  ;;  %2775 = vmatprep.subr.bf16.mxu1 %v6652_v1  ;;  %v2095_v47 = vrot.slane %v2093_v37, 1  ;;  %v6390_v29 = vld [vmem:[%s8457_s3 + $0x168] sm:$0xff]   ;;  %v6391_v20 = vld [vmem:[%s8457_s3 + $0x198] sm:$0xff]  }
 0x328   :  { %2309 = vmatmul.mubr.bf16.gmra.mrb[128].mxu0 %v7458_v38  ;;  %v2040_v40 = vpack.c.bf16 %v7451_v36, %v7446_v33 }
 0x329   :  { %v6517_v44 = vpop.eup %6516  ;;  %v2092_v45 = vor.u32 %v2091_v39, %v2087_v63  ;;  %2316 = vmatprep.mubr.bf16.mxu0 %v6652_v1 }
 0x32a   :  { %v6519_v23 = vpop.eup %6518  ;;  %v1867_v35 = vmul.f32 %v6517_v44, %v6515_v28  ;;  %v7465_v32 = vrot.slane %v2040_v40, 7  ;;  %2776 = vmatpush1.bf16.msra.mxu1 %v6652_v1  ;;  %v7562_v40 = vld [vmem:[%s8460_s2 + $0x3] ss:$0 sm:$0xff] }
 0x32b   :  { %v6521_v41 = vpop.eup %6520  ;;  %v2096_v49 = vsel %vm209_vm2, %v2092_v45, %v2095_v47  ;;  %2777 = vmatprep.subr.bf16.mxu1 %v6652_v1 }
 0x32c   :  { %v1868_v34 = vmul.f32 %v6521_v41, %v6519_v23  ;;  %2195 = vmatprep.mubr.bf16.mxu1 %v2096_v49  ;;  %v2062_v51 = vsel %vm192_vm0, 0, %v7465_v32  ;;  %v2137_v50 = vrot.slane %v7465_v32, 1  ;;  %v2103_v54 = vshll.u32 %v7465_v32, 16 }
 0x32d   :  { %v2136_v53 = vrot.slane %v2062_v51, 1  ;;  %v2099_v42 = vshll.u32 %v2062_v51, 16  ;;  %v7477_v57 = vadd.f32 %v6650_v55, %v1867_v35  ;;  %5876 = vmatmul.mubr.msk.bf16.gmra.mrb[128].mxu1 %vm6865_vm3, %v7431_v17  ;;  %v2097_v0 = vshrl.u32 %v2062_v51, 16 }
 0x32e   :  { %v7482_v60 = vadd.f32 %v6651_v6, %v1868_v34  ;;  %2778 = vmatpush1.bf16.msra.mxu1 %v6652_v1  ;;  %v2105_v8 = vrot.slane %v2103_v54, 1 }
 0x32f   :  { %v2138_v62 = vsel %vm270_vm1, %v2136_v53, %v2137_v50  ;;  %v2101_v3 = vrot.slane %v2099_v42, 1  ;;  %2779 = vmatprep.subr.bf16.mxu1 %v6652_v1 }
 0x330   :  { %2317 = vmatmul.mubr.bf16.gmra.mrb[132].mxu0 %v2138_v62  ;;  %v2041_v56 = vpack.c.bf16 %v7482_v60, %v7477_v57 }
 0x331   :  { %v2102_v7 = vor.u32 %v2101_v3, %v2097_v0  ;;  %2324 = vmatprep.mubr.bf16.mxu0 %v6652_v1 }
 0x332   :  { %v2051_v9 = vrot.slane %v2041_v56, 7  ;;  %2780 = vmatpush1.bf16.msra.mxu1 %v6652_v1 }
 0x333   :  { %v2106_v21 = vsel %vm209_vm2, %v2102_v7, %v2105_v8  ;;  %2781 = vmatprep.subr.bf16.mxu1 %v6652_v1 }
 0x334   :  { %2203 = vmatprep.mubr.bf16.mxu1 %v2106_v21  ;;  %v2065_v27 = vsel %vm192_vm0, 0, %v2051_v9  ;;  %v2140_v4 = vrot.slane %v2051_v9, 1  ;;  %v2113_v14 = vshll.u32 %v2051_v9, 16 }
 0x335   :  { %v2139_v12 = vrot.slane %v2065_v27, 1  ;;  %v2109_v2 = vshll.u32 %v2065_v27, 16  ;;  %5878 = vmatmul.mubr.msk.bf16.gmra.mrb[132].mxu1 %vm6865_vm3, %v7465_v32  ;;  %v2107_v19 = vshrl.u32 %v2065_v27, 16 }
 0x336   :  { %2782 = vmatpush1.bf16.msra.mxu1 %v6652_v1  ;;  %v2115_v24 = vrot.slane %v2113_v14, 1 }
 0x337   :  { %v2141_v15 = vsel %vm270_vm1, %v2139_v12, %v2140_v4  ;;  %v2111_v11 = vrot.slane %v2109_v2, 1  ;;  %2783 = vmatprep.subr.bf16.mxu1 %v6652_v1  ;;  %v6393_v4 = vld [vmem:[%s8458_s1 + $0x198] sm:$0xff]  }
 0x338   :  { %2325 = vmatmul.mubr.bf16.gmra.mrb[136].mxu0 %v2141_v15 }
 0x339   :  { %v2112_v22 = vor.u32 %v2111_v11, %v2107_v19  ;;  %2332 = vmatprep.mubr.bf16.mxu0 %v6652_v1 }
 0x33a   :  { %2784 = vmatpush1.bf16.msra.mxu1 %v6652_v1 }
 0x33b   :  { %v2116_v28 = vsel %vm209_vm2, %v2112_v22, %v2115_v24 }
 0x33c   :  { %2211 = vmatprep.mubr.bf16.mxu1 %v2116_v28 }
 0x33d   :  { %5880 = vmatmul.mubr.msk.bf16.gmra.mrb[136].mxu1 %vm6865_vm3, %v2051_v9 }
 0x33e   :  { %2219 = vmatprep.mubr.bf16.mxu1 %v7393_v52  ;;  %v6386_v52 = vld [vmem:[%s8457_s3 + $0x140] sm:$0xff]  }
 0x340   :  { %2333 = vmatmul.mubr.bf16.gmra.mrb[140].mxu0 %v7375_v30  ;;  %v6384_v30 = vld [vmem:[%s8457_s3 + $0x138] sm:$0xff]  }
 0x341   :  { %2340 = vmatprep.mubr.bf16.mxu0 %v6652_v1  ;;  %2785 = vmatprep.subr.bf16.mxu1 %v6384_v30 }
 0x345   :  { %5882 = vmatmul.mubr.msk.bf16.gmra.mrb[140].mxu1 %vm6865_vm3, %v7350_v58  ;;  %v6383_v58 = vld [vmem:[%s8458_s1 + $0x160] sm:$0xff]  }
 0x346   :  { %2227 = vmatprep.mubr.bf16.mxu1 %v7437_v10  ;;  %2887 = vmatpush1.bf16.msra.mxu0 %v6383_v58  ;;  %v6389_v10 = vld [vmem:[%s8458_s1 + $0x148] sm:$0xff]  }
 0x347   :  { %3504 = vmatprep.subr.bf16.mxu0 %v6391_v20 }
 0x348   :  { %2341 = vmatmul.mubr.bf16.gmra.mrb[144].mxu0 %v7419_v5  ;;  %v6387_v5 = vld [vmem:[%s8458_s1 + $0x140] sm:$0xff]  }
 0x349   :  { %2348 = vmatprep.mubr.bf16.mxu0 %v6652_v1 }
 0x34d   :  { %5884 = vmatmul.mubr.msk.bf16.gmra.mrb[144].mxu1 %vm6865_vm3, %v7384_v46  ;;  %v6385_v46 = vld [vmem:[%s8458_s1 + $0x138] sm:$0xff]  }
 0x34e   :  { %2235 = vmatprep.mubr.bf16.mxu1 %v2096_v49  ;;  %2786 = vmatpush1.bf16.msra.mxu1 %v6385_v46  ;;  %v6399_v46 = vld [vmem:[%s8458_s1 + $0x1a0] sm:$0xff]  }
 0x34f   :  { %2787 = vmatprep.subr.bf16.mxu1 %v6386_v52 }
 0x350   :  { %2349 = vmatmul.mubr.bf16.gmra.mrb[148].mxu0 %v7458_v38 }
 0x351   :  { %2356 = vmatprep.mubr.bf16.mxu0 %v6652_v1 }
 0x352   :  { %2788 = vmatpush1.bf16.msra.mxu1 %v6387_v5 }
 0x355   :  { %5886 = vmatmul.mubr.msk.bf16.gmra.mrb[148].mxu1 %vm6865_vm3, %v7431_v17  ;;  %v6388_v17 = vld [vmem:[%s8457_s3 + $0x148] sm:$0xff]  }
 0x356   :  { %2243 = vmatprep.mubr.bf16.mxu1 %v2106_v21  ;;  %2789 = vmatprep.subr.bf16.mxu1 %v6388_v17 }
 0x357   :  { %2790 = vmatpush1.bf16.msra.mxu1 %v6389_v10  ;;  %v6392_v10 = vld [vmem:[%s8458_s1 + $0x168] sm:$0xff]  }
 0x358   :  { %2357 = vmatmul.mubr.bf16.gmra.mrb[152].mxu0 %v2138_v62  ;;  %3391 = vmatprep.subr.bf16.mxu1 %v6390_v29 }
 0x359   :  { %2364 = vmatprep.mubr.bf16.mxu0 %v6652_v1 }
 0x35d   :  { %5888 = vmatmul.mubr.msk.bf16.gmra.mrb[152].mxu1 %vm6865_vm3, %v7465_v32 }
 0x35e   :  { %2251 = vmatprep.mubr.bf16.mxu1 %v2116_v28 }
 0x360   :  { %2365 = vmatmul.mubr.bf16.gmra.mrb[156].mxu0 %v2141_v15  ;;  %v6398_v15 = vld [vmem:[%s8457_s3 + $0x1a0] sm:$0xff]  }
 0x361   :  { %2914 = vmatprep.mubr.bf16.mxu0 %v6652_v1 }
 0x365   :  { %5890 = vmatmul.mubr.msk.bf16.gmra.mrb[156].mxu1 %vm6865_vm3, %v2051_v9 }
 0x3eb   :  { %v2294_v31 = vpop.f32.mrb[120].mxu0 }
 0x3ec   :  { %v2296_v13 = vpop.f32.mrb[121].mxu0 }
 0x3ed   :  { %v2297_v25 = vpop.f32.mrb[122].mxu0  ;;  %v6394_v13 = vld [vmem:[%s8457_s3 + $0x170] sm:$0xff]  }
 0x3ee   :  { %v2299_v37 = vpop.f32.mrb[123].mxu0 }
 0x3f0   :  { %v2181_v38 = vpop.f32.mrb[120].mxu1 }
 0x3f1   :  { %v2295_v63 = vadd.f32 %v2294_v31, %v2181_v38  ;;  %v2183_v39 = vpop.f32.mrb[121].mxu1 }
 0x3f2   :  { %v2184_v44 = vpop.f32.mrb[122].mxu1 }
 0x3f3   :  { %v2302_v45 = vpop.f32.mrb[124].mxu0  ;;  %v2298_v47 = vadd.f32 %v2297_v25, %v2184_v44  ;;  %v2186_v23 = vpop.f32.mrb[123].mxu1  ;;  %v2377_v41 = vadd.f32 %v7562_v40, %v2295_v63 }
 0x3f4   :  { %v2304_v35 = vpop.f32.mrb[125].mxu0 }
 0x3f5   :  { %v2305_v32 = vpop.f32.mrb[126].mxu0  ;;  %v2378_v49 = vadd.f32 %v7562_v40, %v2298_v47 }
 0x3f6   :  { %v2307_v34 = vpop.f32.mrb[127].mxu0 }
 0x3f7   :  { %v2549_v51 = vpack.c.bf16 %v2378_v49, %v2377_v41  ;;  %v6395_v49 = vld [vmem:[%s8458_s1 + $0x170] sm:$0xff]  }
 0x3f8   :  { %v2189_v50 = vpop.f32.mrb[124].mxu1 }
 0x3f9   :  { %v2559_v53 = vrot.slane %v2549_v51, 7  ;;  %v2303_v42 = vadd.f32 %v2302_v45, %v2189_v50  ;;  %v2191_v54 = vpop.f32.mrb[125].mxu1 }
 0x3fa   :  { %v2192_v55 = vpop.f32.mrb[126].mxu1 }
 0x3fb   :  { %v2310_v6 = vpop.f32.mrb[128].mxu0  ;;  %v2306_v62 = vadd.f32 %v2305_v32, %v2192_v55  ;;  %v2194_v0 = vpop.f32.mrb[127].mxu1  ;;  %v2565_v56 = vsel %vm192_vm0, 0, %v2559_v53  ;;  %v2640_v7 = vrot.slane %v2559_v53, 1  ;;  %v2585_v27 = vshll.u32 %v2559_v53, 16 }
 0x3fc   :  { %v2312_v3 = vpop.f32.mrb[129].mxu0  ;;  %v2639_v9 = vrot.slane %v2565_v56, 1  ;;  %v2581_v21 = vshll.u32 %v2565_v56, 16  ;;  %v2379_v12 = vadd.f32 %v7562_v40, %v2303_v42  ;;  %v2579_v11 = vshrl.u32 %v2565_v56, 16  ;;  %v6397_v56 = vld [vmem:[%s8458_s1 + $0x178] sm:$0xff]  }
 0x3fd   :  { %v2313_v8 = vpop.f32.mrb[130].mxu0  ;;  %v2380_v2 = vadd.f32 %v7562_v40, %v2306_v62  ;;  %v2587_v30 = vrot.slane %v2585_v27, 1 }
 0x3fe   :  { %v2315_v14 = vpop.f32.mrb[131].mxu0  ;;  %v2641_v19 = vsel %vm270_vm1, %v2639_v9, %v2640_v7  ;;  %v2583_v22 = vrot.slane %v2581_v21, 1 }
 0x3ff   :  { %v2550_v24 = vpack.c.bf16 %v2380_v2, %v2379_v12  ;;  %2915 = vmatmul.mubr.bf16.vlgmr.msra.gmra.mrb[160].mxu0 %v2641_v19 }
 0x400   :  { %v2197_v28 = vpop.f32.mrb[128].mxu1  ;;  %v2584_v58 = vor.u32 %v2583_v22, %v2579_v11  ;;  %2922 = vmatprep.mubr.bf16.mxu0 %v6652_v1  ;;  %3505 = vmatpush1.bf16.msra.mxu0 %v6393_v4 }
 0x401   :  { %v2560_v52 = vrot.slane %v2550_v24, 7  ;;  %v2311_v5 = vadd.f32 %v2310_v6, %v2197_v28  ;;  %v2199_v17 = vpop.f32.mrb[129].mxu1  ;;  %3506 = vmatprep.subr.bf16.mxu0 %v6398_v15 }
 0x402   :  { %v2200_v29 = vpop.f32.mrb[130].mxu1  ;;  %v2588_v31 = vsel %vm209_vm2, %v2584_v58, %v2587_v30 }
 0x403   :  { %v2318_v20 = vpop.f32.mrb[132].mxu0  ;;  %v2314_v25 = vadd.f32 %v2313_v8, %v2200_v29  ;;  %v2202_v37 = vpop.f32.mrb[131].mxu1  ;;  %2801 = vmatprep.mubr.bf16.mxu1 %v2588_v31  ;;  %v2568_v63 = vsel %vm192_vm0, 0, %v2560_v52  ;;  %v2643_v39 = vrot.slane %v2560_v52, 1  ;;  %v2595_v23 = vshll.u32 %v2560_v52, 16 }
 0x404   :  { %v2320_v38 = vpop.f32.mrb[133].mxu0  ;;  %5948 = vmatmul.mubr.msk.bf16.vlgmr.msra.gmra.mrb[160].mxu1 %vm6865_vm3, %v2559_v53  ;;  %v2642_v45 = vrot.slane %v2568_v63, 1  ;;  %v2591_v47 = vshll.u32 %v2568_v63, 16  ;;  %3507 = vmatpush1.bf16.msra.mxu0 %v6399_v46  ;;  %v2381_v35 = vadd.f32 %v7562_v40, %v2311_v5  ;;  %v2589_v51 = vshrl.u32 %v2568_v63, 16  ;;  %v6396_v53 = vld [vmem:[%s8457_s3 + $0x178] sm:$0xff]  }
 0x405   :  { %v2321_v44 = vpop.f32.mrb[134].mxu0  ;;  %v2382_v32 = vadd.f32 %v7562_v40, %v2314_v25  ;;  %3392 = vmatpush1.bf16.msra.mxu1 %v6392_v10  ;;  %v2597_v6 = vrot.slane %v2595_v23, 1 }
 0x406   :  { %v2323_v41 = vpop.f32.mrb[135].mxu0  ;;  %v2644_v34 = vsel %vm270_vm1, %v2642_v45, %v2643_v39  ;;  %v2593_v50 = vrot.slane %v2591_v47, 1  ;;  %3393 = vmatprep.subr.bf16.mxu1 %v6394_v13 }
 0x407   :  { %v2551_v42 = vpack.c.bf16 %v2382_v32, %v2381_v35  ;;  %2923 = vmatmul.mubr.bf16.gmra.mrb[164].mxu0 %v2644_v34 }
 0x408   :  { %v2205_v54 = vpop.f32.mrb[132].mxu1  ;;  %v2594_v55 = vor.u32 %v2593_v50, %v2589_v51  ;;  %2930 = vmatprep.mubr.bf16.mxu0 %v6652_v1 }
 0x409   :  { %v2561_v62 = vrot.slane %v2551_v42, 7  ;;  %v2319_v0 = vadd.f32 %v2318_v20, %v2205_v54  ;;  %v2207_v3 = vpop.f32.mrb[133].mxu1  ;;  %3394 = vmatpush1.bf16.msra.mxu1 %v6395_v49 }
 0x40a   :  { %v2208_v7 = vpop.f32.mrb[134].mxu1  ;;  %v2598_v9 = vsel %vm209_vm2, %v2594_v55, %v2597_v6  ;;  %3395 = vmatprep.subr.bf16.mxu1 %v6396_v53 }
 0x40b   :  { %v2326_v8 = vpop.f32.mrb[136].mxu0  ;;  %v2322_v21 = vadd.f32 %v2321_v44, %v2208_v7  ;;  %v2210_v27 = vpop.f32.mrb[135].mxu1  ;;  %2809 = vmatprep.mubr.bf16.mxu1 %v2598_v9  ;;  %v2571_v12 = vsel %vm192_vm0, 0, %v2561_v62  ;;  %v2646_v2 = vrot.slane %v2561_v62, 1  ;;  %v2605_v11 = vshll.u32 %v2561_v62, 16 }
 0x40c   :  { %v2328_v4 = vpop.f32.mrb[137].mxu0  ;;  %5950 = vmatmul.mubr.msk.bf16.gmra.mrb[164].mxu1 %vm6865_vm3, %v2560_v52  ;;  %v2645_v15 = vrot.slane %v2571_v12, 1  ;;  %v2601_v19 = vshll.u32 %v2571_v12, 16  ;;  %v2383_v22 = vadd.f32 %v7562_v40, %v2319_v0  ;;  %v2599_v30 = vshrl.u32 %v2571_v12, 16 }
 0x40d   :  { %v2329_v14 = vpop.f32.mrb[138].mxu0  ;;  %v2384_v24 = vadd.f32 %v7562_v40, %v2322_v21  ;;  %3396 = vmatpush1.bf16.msra.mxu1 %v6397_v56  ;;  %v2607_v10 = vrot.slane %v2605_v11, 1 }
 0x40e   :  { %v2331_v28 = vpop.f32.mrb[139].mxu0  ;;  %v2647_v58 = vsel %vm270_vm1, %v2645_v15, %v2646_v2  ;;  %v2603_v46 = vrot.slane %v2601_v19, 1  ;;  %3397 = vmatprep.subr.bf16.mxu1 %v6652_v1 }
 0x40f   :  { %v2552_v5 = vpack.c.bf16 %v2384_v24, %v2383_v22  ;;  %2931 = vmatmul.mubr.bf16.gmra.mrb[168].mxu0 %v2647_v58 }
 0x410   :  { %v2213_v17 = vpop.f32.mrb[136].mxu1  ;;  %v2604_v52 = vor.u32 %v2603_v46, %v2599_v30  ;;  %2938 = vmatprep.mubr.bf16.mxu0 %v6652_v1 }
 0x411   :  { %v2562_v29 = vrot.slane %v2552_v5, 7  ;;  %v2327_v20 = vadd.f32 %v2326_v8, %v2213_v17  ;;  %v2215_v31 = vpop.f32.mrb[137].mxu1  ;;  %3398 = vmatpush1.bf16.msra.mxu1 %v6652_v1  ;;  %v7630_v8 = vld [vmem:[%s8461_s4 + $0x3] ss:$0 sm:$0xff] }
 0x412   :  { %v2216_v13 = vpop.f32.mrb[138].mxu1  ;;  %v2608_v37 = vsel %vm209_vm2, %v2604_v52, %v2607_v10  ;;  %3399 = vmatprep.subr.bf16.mxu1 %v6652_v1 }
 0x413   :  { %v2334_v25 = vpop.f32.mrb[140].mxu0  ;;  %v2330_v38 = vadd.f32 %v2329_v14, %v2216_v13  ;;  %v2218_v63 = vpop.f32.mrb[139].mxu1  ;;  %2817 = vmatprep.mubr.bf16.mxu1 %v2608_v37  ;;  %v2574_v44 = vsel %vm192_vm0, 0, %v2562_v29  ;;  %v2649_v45 = vrot.slane %v2562_v29, 1  ;;  %v2615_v32 = vshll.u32 %v2562_v29, 16 }
 0x414   :  { %v2335_v39 = vpop.f32.mrb[141].mxu0  ;;  %5952 = vmatmul.mubr.msk.bf16.gmra.mrb[168].mxu1 %vm6865_vm3, %v2561_v62  ;;  %v2648_v23 = vrot.slane %v2574_v44, 1  ;;  %v2611_v35 = vshll.u32 %v2574_v44, 16  ;;  %v2385_v41 = vadd.f32 %v7562_v40, %v2327_v20  ;;  %v2609_v50 = vshrl.u32 %v2574_v44, 16 }
 0x415   :  { %v2337_v47 = vpop.f32.mrb[142].mxu0  ;;  %v2386_v49 = vadd.f32 %v7562_v40, %v2330_v38  ;;  %3400 = vmatpush1.bf16.msra.mxu1 %v6652_v1  ;;  %v2617_v6 = vrot.slane %v2615_v32, 1 }
 0x416   :  { %v2338_v34 = vpop.f32.mrb[143].mxu0  ;;  %v2650_v51 = vsel %vm270_vm1, %v2648_v23, %v2649_v45  ;;  %v2613_v53 = vrot.slane %v2611_v35, 1  ;;  %3401 = vmatprep.subr.bf16.mxu1 %v6652_v1 }
 0x417   :  { %v2553_v42 = vpack.c.bf16 %v2386_v49, %v2385_v41  ;;  %2939 = vmatmul.mubr.bf16.gmra.mrb[172].mxu0 %v2650_v51 }
 0x418   :  { %v2221_v54 = vpop.f32.mrb[140].mxu1  ;;  %v2614_v55 = vor.u32 %v2613_v53, %v2609_v50  ;;  %2946 = vmatprep.mubr.bf16.mxu0 %v6652_v1 }
 0x419   :  { %v2563_v62 = vrot.slane %v2553_v42, 7  ;;  %v2222_v0 = vpop.f32.mrb[141].mxu1  ;;  %3402 = vmatpush1.bf16.msra.mxu1 %v6652_v1 }
 0x41a   :  { %v2336_v40 = vadd.f32 %v2335_v39, %v2222_v0  ;;  %v2224_v3 = vpop.f32.mrb[142].mxu1  ;;  %v2618_v7 = vsel %vm209_vm2, %v2614_v55, %v2617_v6  ;;  %3403 = vmatprep.subr.bf16.mxu1 %v6652_v1 }
 0x41b   :  { %v2342_v56 = vpop.f32.mrb[144].mxu0  ;;  %v2225_v9 = vpop.f32.mrb[143].mxu1  ;;  %2825 = vmatprep.mubr.bf16.mxu1 %v2618_v7  ;;  %v2577_v27 = vsel %vm192_vm0, 0, %v2563_v62  ;;  %v2652_v4 = vrot.slane %v2563_v62, 1  ;;  %v2625_v11 = vshll.u32 %v2563_v62, 16 }
 0x41c   :  { %v2343_v21 = vpop.f32.mrb[145].mxu0  ;;  %v2339_v12 = vadd.f32 %v2338_v34, %v2225_v9  ;;  %5954 = vmatmul.mubr.msk.bf16.gmra.mrb[172].mxu1 %vm6865_vm3, %v2562_v29  ;;  %v2651_v14 = vrot.slane %v2577_v27, 1  ;;  %v2621_v19 = vshll.u32 %v2577_v27, 16  ;;  %v2391_v22 = vadd.f32 %v7630_v8, %v2336_v40 }
 0x41d   :  { %v2345_v2 = vpop.f32.mrb[146].mxu0  ;;  %3404 = vmatpush1.bf16.msra.mxu1 %v6652_v1  ;;  %v2619_v58 = vshrl.u32 %v2577_v27, 16  ;;  %v2627_v10 = vrot.slane %v2625_v11, 1 }
 0x41e   :  { %v2346_v15 = vpop.f32.mrb[147].mxu0  ;;  %v2392_v24 = vadd.f32 %v7630_v8, %v2339_v12  ;;  %v2653_v28 = vsel %vm270_vm1, %v2651_v14, %v2652_v4  ;;  %3405 = vmatprep.subr.bf16.mxu1 %v6652_v1  ;;  %v2623_v30 = vrot.slane %v2621_v19, 1 }
 0x41f   :  { %2947 = vmatmul.mubr.bf16.gmra.mrb[176].mxu0 %v2653_v28 }
 0x420   :  { %v2659_v46 = vpack.c.bf16 %v2392_v24, %v2391_v22  ;;  %v2229_v5 = vpop.f32.mrb[144].mxu1  ;;  %2954 = vmatprep.mubr.bf16.mxu0 %v6652_v1  ;;  %v2624_v52 = vor.u32 %v2623_v30, %v2619_v58 }
 0x421   :  { %v2230_v17 = vpop.f32.mrb[145].mxu1  ;;  %3406 = vmatpush1.bf16.msra.mxu1 %v6652_v1 }
 0x422   :  { %v2669_v29 = vrot.slane %v2659_v46, 7  ;;  %v2344_v20 = vadd.f32 %v2343_v21, %v2230_v17  ;;  %v2232_v31 = vpop.f32.mrb[146].mxu1  ;;  %v2628_v37 = vsel %vm209_vm2, %v2624_v52, %v2627_v10 }
 0x423   :  { %v2350_v13 = vpop.f32.mrb[148].mxu0  ;;  %v2233_v25 = vpop.f32.mrb[147].mxu1  ;;  %2833 = vmatprep.mubr.bf16.mxu1 %v2628_v37 }
 0x424   :  { %v2351_v38 = vpop.f32.mrb[149].mxu0  ;;  %v2347_v63 = vadd.f32 %v2346_v15, %v2233_v25  ;;  %v2675_v44 = vsel %vm192_vm0, 0, %v2669_v29  ;;  %v2750_v45 = vrot.slane %v2669_v29, 1  ;;  %5956 = vmatmul.mubr.msk.bf16.gmra.mrb[176].mxu1 %vm6865_vm3, %v2563_v62  ;;  %v2695_v32 = vshll.u32 %v2669_v29, 16 }
 0x425   :  { %v2353_v39 = vpop.f32.mrb[150].mxu0  ;;  %v2749_v23 = vrot.slane %v2675_v44, 1  ;;  %v2691_v35 = vshll.u32 %v2675_v44, 16  ;;  %v2393_v41 = vadd.f32 %v7630_v8, %v2344_v20  ;;  %v2689_v51 = vshrl.u32 %v2675_v44, 16 }
 0x426   :  { %v2354_v47 = vpop.f32.mrb[151].mxu0  ;;  %v2394_v49 = vadd.f32 %v7630_v8, %v2347_v63  ;;  %v2697_v6 = vrot.slane %v2695_v32, 1 }
 0x427   :  { %v2751_v34 = vsel %vm270_vm1, %v2749_v23, %v2750_v45  ;;  %v2693_v50 = vrot.slane %v2691_v35, 1 }
 0x428   :  { %v2660_v53 = vpack.c.bf16 %v2394_v49, %v2393_v41  ;;  %v2237_v42 = vpop.f32.mrb[148].mxu1  ;;  %2955 = vmatmul.mubr.bf16.gmra.mrb[180].mxu0 %v2751_v34 }
 0x429   :  { %v2238_v54 = vpop.f32.mrb[149].mxu1  ;;  %v2694_v55 = vor.u32 %v2693_v50, %v2689_v51  ;;  %2962 = vmatprep.mubr.bf16.mxu0 %v6652_v1 }
 0x42a   :  { %v2670_v62 = vrot.slane %v2660_v53, 7  ;;  %v2352_v0 = vadd.f32 %v2351_v38, %v2238_v54  ;;  %v2240_v40 = vpop.f32.mrb[150].mxu1 }
 0x42b   :  { %v2358_v3 = vpop.f32.mrb[152].mxu0  ;;  %v2241_v56 = vpop.f32.mrb[151].mxu1  ;;  %v2698_v9 = vsel %vm209_vm2, %v2694_v55, %v2697_v6 }
 0x42c   :  { %v2359_v7 = vpop.f32.mrb[153].mxu0  ;;  %v2355_v21 = vadd.f32 %v2354_v47, %v2241_v56  ;;  %2841 = vmatprep.mubr.bf16.mxu1 %v2698_v9  ;;  %v2678_v4 = vsel %vm192_vm0, 0, %v2670_v62  ;;  %v2753_v12 = vrot.slane %v2670_v62, 1  ;;  %v2705_v19 = vshll.u32 %v2670_v62, 16 }
 0x42d   :  { %v2361_v27 = vpop.f32.mrb[154].mxu0  ;;  %5958 = vmatmul.mubr.msk.bf16.gmra.mrb[180].mxu1 %vm6865_vm3, %v2669_v29  ;;  %v2752_v14 = vrot.slane %v2678_v4, 1  ;;  %v2701_v15 = vshll.u32 %v2678_v4, 16  ;;  %v2395_v11 = vadd.f32 %v7630_v8, %v2352_v0  ;;  %v2699_v28 = vshrl.u32 %v2678_v4, 16 }
 0x42e   :  { %v2362_v2 = vpop.f32.mrb[155].mxu0  ;;  %v2396_v22 = vadd.f32 %v7630_v8, %v2355_v21  ;;  %v2707_v52 = vrot.slane %v2705_v19, 1 }
 0x42f   :  { %v2754_v24 = vsel %vm270_vm1, %v2752_v14, %v2753_v12  ;;  %v2703_v58 = vrot.slane %v2701_v15, 1 }
 0x430   :  { %v2661_v30 = vpack.c.bf16 %v2396_v22, %v2395_v11  ;;  %v2245_v46 = vpop.f32.mrb[152].mxu1  ;;  %2963 = vmatmul.mubr.bf16.gmra.mrb[184].mxu0 %v2754_v24 }
 0x431   :  { %v2246_v5 = vpop.f32.mrb[153].mxu1  ;;  %v2704_v17 = vor.u32 %v2703_v58, %v2699_v28  ;;  %2970 = vmatprep.mubr.bf16.mxu0 %v6652_v1 }
 0x432   :  { %v2671_v10 = vrot.slane %v2661_v30, 7  ;;  %v2360_v29 = vadd.f32 %v2359_v7, %v2246_v5  ;;  %v2248_v20 = vpop.f32.mrb[154].mxu1 }
 0x433   :  { %v2366_v31 = vpop.f32.mrb[156].mxu0  ;;  %v2249_v13 = vpop.f32.mrb[155].mxu1  ;;  %v2708_v37 = vsel %vm209_vm2, %v2704_v17, %v2707_v52 }
 0x434   :  { %v2367_v25 = vpop.f32.mrb[157].mxu0  ;;  %v2363_v38 = vadd.f32 %v2362_v2, %v2249_v13  ;;  %2849 = vmatprep.mubr.bf16.mxu1 %v2708_v37  ;;  %v2681_v39 = vsel %vm192_vm0, 0, %v2671_v10  ;;  %v2756_v44 = vrot.slane %v2671_v10, 1  ;;  %v2715_v35 = vshll.u32 %v2671_v10, 16  ;;  %v6401_v37 = vld [vmem:[%s8458_s1 + $0x1a8] sm:$0xff]  }
 0x435   :  { %v2369_v63 = vpop.f32.mrb[158].mxu0  ;;  %5960 = vmatmul.mubr.msk.bf16.gmra.mrb[184].mxu1 %vm6865_vm3, %v2670_v62  ;;  %v2755_v47 = vrot.slane %v2681_v39, 1  ;;  %v2711_v23 = vshll.u32 %v2681_v39, 16  ;;  %v2397_v32 = vadd.f32 %v7630_v8, %v2360_v29  ;;  %v2709_v34 = vshrl.u32 %v2681_v39, 16  ;;  %v6404_v39 = vld [vmem:[%s8457_s3 + $0x188] sm:$0xff]  }
 0x436   :  { %v2370_v45 = vpop.f32.mrb[159].mxu0  ;;  %v2398_v41 = vadd.f32 %v7630_v8, %v2363_v38  ;;  %v2717_v55 = vrot.slane %v2715_v35, 1  ;;  %v6402_v38 = vld [vmem:[%s8457_s3 + $0x180] sm:$0xff]  }
 0x437   :  { %v2757_v49 = vsel %vm270_vm1, %v2755_v47, %v2756_v44  ;;  %v2713_v51 = vrot.slane %v2711_v23, 1  ;;  %v6403_v63 = vld [vmem:[%s8458_s1 + $0x180] sm:$0xff]   ;;  %3407 = vmatprep.subr.bf16.mxu1 %v6402_v38  ;;  %v6405_v44 = vld [vmem:[%s8458_s1 + $0x188] sm:$0xff]   ;;  %v6407_v47 = vld [vmem:[%s8458_s1 + $0x190] sm:$0xff]  }
 0x438   :  { %v2662_v50 = vpack.c.bf16 %v2398_v41, %v2397_v32  ;;  %v2253_v53 = vpop.f32.mrb[156].mxu1  ;;  %2971 = vmatmul.mubr.bf16.gmra.mrb[188].mxu0 %v2757_v49  ;;  %3408 = vmatpush1.bf16.msra.mxu1 %v6403_v63 }
 0x439   :  { %v2254_v42 = vpop.f32.mrb[157].mxu1  ;;  %v2714_v54 = vor.u32 %v2713_v51, %v2709_v34  ;;  %2978 = vmatprep.mubr.bf16.mxu0 %v6652_v1  ;;  %3409 = vmatprep.subr.bf16.mxu1 %v6404_v39 }
 0x43a   :  { %v2672_v6 = vrot.slane %v2662_v50, 7  ;;  %v2368_v62 = vadd.f32 %v2367_v25, %v2254_v42  ;;  %v2256_v0 = vpop.f32.mrb[158].mxu1  ;;  %v6400_v25 = vld [vmem:[%s8457_s3 + $0x1a8] sm:$0xff]   ;;  %v7710_v50 = vld [vmem:[%s8460_s2 + $0x4] ss:$0 sm:$0xff] }
 0x43b   :  { %v2257_v40 = vpop.f32.mrb[159].mxu1  ;;  %v2718_v3 = vsel %vm209_vm2, %v2714_v54, %v2717_v55  ;;  %3508 = vmatprep.subr.bf16.mxu0 %v6400_v25 }
 0x43c   :  { %v2371_v56 = vadd.f32 %v2370_v45, %v2257_v40  ;;  %2857 = vmatprep.mubr.bf16.mxu1 %v2718_v3  ;;  %v2684_v7 = vsel %vm192_vm0, 0, %v2672_v6  ;;  %v2759_v9 = vrot.slane %v2672_v6, 1  ;;  %v2725_v4 = vshll.u32 %v2672_v6, 16  ;;  %3509 = vmatpush1.bf16.msra.mxu0 %v6401_v37  ;;  %v6406_v45 = vld [vmem:[%s8457_s3 + $0x190] sm:$0xff]  }
 0x43d   :  { %5962 = vmatmul.mubr.msk.bf16.gmra.mrb[188].mxu1 %vm6865_vm3, %v2671_v10  ;;  %v2758_v21 = vrot.slane %v2684_v7, 1  ;;  %v2721_v27 = vshll.u32 %v2684_v7, 16  ;;  %v2399_v12 = vadd.f32 %v7630_v8, %v2368_v62  ;;  %v2719_v15 = vshrl.u32 %v2684_v7, 16 }
 0x43e   :  { %v2400_v2 = vadd.f32 %v7630_v8, %v2371_v56  ;;  %v2727_v24 = vrot.slane %v2725_v4, 1  ;;  %3410 = vmatpush1.bf16.msra.mxu1 %v6405_v44 }
 0x43f   :  { %v2760_v14 = vsel %vm270_vm1, %v2758_v21, %v2759_v9  ;;  %v2723_v19 = vrot.slane %v2721_v27, 1  ;;  %3411 = vmatprep.subr.bf16.mxu1 %v6406_v45 }
 0x440   :  { %v2663_v11 = vpack.c.bf16 %v2400_v2, %v2399_v12  ;;  %2979 = vmatmul.mubr.bf16.gmra.mrb[192].mxu0 %v2760_v14 }
 0x441   :  { %v2724_v22 = vor.u32 %v2723_v19, %v2719_v15  ;;  %2986 = vmatprep.mubr.bf16.mxu0 %v6652_v1 }
 0x442   :  { %v2673_v28 = vrot.slane %v2663_v11, 7  ;;  %3412 = vmatpush1.bf16.msra.mxu1 %v6407_v47 }
 0x443   :  { %v2728_v58 = vsel %vm209_vm2, %v2724_v22, %v2727_v24 }
 0x444   :  { %2865 = vmatprep.mubr.bf16.mxu1 %v2728_v58  ;;  %v2687_v30 = vsel %vm192_vm0, 0, %v2673_v28  ;;  %v2762_v46 = vrot.slane %v2673_v28, 1  ;;  %v2735_v17 = vshll.u32 %v2673_v28, 16 }
 0x445   :  { %5964 = vmatmul.mubr.msk.bf16.gmra.mrb[192].mxu1 %vm6865_vm3, %v2672_v6  ;;  %v2761_v8 = vrot.slane %v2687_v30, 1  ;;  %v2731_v5 = vshll.u32 %v2687_v30, 16  ;;  %v2729_v10 = vshrl.u32 %v2687_v30, 16 }
 0x446   :  { %v2737_v31 = vrot.slane %v2735_v17, 1 }
 0x447   :  { %v2763_v52 = vsel %vm270_vm1, %v2761_v8, %v2762_v46  ;;  %v2733_v29 = vrot.slane %v2731_v5, 1 }
 0x448   :  { %2987 = vmatmul.mubr.bf16.gmra.mrb[196].mxu0 %v2763_v52 }
 0x449   :  { %v2734_v20 = vor.u32 %v2733_v29, %v2729_v10  ;;  %3536 = vmatprep.mubr.bf16.mxu0 %v6652_v1 }
 0x44b   :  { %v2738_v13 = vsel %vm209_vm2, %v2734_v20, %v2737_v31 }
 0x44c   :  { %2873 = vmatprep.mubr.bf16.mxu1 %v2738_v13 }
 0x44d   :  { %5966 = vmatmul.mubr.msk.bf16.gmra.mrb[196].mxu1 %vm6865_vm3, %v2673_v28 }
 0x4d2   :  { %v2916_v23 = vpop.f32.mrb[160].mxu0 }
 0x4d3   :  { %v2918_v35 = vpop.f32.mrb[161].mxu0 }
 0x4d4   :  { %v2919_v32 = vpop.f32.mrb[162].mxu0 }
 0x4d5   :  { %v2921_v41 = vpop.f32.mrb[163].mxu0 }
 0x4d7   :  { %v2803_v49 = vpop.f32.mrb[160].mxu1 }
 0x4d8   :  { %v2917_v34 = vadd.f32 %v2916_v23, %v2803_v49  ;;  %v2805_v51 = vpop.f32.mrb[161].mxu1 }
 0x4d9   :  { %v2806_v53 = vpop.f32.mrb[162].mxu1 }
 0x4da   :  { %v2920_v42 = vadd.f32 %v2919_v32, %v2806_v53  ;;  %v2808_v54 = vpop.f32.mrb[163].mxu1  ;;  %v2924_v55 = vpop.f32.mrb[164].mxu0  ;;  %v2999_v62 = vadd.f32 %v7710_v50, %v2917_v34 }
 0x4db   :  { %v2926_v6 = vpop.f32.mrb[165].mxu0 }
 0x4dc   :  { %v3000_v0 = vadd.f32 %v7710_v50, %v2920_v42  ;;  %v2927_v40 = vpop.f32.mrb[166].mxu0 }
 0x4dd   :  { %v2929_v3 = vpop.f32.mrb[167].mxu0 }
 0x4de   :  { %v3171_v56 = vpack.c.bf16 %v3000_v0, %v2999_v62 }
 0x4df   :  { %v2811_v7 = vpop.f32.mrb[164].mxu1 }
 0x4e0   :  { %v3181_v9 = vrot.slane %v3171_v56, 7  ;;  %v2925_v21 = vadd.f32 %v2924_v55, %v2811_v7  ;;  %v2813_v27 = vpop.f32.mrb[165].mxu1 }
 0x4e1   :  { %v2814_v4 = vpop.f32.mrb[166].mxu1 }
 0x4e2   :  { %v2928_v12 = vadd.f32 %v2927_v40, %v2814_v4  ;;  %v2816_v2 = vpop.f32.mrb[167].mxu1  ;;  %v2932_v14 = vpop.f32.mrb[168].mxu0  ;;  %v3187_v15 = vsel %vm192_vm0, 0, %v3181_v9  ;;  %v3262_v19 = vrot.slane %v3181_v9, 1  ;;  %v3207_v28 = vshll.u32 %v3181_v9, 16 }
 0x4e3   :  { %v2934_v11 = vpop.f32.mrb[169].mxu0  ;;  %v3261_v22 = vrot.slane %v3187_v15, 1  ;;  %v3203_v24 = vshll.u32 %v3187_v15, 16  ;;  %v3001_v58 = vadd.f32 %v7710_v50, %v2925_v21  ;;  %v3201_v17 = vshrl.u32 %v3187_v15, 16 }
 0x4e4   :  { %v3002_v30 = vadd.f32 %v7710_v50, %v2928_v12  ;;  %v2935_v46 = vpop.f32.mrb[170].mxu0  ;;  %v3209_v31 = vrot.slane %v3207_v28, 1 }
 0x4e5   :  { %v2937_v8 = vpop.f32.mrb[171].mxu0  ;;  %v3263_v5 = vsel %vm270_vm1, %v3261_v22, %v3262_v19  ;;  %v3205_v52 = vrot.slane %v3203_v24, 1 }
 0x4e6   :  { %v3172_v10 = vpack.c.bf16 %v3002_v30, %v3001_v58  ;;  %3537 = vmatmul.mubr.bf16.vlgmr.msra.gmra.mrb[200].mxu0 %v3263_v5 }
 0x4e7   :  { %v2819_v29 = vpop.f32.mrb[168].mxu1  ;;  %v3206_v20 = vor.u32 %v3205_v52, %v3201_v17  ;;  %3544 = vmatprep.mubr.bf16.mxu0 %v6652_v1 }
 0x4e8   :  { %v3182_v13 = vrot.slane %v3172_v10, 7  ;;  %v2933_v25 = vadd.f32 %v2932_v14, %v2819_v29  ;;  %v2821_v37 = vpop.f32.mrb[169].mxu1 }
 0x4e9   :  { %v2822_v38 = vpop.f32.mrb[170].mxu1  ;;  %v3210_v63 = vsel %vm209_vm2, %v3206_v20, %v3209_v31 }
 0x4ea   :  { %v2936_v39 = vadd.f32 %v2935_v46, %v2822_v38  ;;  %v2824_v44 = vpop.f32.mrb[171].mxu1  ;;  %v2940_v45 = vpop.f32.mrb[172].mxu0  ;;  %3423 = vmatprep.mubr.bf16.mxu1 %v3210_v63  ;;  %v3190_v47 = vsel %vm192_vm0, 0, %v3182_v13  ;;  %v3265_v23 = vrot.slane %v3182_v13, 1  ;;  %v3217_v49 = vshll.u32 %v3182_v13, 16 }
 0x4eb   :  { %v2942_v35 = vpop.f32.mrb[173].mxu0  ;;  %6024 = vmatmul.mubr.msk.bf16.vlgmr.msra.gmra.mrb[200].mxu1 %vm6865_vm3, %v3181_v9  ;;  %v3264_v32 = vrot.slane %v3190_v47, 1  ;;  %v3213_v41 = vshll.u32 %v3190_v47, 16  ;;  %v3003_v34 = vadd.f32 %v7710_v50, %v2933_v25  ;;  %v3211_v55 = vshrl.u32 %v3190_v47, 16 }
 0x4ec   :  { %v3004_v51 = vadd.f32 %v7710_v50, %v2936_v39  ;;  %v2943_v53 = vpop.f32.mrb[174].mxu0  ;;  %v3219_v3 = vrot.slane %v3217_v49, 1 }
 0x4ed   :  { %v2945_v42 = vpop.f32.mrb[175].mxu0  ;;  %v3266_v54 = vsel %vm270_vm1, %v3264_v32, %v3265_v23  ;;  %v3215_v6 = vrot.slane %v3213_v41, 1 }
 0x4ee   :  { %v3173_v62 = vpack.c.bf16 %v3004_v51, %v3003_v34  ;;  %3545 = vmatmul.mubr.bf16.gmra.mrb[204].mxu0 %v3266_v54 }
 0x4ef   :  { %v2827_v0 = vpop.f32.mrb[172].mxu1  ;;  %v3216_v40 = vor.u32 %v3215_v6, %v3211_v55  ;;  %3552 = vmatprep.mubr.bf16.mxu0 %v6652_v1 }
 0x4f0   :  { %v3183_v56 = vrot.slane %v3173_v62, 7  ;;  %v2941_v7 = vadd.f32 %v2940_v45, %v2827_v0  ;;  %v2829_v9 = vpop.f32.mrb[173].mxu1 }
 0x4f1   :  { %v2830_v21 = vpop.f32.mrb[174].mxu1  ;;  %v3220_v27 = vsel %vm209_vm2, %v3216_v40, %v3219_v3 }
 0x4f2   :  { %v2944_v4 = vadd.f32 %v2943_v53, %v2830_v21  ;;  %v2832_v12 = vpop.f32.mrb[175].mxu1  ;;  %v2948_v2 = vpop.f32.mrb[176].mxu0  ;;  %3431 = vmatprep.mubr.bf16.mxu1 %v3220_v27  ;;  %v3193_v14 = vsel %vm192_vm0, 0, %v3183_v56  ;;  %v3268_v15 = vrot.slane %v3183_v56, 1  ;;  %v3227_v24 = vshll.u32 %v3183_v56, 16 }
 0x4f3   :  { %v2950_v19 = vpop.f32.mrb[177].mxu0  ;;  %6026 = vmatmul.mubr.msk.bf16.gmra.mrb[204].mxu1 %vm6865_vm3, %v3182_v13  ;;  %v3267_v11 = vrot.slane %v3193_v14, 1  ;;  %v3223_v22 = vshll.u32 %v3193_v14, 16  ;;  %v3005_v28 = vadd.f32 %v7710_v50, %v2941_v7  ;;  %v3221_v5 = vshrl.u32 %v3193_v14, 16 }
 0x4f4   :  { %v3006_v58 = vadd.f32 %v7710_v50, %v2944_v4  ;;  %v2951_v30 = vpop.f32.mrb[178].mxu0  ;;  %v3229_v29 = vrot.slane %v3227_v24, 1 }
 0x4f5   :  { %v2953_v46 = vpop.f32.mrb[179].mxu0  ;;  %v3269_v8 = vsel %vm270_vm1, %v3267_v11, %v3268_v15  ;;  %v3225_v17 = vrot.slane %v3223_v22, 1 }
 0x4f6   :  { %v3174_v52 = vpack.c.bf16 %v3006_v58, %v3005_v28  ;;  %3553 = vmatmul.mubr.bf16.gmra.mrb[208].mxu0 %v3269_v8 }
 0x4f7   :  { %v3226_v10 = vor.u32 %v3225_v17, %v3221_v5  ;;  %3560 = vmatprep.mubr.bf16.mxu0 %v6652_v1  ;;  %v2835_v31 = vpop.f32.mrb[176].mxu1 }
 0x4f8   :  { %v3184_v20 = vrot.slane %v3174_v52, 7  ;;  %v2949_v13 = vadd.f32 %v2948_v2, %v2835_v31  ;;  %v2837_v25 = vpop.f32.mrb[177].mxu1 }
 0x4f9   :  { %v3230_v37 = vsel %vm209_vm2, %v3226_v10, %v3229_v29  ;;  %v2838_v38 = vpop.f32.mrb[178].mxu1 }
 0x4fa   :  { %3439 = vmatprep.mubr.bf16.mxu1 %v3230_v37  ;;  %v3196_v63 = vsel %vm192_vm0, 0, %v3184_v20  ;;  %v3271_v39 = vrot.slane %v3184_v20, 1  ;;  %v2952_v44 = vadd.f32 %v2951_v30, %v2838_v38  ;;  %v2840_v45 = vpop.f32.mrb[179].mxu1  ;;  %v3237_v41 = vshll.u32 %v3184_v20, 16 }
 0x4fb   :  { %v2956_v47 = vpop.f32.mrb[180].mxu0  ;;  %6028 = vmatmul.mubr.msk.bf16.gmra.mrb[208].mxu1 %vm6865_vm3, %v3183_v56  ;;  %v3270_v23 = vrot.slane %v3196_v63, 1  ;;  %v3233_v32 = vshll.u32 %v3196_v63, 16  ;;  %v3007_v49 = vadd.f32 %v7710_v50, %v2949_v13  ;;  %v3231_v54 = vshrl.u32 %v3196_v63, 16 }
 0x4fc   :  { %v2957_v35 = vpop.f32.mrb[181].mxu0  ;;  %v3008_v34 = vadd.f32 %v7710_v50, %v2952_v44  ;;  %v3239_v40 = vrot.slane %v3237_v41, 1  ;;  %v7747_v50 = vld [vmem:[%s8461_s4 + $0x4] ss:$0 sm:$0xff] }
 0x4fd   :  { %v2959_v51 = vpop.f32.mrb[182].mxu0  ;;  %v3272_v53 = vsel %vm270_vm1, %v3270_v23, %v3271_v39  ;;  %v3235_v55 = vrot.slane %v3233_v32, 1 }
 0x4fe   :  { %v2960_v42 = vpop.f32.mrb[183].mxu0  ;;  %3561 = vmatmul.mubr.bf16.gmra.mrb[212].mxu0 %v3272_v53  ;;  %v3175_v6 = vpack.c.bf16 %v3008_v34, %v3007_v49 }
 0x4ff   :  { %3568 = vmatprep.mubr.bf16.mxu0 %v6652_v1  ;;  %v3236_v0 = vor.u32 %v3235_v55, %v3231_v54 }
 0x500   :  { %v2843_v62 = vpop.f32.mrb[180].mxu1  ;;  %v3185_v3 = vrot.slane %v3175_v6, 7 }
 0x501   :  { %v2844_v56 = vpop.f32.mrb[181].mxu1  ;;  %v3240_v21 = vsel %vm209_vm2, %v3236_v0, %v3239_v40 }
 0x502   :  { %v2958_v7 = vadd.f32 %v2957_v35, %v2844_v56  ;;  %v2846_v9 = vpop.f32.mrb[182].mxu1  ;;  %3447 = vmatprep.mubr.bf16.mxu1 %v3240_v21  ;;  %v3199_v12 = vsel %vm192_vm0, 0, %v3185_v3  ;;  %v3274_v2 = vrot.slane %v3185_v3, 1  ;;  %v3247_v24 = vshll.u32 %v3185_v3, 16 }
 0x503   :  { %v2847_v27 = vpop.f32.mrb[183].mxu1  ;;  %v2964_v4 = vpop.f32.mrb[184].mxu0  ;;  %6030 = vmatmul.mubr.msk.bf16.gmra.mrb[212].mxu1 %vm6865_vm3, %v3184_v20  ;;  %v3273_v19 = vrot.slane %v3199_v12, 1  ;;  %v3243_v22 = vshll.u32 %v3199_v12, 16  ;;  %v3241_v8 = vshrl.u32 %v3199_v12, 16 }
 0x504   :  { %v2961_v14 = vadd.f32 %v2960_v42, %v2847_v27  ;;  %v2965_v15 = vpop.f32.mrb[185].mxu0  ;;  %v3013_v28 = vadd.f32 %v7747_v50, %v2958_v7  ;;  %v3249_v20 = vrot.slane %v3247_v24, 1 }
 0x505   :  { %v2967_v11 = vpop.f32.mrb[186].mxu0  ;;  %v3275_v46 = vsel %vm270_vm1, %v3273_v19, %v3274_v2  ;;  %v3245_v5 = vrot.slane %v3243_v22, 1 }
 0x506   :  { %v3014_v58 = vadd.f32 %v7747_v50, %v2961_v14  ;;  %v2968_v30 = vpop.f32.mrb[187].mxu0  ;;  %3569 = vmatmul.mubr.bf16.gmra.mrb[216].mxu0 %v3275_v46 }
 0x507   :  { %3576 = vmatprep.mubr.bf16.mxu0 %v6652_v1  ;;  %v3246_v29 = vor.u32 %v3245_v5, %v3241_v8 }
 0x508   :  { %v3281_v17 = vpack.c.bf16 %v3014_v58, %v3013_v28  ;;  %v2851_v52 = vpop.f32.mrb[184].mxu1 }
 0x509   :  { %v2852_v10 = vpop.f32.mrb[185].mxu1  ;;  %v3250_v37 = vsel %vm209_vm2, %v3246_v29, %v3249_v20 }
 0x50a   :  { %v3291_v31 = vrot.slane %v3281_v17, 7  ;;  %v2966_v13 = vadd.f32 %v2965_v15, %v2852_v10  ;;  %v2854_v25 = vpop.f32.mrb[186].mxu1  ;;  %3455 = vmatprep.mubr.bf16.mxu1 %v3250_v37 }
 0x50b   :  { %v2855_v38 = vpop.f32.mrb[187].mxu1  ;;  %v2972_v63 = vpop.f32.mrb[188].mxu0  ;;  %6032 = vmatmul.mubr.msk.bf16.gmra.mrb[216].mxu1 %vm6865_vm3, %v3185_v3 }
 0x50c   :  { %v2969_v39 = vadd.f32 %v2968_v30, %v2855_v38  ;;  %v2973_v44 = vpop.f32.mrb[189].mxu0  ;;  %v3297_v45 = vsel %vm192_vm0, 0, %v3291_v31  ;;  %v3372_v47 = vrot.slane %v3291_v31, 1  ;;  %v3317_v41 = vshll.u32 %v3291_v31, 16 }
 0x50d   :  { %v2975_v23 = vpop.f32.mrb[190].mxu0  ;;  %v3371_v35 = vrot.slane %v3297_v45, 1  ;;  %v3313_v32 = vshll.u32 %v3297_v45, 16  ;;  %v3015_v49 = vadd.f32 %v7747_v50, %v2966_v13  ;;  %v3311_v42 = vshrl.u32 %v3297_v45, 16 }
 0x50e   :  { %v3016_v34 = vadd.f32 %v7747_v50, %v2969_v39  ;;  %v2976_v51 = vpop.f32.mrb[191].mxu0  ;;  %v3319_v40 = vrot.slane %v3317_v41, 1 }
 0x50f   :  { %v3373_v53 = vsel %vm270_vm1, %v3371_v35, %v3372_v47  ;;  %v3315_v54 = vrot.slane %v3313_v32, 1 }
 0x510   :  { %v3282_v55 = vpack.c.bf16 %v3016_v34, %v3015_v49  ;;  %v2859_v6 = vpop.f32.mrb[188].mxu1  ;;  %3577 = vmatmul.mubr.bf16.gmra.mrb[220].mxu0 %v3373_v53 }
 0x511   :  { %v2860_v62 = vpop.f32.mrb[189].mxu1  ;;  %v3316_v0 = vor.u32 %v3315_v54, %v3311_v42  ;;  %3584 = vmatprep.mubr.bf16.mxu0 %v6652_v1 }
 0x512   :  { %v3292_v3 = vrot.slane %v3282_v55, 7  ;;  %v2974_v56 = vadd.f32 %v2973_v44, %v2860_v62  ;;  %v2862_v7 = vpop.f32.mrb[190].mxu1 }
 0x513   :  { %v2863_v9 = vpop.f32.mrb[191].mxu1  ;;  %v2980_v21 = vpop.f32.mrb[192].mxu0  ;;  %v3320_v27 = vsel %vm209_vm2, %v3316_v0, %v3319_v40 }
 0x514   :  { %v2977_v4 = vadd.f32 %v2976_v51, %v2863_v9  ;;  %v2981_v12 = vpop.f32.mrb[193].mxu0  ;;  %3463 = vmatprep.mubr.bf16.mxu1 %v3320_v27  ;;  %v3300_v2 = vsel %vm192_vm0, 0, %v3292_v3  ;;  %v3375_v14 = vrot.slane %v3292_v3, 1  ;;  %v3327_v22 = vshll.u32 %v3292_v3, 16 }
 0x515   :  { %v2983_v15 = vpop.f32.mrb[194].mxu0  ;;  %6034 = vmatmul.mubr.msk.bf16.gmra.mrb[220].mxu1 %vm6865_vm3, %v3291_v31  ;;  %v3374_v19 = vrot.slane %v3300_v2, 1  ;;  %v3323_v11 = vshll.u32 %v3300_v2, 16  ;;  %v3017_v24 = vadd.f32 %v7747_v50, %v2974_v56  ;;  %v3321_v46 = vshrl.u32 %v3300_v2, 16 }
 0x516   :  { %v3018_v28 = vadd.f32 %v7747_v50, %v2977_v4  ;;  %v2984_v58 = vpop.f32.mrb[195].mxu0  ;;  %v3329_v29 = vrot.slane %v3327_v22, 1 }
 0x517   :  { %v3376_v30 = vsel %vm270_vm1, %v3374_v19, %v3375_v14  ;;  %v3325_v8 = vrot.slane %v3323_v11, 1 }
 0x518   :  { %v3283_v5 = vpack.c.bf16 %v3018_v28, %v3017_v24  ;;  %v2867_v17 = vpop.f32.mrb[192].mxu1  ;;  %3585 = vmatmul.mubr.bf16.gmra.mrb[224].mxu0 %v3376_v30 }
 0x519   :  { %v2868_v52 = vpop.f32.mrb[193].mxu1  ;;  %v3326_v10 = vor.u32 %v3325_v8, %v3321_v46  ;;  %3592 = vmatprep.mubr.bf16.mxu0 %v6652_v1 }
 0x51a   :  { %v3293_v20 = vrot.slane %v3283_v5, 7  ;;  %v2982_v31 = vadd.f32 %v2981_v12, %v2868_v52  ;;  %v2870_v13 = vpop.f32.mrb[194].mxu1 }
 0x51b   :  { %v2871_v25 = vpop.f32.mrb[195].mxu1  ;;  %v2988_v37 = vpop.f32.mrb[196].mxu0  ;;  %v3330_v38 = vsel %vm209_vm2, %v3326_v10, %v3329_v29 }
 0x51c   :  { %v2985_v63 = vadd.f32 %v2984_v58, %v2871_v25  ;;  %v2989_v39 = vpop.f32.mrb[197].mxu0  ;;  %3471 = vmatprep.mubr.bf16.mxu1 %v3330_v38  ;;  %v3303_v44 = vsel %vm192_vm0, 0, %v3293_v20  ;;  %v3378_v45 = vrot.slane %v3293_v20, 1  ;;  %v3337_v32 = vshll.u32 %v3293_v20, 16  ;;  %v6408_v38 = vld [vmem:[%s8457_s3 + $0x1b0] sm:$0xff]  }
 0x51d   :  { %v2991_v47 = vpop.f32.mrb[198].mxu0  ;;  %6036 = vmatmul.mubr.msk.bf16.gmra.mrb[224].mxu1 %vm6865_vm3, %v3292_v3  ;;  %v3377_v23 = vrot.slane %v3303_v44, 1  ;;  %v3333_v35 = vshll.u32 %v3303_v44, 16  ;;  %v3019_v41 = vadd.f32 %v7747_v50, %v2982_v31  ;;  %v3331_v53 = vshrl.u32 %v3303_v44, 16  ;;  %v6411_v44 = vld [vmem:[%s8458_s1 + $0x1e0] sm:$0xff]   ;;  %4003 = vmatprep.subr.bf16.mxu1 %v6408_v38 }
 0x51e   :  { %v3020_v49 = vadd.f32 %v7747_v50, %v2985_v63  ;;  %v2992_v34 = vpop.f32.mrb[199].mxu0  ;;  %v3339_v0 = vrot.slane %v3337_v32, 1  ;;  %v6409_v63 = vld [vmem:[%s8457_s3 + $0x1e0] sm:$0xff]   ;;  %v6413_v47 = vld [vmem:[%s8458_s1 + $0x1b8] sm:$0xff]   ;;  %v6416_v32 = vld [vmem:[%s8457_s3 + $0x1e8] sm:$0xff]  }
 0x51f   :  { %v3379_v51 = vsel %vm270_vm1, %v3377_v23, %v3378_v45  ;;  %v3335_v42 = vrot.slane %v3333_v35, 1  ;;  %4116 = vmatprep.subr.bf16.mxu0 %v6409_v63  ;;  %v6412_v45 = vld [vmem:[%s8457_s3 + $0x1b8] sm:$0xff]   ;;  %v6414_v23 = vld [vmem:[%s8457_s3 + $0x1c0] sm:$0xff]  }
 0x520   :  { %v3284_v54 = vpack.c.bf16 %v3020_v49, %v3019_v41  ;;  %v2875_v55 = vpop.f32.mrb[196].mxu1  ;;  %3593 = vmatmul.mubr.bf16.gmra.mrb[228].mxu0 %v3379_v51  ;;  %v6415_v35 = vld [vmem:[%s8458_s1 + $0x1c0] sm:$0xff]   ;;  %v6417_v41 = vld [vmem:[%s8458_s1 + $0x1e8] sm:$0xff]   ;;  %v6418_v51 = vld [vmem:[%s8457_s3 + $0x1f0] sm:$0xff]  }
 0x521   :  { %v2876_v6 = vpop.f32.mrb[197].mxu1  ;;  %v3336_v62 = vor.u32 %v3335_v42, %v3331_v53  ;;  %3600 = vmatprep.mubr.bf16.mxu0 %v6652_v1  ;;  %4117 = vmatpush1.bf16.msra.mxu0 %v6411_v44  ;;  %v6420_v49 = vld [vmem:[%s8457_s3 + $0x1c8] sm:$0xff]   ;;  %v6419_v53 = vld [vmem:[%s8458_s1 + $0x1f0] sm:$0xff]   ;;  %v6424_v55 = vld [vmem:[%s8457_s3 + $0x1d8] sm:$0xff]  }
 0x522   :  { %v3294_v40 = vrot.slane %v3284_v54, 7  ;;  %v2990_v3 = vadd.f32 %v2989_v39, %v2876_v6  ;;  %v2878_v56 = vpop.f32.mrb[198].mxu1  ;;  %v6410_v39 = vld [vmem:[%s8458_s1 + $0x1b0] sm:$0xff]   ;;  %4118 = vmatprep.subr.bf16.mxu0 %v6416_v32  ;;  %v6425_v6 = vld [vmem:[%s8458_s1 + $0x1d8] sm:$0xff]   ;;  %v6427_v44 = vld [vmem:[%s8457_s3 + $0x228] sm:$0xff]  }
 0x523   :  { %v2879_v7 = vpop.f32.mrb[199].mxu1  ;;  %v3340_v9 = vsel %vm209_vm2, %v3336_v62, %v3339_v0  ;;  %4004 = vmatpush1.bf16.msra.mxu1 %v6410_v39  ;;  %v6422_v42 = vld [vmem:[%s8457_s3 + $0x1d0] sm:$0xff]   ;;  %v6426_v39 = vld [vmem:[%s8457_s3 + $0x1f8] sm:$0xff]  }
 0x524   :  { %v2993_v21 = vadd.f32 %v2992_v34, %v2879_v7  ;;  %3479 = vmatprep.mubr.bf16.mxu1 %v3340_v9  ;;  %v3306_v27 = vsel %vm192_vm0, 0, %v3294_v40  ;;  %v3381_v4 = vrot.slane %v3294_v40, 1  ;;  %v3347_v14 = vshll.u32 %v3294_v40, 16  ;;  %4005 = vmatprep.subr.bf16.mxu1 %v6412_v45  ;;  %v6421_v34 = vld [vmem:[%s8458_s1 + $0x1c8] sm:$0xff]   ;;  %v6423_v54 = vld [vmem:[%s8458_s1 + $0x1d0] sm:$0xff]  }
 0x525   :  { %6038 = vmatmul.mubr.msk.bf16.gmra.mrb[228].mxu1 %vm6865_vm3, %v3293_v20  ;;  %v3380_v12 = vrot.slane %v3306_v27, 1  ;;  %v3343_v2 = vshll.u32 %v3306_v27, 16  ;;  %v3021_v15 = vadd.f32 %v7747_v50, %v2990_v3  ;;  %v3341_v22 = vshrl.u32 %v3306_v27, 16  ;;  %4119 = vmatpush1.bf16.msra.mxu0 %v6417_v41 }
 0x526   :  { %v3022_v19 = vadd.f32 %v7747_v50, %v2993_v21  ;;  %v3349_v30 = vrot.slane %v3347_v14, 1  ;;  %4120 = vmatprep.subr.bf16.mxu0 %v6418_v51 }
 0x527   :  { %v3382_v11 = vsel %vm270_vm1, %v3380_v12, %v3381_v4  ;;  %v3345_v24 = vrot.slane %v3343_v2, 1  ;;  %4006 = vmatpush1.bf16.msra.mxu1 %v6413_v47 }
 0x528   :  { %v3285_v28 = vpack.c.bf16 %v3022_v19, %v3021_v15  ;;  %3601 = vmatmul.mubr.bf16.gmra.mrb[232].mxu0 %v3382_v11  ;;  %4007 = vmatprep.subr.bf16.mxu1 %v6414_v23 }
 0x529   :  { %v3346_v58 = vor.u32 %v3345_v24, %v3341_v22  ;;  %3608 = vmatprep.mubr.bf16.mxu0 %v6652_v1  ;;  %4121 = vmatpush1.bf16.msra.mxu0 %v6419_v53 }
 0x52a   :  { %v3295_v46 = vrot.slane %v3285_v28, 7  ;;  %4738 = vmatprep.subr.bf16.mxu0 %v6427_v44 }
 0x52b   :  { %v3350_v8 = vsel %vm209_vm2, %v3346_v58, %v3349_v30  ;;  %4008 = vmatpush1.bf16.msra.mxu1 %v6415_v35 }
 0x52c   :  { %3487 = vmatprep.mubr.bf16.mxu1 %v3350_v8  ;;  %v3309_v5 = vsel %vm192_vm0, 0, %v3295_v46  ;;  %v3384_v17 = vrot.slane %v3295_v46, 1  ;;  %v3357_v10 = vshll.u32 %v3295_v46, 16  ;;  %4009 = vmatprep.subr.bf16.mxu1 %v6652_v1 }
 0x52d   :  { %6040 = vmatmul.mubr.msk.bf16.gmra.mrb[232].mxu1 %vm6865_vm3, %v3294_v40  ;;  %v3383_v50 = vrot.slane %v3309_v5, 1  ;;  %v3353_v52 = vshll.u32 %v3309_v5, 16  ;;  %v3351_v20 = vshrl.u32 %v3309_v5, 16 }
 0x52e   :  { %v3359_v25 = vrot.slane %v3357_v10, 1  ;;  %v7864_v10 = vld [vmem:[%s8460_s2 + $0x5] ss:$0 sm:$0xff] }
 0x52f   :  { %v3385_v29 = vsel %vm270_vm1, %v3383_v50, %v3384_v17  ;;  %v3355_v31 = vrot.slane %v3353_v52, 1  ;;  %4010 = vmatpush1.bf16.msra.mxu1 %v6652_v1 }
 0x530   :  { %3609 = vmatmul.mubr.bf16.gmra.mrb[236].mxu0 %v3385_v29  ;;  %4011 = vmatprep.subr.bf16.mxu1 %v6652_v1 }
 0x531   :  { %v3356_v13 = vor.u32 %v3355_v31, %v3351_v20  ;;  %4148 = vmatprep.mubr.bf16.mxu0 %v6652_v1 }
 0x533   :  { %v3360_v37 = vsel %vm209_vm2, %v3356_v13, %v3359_v25  ;;  %4012 = vmatpush1.bf16.msra.mxu1 %v6652_v1 }
 0x534   :  { %3495 = vmatprep.mubr.bf16.mxu1 %v3360_v37  ;;  %4013 = vmatprep.subr.bf16.mxu1 %v6652_v1 }
 0x535   :  { %6042 = vmatmul.mubr.msk.bf16.gmra.mrb[236].mxu1 %vm6865_vm3, %v3295_v46 }
 0x537   :  { %4014 = vmatpush1.bf16.msra.mxu1 %v6652_v1 }
 0x538   :  { %4015 = vmatprep.subr.bf16.mxu1 %v6652_v1 }
 0x53b   :  { %4016 = vmatpush1.bf16.msra.mxu1 %v6652_v1 }
 0x53c   :  { %4017 = vmatprep.subr.bf16.mxu1 %v6652_v1 }
 0x53f   :  { %4018 = vmatpush1.bf16.msra.mxu1 %v6652_v1 }
 0x540   :  { %4019 = vmatprep.subr.bf16.mxu1 %v6420_v49 }
 0x543   :  { %4020 = vmatpush1.bf16.msra.mxu1 %v6421_v34 }
 0x544   :  { %4021 = vmatprep.subr.bf16.mxu1 %v6422_v42 }
 0x547   :  { %4022 = vmatpush1.bf16.msra.mxu1 %v6423_v54 }
 0x548   :  { %4023 = vmatprep.subr.bf16.mxu1 %v6424_v55 }
 0x54b   :  { %4024 = vmatpush1.bf16.msra.mxu1 %v6425_v6 }
 0x54c   :  { %4625 = vmatprep.subr.bf16.mxu1 %v6426_v39 }
 0x5b9   :  { %v3538_v62 = vpop.f32.mrb[200].mxu0 }
 0x5ba   :  { %v3540_v0 = vpop.f32.mrb[201].mxu0 }
 0x5bb   :  { %v3541_v40 = vpop.f32.mrb[202].mxu0 }
 0x5bc   :  { %v3543_v3 = vpop.f32.mrb[203].mxu0 }
 0x5be   :  { %v3425_v56 = vpop.f32.mrb[200].mxu1 }
 0x5bf   :  { %v3539_v7 = vadd.f32 %v3538_v62, %v3425_v56  ;;  %v3427_v9 = vpop.f32.mrb[201].mxu1 }
 0x5c0   :  { %v3428_v21 = vpop.f32.mrb[202].mxu1 }
 0x5c1   :  { %v3542_v27 = vadd.f32 %v3541_v40, %v3428_v21  ;;  %v3430_v4 = vpop.f32.mrb[203].mxu1  ;;  %v3546_v12 = vpop.f32.mrb[204].mxu0  ;;  %v3621_v37 = vadd.f32 %v7864_v10, %v3539_v7 }
 0x5c2   :  { %v3548_v2 = vpop.f32.mrb[205].mxu0 }
 0x5c3   :  { %v3549_v14 = vpop.f32.mrb[206].mxu0  ;;  %v3622_v45 = vadd.f32 %v7864_v10, %v3542_v27  ;;  %v6045_v47 = vmul.f32 -1.442695, %v3621_v37 }
 0x5c4   :  { %v3551_v15 = vpop.f32.mrb[207].mxu0 }
 0x5c5   :  { %v6046_v49 = vmul.f32 -1.442695, %v3622_v45  ;;  %6522 = vpow2.f32 %v6045_v47 }
 0x5c6   :  { %v3433_v19 = vpop.f32.mrb[204].mxu1 }
 0x5c7   :  { %v3547_v11 = vadd.f32 %v3546_v12, %v3433_v19  ;;  %v3435_v22 = vpop.f32.mrb[205].mxu1  ;;  %6524 = vpow2.f32 %v6046_v49 }
 0x5c8   :  { %v3436_v24 = vpop.f32.mrb[206].mxu1 }
 0x5c9   :  { %v3550_v28 = vadd.f32 %v3549_v14, %v3436_v24  ;;  %v3438_v58 = vpop.f32.mrb[207].mxu1  ;;  %v3554_v30 = vpop.f32.mrb[208].mxu0  ;;  %v3623_v42 = vadd.f32 %v7864_v10, %v3547_v11 }
 0x5ca   :  { %v3556_v46 = vpop.f32.mrb[209].mxu0 }
 0x5cb   :  { %v3557_v8 = vpop.f32.mrb[210].mxu0  ;;  %v3624_v55 = vadd.f32 %v7864_v10, %v3550_v28  ;;  %v6047_v0 = vmul.f32 -1.442695, %v3623_v42  ;;  %v7881_v46 = vld [vmem:[%s8461_s4 + $0x5] ss:$0 sm:$0xff] }
 0x5cc   :  { %v3559_v5 = vpop.f32.mrb[211].mxu0 }
 0x5cd   :  { %v6048_v40 = vmul.f32 -1.442695, %v3624_v55  ;;  %6526 = vpow2.f32 %v6047_v0 }
 0x5ce   :  { %v3441_v17 = vpop.f32.mrb[208].mxu1 }
 0x5cf   :  { %v3555_v50 = vadd.f32 %v3554_v30, %v3441_v17  ;;  %v3443_v52 = vpop.f32.mrb[209].mxu1  ;;  %6528 = vpow2.f32 %v6048_v40  ;;  %v6523_v14 = vpop.eup %6522 }
 0x5d0   :  { %v3444_v29 = vpop.f32.mrb[210].mxu1  ;;  %v3675_v28 = vadd.f32 1.0, %v6523_v14 }
 0x5d1   :  { %v3558_v20 = vadd.f32 %v3557_v8, %v3444_v29  ;;  %v3446_v31 = vpop.f32.mrb[211].mxu1  ;;  %v3562_v13 = vpop.f32.mrb[212].mxu0  ;;  %v3625_v21 = vadd.f32 %v7864_v10, %v3555_v50 }
 0x5d2   :  { %v3564_v25 = vpop.f32.mrb[213].mxu0  ;;  %v6525_v24 = vpop.eup %6524 }
 0x5d3   :  { %v3565_v38 = vpop.f32.mrb[214].mxu0  ;;  %v3626_v15 = vadd.f32 %v7864_v10, %v3558_v20  ;;  %v6049_v22 = vmul.f32 -1.442695, %v3625_v21  ;;  %v3676_v50 = vadd.f32 1.0, %v6525_v24 }
 0x5d4   :  { %v3567_v63 = vpop.f32.mrb[215].mxu0 }
 0x5d5   :  { %v6050_v30 = vmul.f32 -1.442695, %v3626_v15  ;;  %6530 = vpow2.f32 %v6049_v22 }
 0x5d6   :  { %v3449_v23 = vpop.f32.mrb[212].mxu1  ;;  %6532 = vrcp.f32 %v3675_v28 }
 0x5d7   :  { %v3563_v35 = vadd.f32 %v3562_v13, %v3449_v23  ;;  %v3451_v32 = vpop.f32.mrb[213].mxu1  ;;  %v6527_v37 = vpop.eup %6526  ;;  %6534 = vpow2.f32 %v6050_v30 }
 0x5d8   :  { %v3452_v41 = vpop.f32.mrb[214].mxu1  ;;  %v3677_v23 = vadd.f32 1.0, %v6527_v37 }
 0x5d9   :  { %v3566_v34 = vadd.f32 %v3565_v38, %v3452_v41  ;;  %v3454_v51 = vpop.f32.mrb[215].mxu1  ;;  %v3570_v53 = vpop.f32.mrb[216].mxu0  ;;  %v3627_v52 = vadd.f32 %v7864_v10, %v3563_v35 }
 0x5da   :  { %v3572_v54 = vpop.f32.mrb[217].mxu0  ;;  %v6529_v63 = vpop.eup %6528 }
 0x5db   :  { %v3573_v6 = vpop.f32.mrb[218].mxu0  ;;  %v3628_v39 = vadd.f32 %v7864_v10, %v3566_v34  ;;  %v6051_v47 = vmul.f32 -1.442695, %v3627_v52  ;;  %v3678_v32 = vadd.f32 1.0, %v6529_v63 }
 0x5dc   :  { %v3575_v62 = vpop.f32.mrb[219].mxu0 }
 0x5dd   :  { %v6052_v51 = vmul.f32 -1.442695, %v3628_v39 }
 0x5de   :  { %v3457_v3 = vpop.f32.mrb[216].mxu1 }
 0x5df   :  { %v3571_v56 = vadd.f32 %v3570_v53, %v3457_v3  ;;  %v3459_v7 = vpop.f32.mrb[217].mxu1  ;;  %v6531_v0 = vpop.eup %6530 }
 0x5e0   :  { %v3460_v9 = vpop.f32.mrb[218].mxu1 }
 0x5e1   :  { %v3574_v27 = vadd.f32 %v3573_v6, %v3460_v9  ;;  %v3462_v4 = vpop.f32.mrb[219].mxu1  ;;  %v3629_v41 = vadd.f32 %v7864_v10, %v3571_v56  ;;  %v6533_v9 = vpop.eup %6532 }
 0x5e2   :  { %v6535_v4 = vpop.eup %6534 }
 0x5e3   :  { %v3578_v12 = vpop.f32.mrb[220].mxu0  ;;  %v6053_v40 = vmul.f32 -1.442695, %v3629_v41  ;;  %v3630_v3 = vadd.f32 %v7864_v10, %v3574_v27  ;;  %v3680_v27 = vadd.f32 1.0, %v6535_v4 }
 0x5e4   :  { %v3579_v2 = vpop.f32.mrb[221].mxu0 }
 0x5e5   :  { %v3581_v19 = vpop.f32.mrb[222].mxu0 }
 0x5e6   :  { %v3582_v11 = vpop.f32.mrb[223].mxu0  ;;  %v6054_v19 = vmul.f32 -1.442695, %v3630_v3 }
 0x5e8   :  { %v3465_v58 = vpop.f32.mrb[220].mxu1 }
 0x5e9   :  { %v3466_v8 = vpop.f32.mrb[221].mxu1 }
 0x5ea   :  { %v3580_v5 = vadd.f32 %v3579_v2, %v3466_v8  ;;  %v3468_v17 = vpop.f32.mrb[222].mxu1  ;;  %v3679_v2 = vadd.f32 1.0, %v6531_v0 }
 0x5eb   :  { %v3469_v29 = vpop.f32.mrb[223].mxu1  ;;  %v3586_v20 = vpop.f32.mrb[224].mxu0 }
 0x5ec   :  { %v3635_v31 = vadd.f32 %v7881_v46, %v3580_v5  ;;  %v3583_v13 = vadd.f32 %v3582_v11, %v3469_v29  ;;  %v3587_v25 = vpop.f32.mrb[225].mxu0 }
 0x5ed   :  { %v3589_v38 = vpop.f32.mrb[226].mxu0 }
 0x5ee   :  { %6536 = vtanh.f32 %v3635_v31  ;;  %v3636_v44 = vadd.f32 %v7881_v46, %v3583_v13  ;;  %v3590_v45 = vpop.f32.mrb[227].mxu0 }
 0x5ef   :  { %6538 = vrcp.f32 %v3676_v50 }
 0x5f0   :  { %6540 = vtanh.f32 %v3636_v44  ;;  %v3473_v35 = vpop.f32.mrb[224].mxu1 }
 0x5f1   :  { %v3474_v49 = vpop.f32.mrb[225].mxu1  ;;  %6542 = vpow2.f32 %v6051_v47 }
 0x5f2   :  { %v3588_v53 = vadd.f32 %v3587_v25, %v3474_v49  ;;  %v3476_v42 = vpop.f32.mrb[226].mxu1  ;;  %6544 = vrcp.f32 %v3677_v23 }
 0x5f3   :  { %v3477_v54 = vpop.f32.mrb[227].mxu1  ;;  %v3594_v55 = vpop.f32.mrb[228].mxu0  ;;  %6546 = vrcp.f32 %v3678_v32 }
 0x5f4   :  { %v3637_v34 = vadd.f32 %v7881_v46, %v3588_v53  ;;  %v3591_v6 = vadd.f32 %v3590_v45, %v3477_v54  ;;  %v3595_v62 = vpop.f32.mrb[229].mxu0  ;;  %6548 = vpow2.f32 %v6052_v51 }
 0x5f5   :  { %v3597_v7 = vpop.f32.mrb[230].mxu0 }
 0x5f6   :  { %v3638_v56 = vadd.f32 %v7881_v46, %v3591_v6  ;;  %v3598_v21 = vpop.f32.mrb[231].mxu0  ;;  %6550 = vtanh.f32 %v3637_v34 }
 0x5f8   :  { %v6537_v12 = vpop.eup %6536  ;;  %6552 = vtanh.f32 %v3638_v56  ;;  %v3481_v14 = vpop.f32.mrb[228].mxu1 }
 0x5f9   :  { %v6539_v15 = vpop.eup %6538  ;;  %6554 = vpow2.f32 %v6053_v40  ;;  %v3715_v11 = vmul.f32 %v6537_v12, %v6533_v9  ;;  %v3482_v22 = vpop.f32.mrb[229].mxu1  ;;  %v6429_v9 = vld [vmem:[%s8458_s1 + $0x228] sm:$0xff]   ;;  %v6434_v14 = vld [vmem:[%s8457_s3 + $0x230] sm:$0xff]  }
 0x5fa   :  { %v6541_v24 = vpop.eup %6540  ;;  %v3596_v28 = vadd.f32 %v3595_v62, %v3482_v22  ;;  %v3484_v10 = vpop.f32.mrb[230].mxu1  ;;  %6556 = vrcp.f32 %v3679_v2 }
 0x5fb   :  { %v3716_v58 = vmul.f32 %v6541_v24, %v6539_v15  ;;  %v3485_v30 = vpop.f32.mrb[231].mxu1  ;;  %v3602_v8 = vpop.f32.mrb[232].mxu0  ;;  %6558 = vpow2.f32 %v6054_v19  ;;  %v7893_v29 = vadd.f32 %v3715_v11, %v7340_v43 }
 0x5fc   :  { %v3639_v5 = vadd.f32 %v7881_v46, %v3596_v28  ;;  %v3599_v17 = vadd.f32 %v3598_v21, %v3485_v30  ;;  %v3603_v50 = vpop.f32.mrb[233].mxu0  ;;  %v6543_v52 = vpop.eup %6542 }
 0x5fd   :  { %v7896_v20 = vadd.f32 %v3716_v58, %v7345_v48  ;;  %v3605_v31 = vpop.f32.mrb[234].mxu0  ;;  %v6545_v13 = vpop.eup %6544  ;;  %v3681_v44 = vadd.f32 1.0, %v6543_v52 }
 0x5fe   :  { %6560 = vtanh.f32 %v3639_v5  ;;  %v3640_v25 = vadd.f32 %v7881_v46, %v3599_v17  ;;  %v3606_v37 = vpop.f32.mrb[235].mxu0  ;;  %v6547_v38 = vpop.eup %6546  ;;  %v6435_v5 = vld [vmem:[%s8458_s1 + $0x230] sm:$0xff]  }
 0x5ff   :  { %6562 = vrcp.f32 %v3680_v27  ;;  %v3893_v63 = vpack.c.bf16 %v7896_v20, %v7893_v29  ;;  %v6549_v39 = vpop.eup %6548 }
 0x600   :  { %6564 = vtanh.f32 %v3640_v25  ;;  %v3489_v45 = vpop.f32.mrb[232].mxu1  ;;  %v6551_v47 = vpop.eup %6550  ;;  %v3682_v42 = vadd.f32 1.0, %v6549_v39 }
 0x601   :  { %v7901_v23 = vrot.slane %v3893_v63, 7  ;;  %v3490_v35 = vpop.f32.mrb[233].mxu1  ;;  %v3717_v41 = vmul.f32 %v6551_v47, %v6545_v13  ;;  %6566 = vrcp.f32 %v3681_v44  ;;  %v6428_v44 = vld [vmem:[%s8458_s1 + $0x1f8] sm:$0xff]  }
 0x602   :  { %v6553_v32 = vpop.eup %6552  ;;  %v3604_v49 = vadd.f32 %v3603_v50, %v3490_v35  ;;  %v3492_v51 = vpop.f32.mrb[234].mxu1 }
 0x603   :  { %v6555_v53 = vpop.eup %6554  ;;  %v3718_v54 = vmul.f32 %v6553_v32, %v6547_v38  ;;  %v3493_v55 = vpop.f32.mrb[235].mxu1  ;;  %v3909_v6 = vsel %vm192_vm0, 0, %v7901_v23  ;;  %v3984_v62 = vrot.slane %v7901_v23, 1  ;;  %v7911_v56 = vadd.f32 %v3717_v41, %v7362_v16 }
 0x604   :  { %v3610_v34 = vpop.f32.mrb[236].mxu0  ;;  %v3641_v0 = vadd.f32 %v7881_v46, %v3604_v49  ;;  %v3607_v40 = vadd.f32 %v3606_v37, %v3493_v55  ;;  %v3983_v7 = vrot.slane %v3909_v6, 1  ;;  %v3925_v12 = vshll.u32 %v3909_v6, 16  ;;  %v6557_v15 = vpop.eup %6556  ;;  %v6436_v37 = vld [vmem:[%s8457_s3 + $0x238] sm:$0xff]   ;;  %v6430_v49 = vld [vmem:[%s8457_s3 + $0x200] sm:$0xff]  }
 0x605   :  { %v3611_v3 = vpop.f32.mrb[237].mxu0  ;;  %v7914_v21 = vadd.f32 %v3718_v54, %v7367_v18  ;;  %v3929_v2 = vshll.u32 %v7901_v23, 16  ;;  %v3683_v19 = vadd.f32 1.0, %v6555_v53  ;;  %v6559_v28 = vpop.eup %6558  ;;  %v3923_v10 = vshrl.u32 %v3909_v6, 16 }
 0x606   :  { %v3613_v4 = vpop.f32.mrb[238].mxu0  ;;  %6568 = vtanh.f32 %v3641_v0  ;;  %v3642_v11 = vadd.f32 %v7881_v46, %v3607_v40  ;;  %v7922_v24 = vsel %vm270_vm1, %v3983_v7, %v3984_v62  ;;  %v3927_v27 = vrot.slane %v3925_v12, 1  ;;  %v6431_v7 = vld [vmem:[%s8458_s1 + $0x200] sm:$0xff]  }
 0x607   :  { %v3614_v22 = vpop.f32.mrb[239].mxu0  ;;  %6570 = vrcp.f32 %v3682_v42  ;;  %4149 = vmatmul.mubr.bf16.vlgmr.msra.gmra.mrb[240].mxu0 %v7922_v24  ;;  %v3894_v58 = vpack.c.bf16 %v7914_v21, %v7911_v56  ;;  %v3931_v13 = vrot.slane %v3929_v2, 1  ;;  %v3684_v45 = vadd.f32 1.0, %v6559_v28 }
 0x608   :  { %v6561_v30 = vpop.eup %6560  ;;  %6572 = vtanh.f32 %v3642_v11  ;;  %v3497_v8 = vpop.f32.mrb[236].mxu1  ;;  %4156 = vmatprep.mubr.bf16.mxu0 %v6652_v1  ;;  %4739 = vmatpush1.bf16.msra.mxu0 %v6429_v9  ;;  %v3928_v31 = vor.u32 %v3927_v27, %v3923_v10  ;;  %v6433_v10 = vld [vmem:[%s8458_s1 + $0x208] sm:$0xff]  }
 0x609   :  { %v6563_v17 = vpop.eup %6562  ;;  %v3719_v50 = vmul.f32 %v6561_v30, %v6557_v15  ;;  %v3498_v52 = vpop.f32.mrb[237].mxu1  ;;  %v7931_v25 = vrot.slane %v3894_v58, 7  ;;  %4740 = vmatprep.subr.bf16.mxu0 %v6434_v14  ;;  %6574 = vrcp.f32 %v3683_v19 }
 0x60a   :  { %v6565_v38 = vpop.eup %6564  ;;  %v3612_v63 = vadd.f32 %v3611_v3, %v3498_v52  ;;  %v3500_v39 = vpop.f32.mrb[238].mxu1  ;;  %v7940_v32 = vsel %vm209_vm2, %v3928_v31, %v3931_v13 }
 0x60b   :  { %v3720_v47 = vmul.f32 %v6565_v38, %v6563_v17  ;;  %v3501_v35 = vpop.f32.mrb[239].mxu1  ;;  %v3912_v41 = vsel %vm192_vm0, 0, %v7931_v25  ;;  %4035 = vmatprep.mubr.bf16.mxu1 %v7940_v32  ;;  %v3987_v54 = vrot.slane %v7931_v25, 1  ;;  %v7951_v55 = vadd.f32 %v3719_v50, %v7406_v59  ;;  %v6567_v0 = vpop.eup %6566 }
 0x60c   :  { %v3643_v51 = vadd.f32 %v7881_v46, %v3612_v63  ;;  %v3615_v53 = vadd.f32 %v3614_v22, %v3501_v35  ;;  %v3986_v42 = vrot.slane %v3912_v41, 1  ;;  %4741 = vmatpush1.bf16.msra.mxu0 %v6435_v5  ;;  %6110 = vmatmul.mubr.msk.bf16.vlgmr.msra.gmra.mrb[240].mxu1 %vm6865_vm3, %v7901_v23  ;;  %v3935_v6 = vshll.u32 %v3912_v41, 16 }
 0x60d   :  { %v7954_v34 = vadd.f32 %v3720_v47, %v7411_v61  ;;  %v3939_v62 = vshll.u32 %v7931_v25, 16  ;;  %4742 = vmatprep.subr.bf16.mxu0 %v6436_v37  ;;  %4626 = vmatpush1.bf16.msra.mxu1 %v6428_v44  ;;  %v3933_v9 = vshrl.u32 %v3912_v41, 16 }
 0x60e   :  { %6576 = vtanh.f32 %v3643_v51  ;;  %v3644_v40 = vadd.f32 %v7881_v46, %v3615_v53  ;;  %v7962_v3 = vsel %vm270_vm1, %v3986_v42, %v3987_v54  ;;  %v3937_v4 = vrot.slane %v3935_v6, 1  ;;  %4627 = vmatprep.subr.bf16.mxu1 %v6430_v49  ;;  %v6432_v46 = vld [vmem:[%s8457_s3 + $0x208] sm:$0xff]  }
 0x60f   :  { %6578 = vrcp.f32 %v3684_v45  ;;  %4157 = vmatmul.mubr.bf16.gmra.mrb[244].mxu0 %v7962_v3  ;;  %v3895_v12 = vpack.c.bf16 %v7954_v34, %v7951_v55  ;;  %v3941_v11 = vrot.slane %v3939_v62, 1 }
 0x610   :  { %v6569_v2 = vpop.eup %6568  ;;  %6580 = vtanh.f32 %v3644_v40  ;;  %4164 = vmatprep.mubr.bf16.mxu0 %v6652_v1  ;;  %v3938_v19 = vor.u32 %v3937_v4, %v3933_v9 }
 0x611   :  { %v6571_v14 = vpop.eup %6570  ;;  %v3721_v15 = vmul.f32 %v6569_v2, %v6567_v0  ;;  %v7974_v22 = vrot.slane %v3895_v12, 7  ;;  %4628 = vmatpush1.bf16.msra.mxu1 %v6431_v7 }
 0x612   :  { %v6573_v28 = vpop.eup %6572  ;;  %v7980_v58 = vsel %vm209_vm2, %v3938_v19, %v3941_v11  ;;  %4629 = vmatprep.subr.bf16.mxu1 %v6432_v46 }
 0x613   :  { %v3722_v27 = vmul.f32 %v6573_v28, %v6571_v14  ;;  %v3915_v30 = vsel %vm192_vm0, 0, %v7974_v22  ;;  %v6575_v8 = vpop.eup %6574  ;;  %4043 = vmatprep.mubr.bf16.mxu1 %v7980_v58  ;;  %v3990_v17 = vrot.slane %v7974_v22, 1  ;;  %v7987_v52 = vadd.f32 %v3721_v15, %v7446_v33 }
 0x614   :  { %v3989_v5 = vrot.slane %v3915_v30, 1  ;;  %v3945_v50 = vshll.u32 %v3915_v30, 16  ;;  %6112 = vmatmul.mubr.msk.bf16.gmra.mrb[244].mxu1 %vm6865_vm3, %v7931_v25  ;;  %v3949_v13 = vshll.u32 %v7974_v22, 16  ;;  %v3943_v38 = vshrl.u32 %v3915_v30, 16 }
 0x615   :  { %v7990_v31 = vadd.f32 %v3722_v27, %v7451_v36  ;;  %4630 = vmatpush1.bf16.msra.mxu1 %v6433_v10 }
 0x616   :  { %v7997_v37 = vsel %vm270_vm1, %v3989_v5, %v3990_v17  ;;  %v3947_v63 = vrot.slane %v3945_v50, 1  ;;  %4631 = vmatprep.subr.bf16.mxu1 %v6652_v1  ;;  %v3951_v47 = vrot.slane %v3949_v13, 1 }
 0x617   :  { %4165 = vmatmul.mubr.bf16.gmra.mrb[248].mxu0 %v7997_v37  ;;  %v3896_v39 = vpack.c.bf16 %v7990_v31, %v7987_v52 }
 0x618   :  { %v6577_v44 = vpop.eup %6576  ;;  %v3948_v45 = vor.u32 %v3947_v63, %v3943_v38  ;;  %4172 = vmatprep.mubr.bf16.mxu0 %v6652_v1 }
 0x619   :  { %v6579_v35 = vpop.eup %6578  ;;  %v3723_v41 = vmul.f32 %v6577_v44, %v6575_v8  ;;  %v8004_v49 = vrot.slane %v3896_v39, 7  ;;  %4632 = vmatpush1.bf16.msra.mxu1 %v6652_v1  ;;  %v8094_v39 = vld [vmem:[%s8457_s3 + $0x270] sm:$0xff]  }
 0x61a   :  { %v6581_v51 = vpop.eup %6580  ;;  %v3952_v53 = vsel %vm209_vm2, %v3948_v45, %v3951_v47  ;;  %4633 = vmatprep.subr.bf16.mxu1 %v6652_v1 }
 0x61b   :  { %v3724_v42 = vmul.f32 %v6581_v51, %v6579_v35  ;;  %4051 = vmatprep.mubr.bf16.mxu1 %v3952_v53  ;;  %v3918_v54 = vsel %vm192_vm0, 0, %v8004_v49  ;;  %v3993_v6 = vrot.slane %v8004_v49, 1  ;;  %v3959_v40 = vshll.u32 %v8004_v49, 16 }
 0x61c   :  { %v3992_v62 = vrot.slane %v3918_v54, 1  ;;  %v3955_v0 = vshll.u32 %v3918_v54, 16  ;;  %v8014_v7 = vadd.f32 %v3723_v41, %v7477_v57  ;;  %6114 = vmatmul.mubr.msk.bf16.gmra.mrb[248].mxu1 %vm6865_vm3, %v7974_v22  ;;  %v3953_v12 = vshrl.u32 %v3918_v54, 16 }
 0x61d   :  { %v8017_v9 = vadd.f32 %v3724_v42, %v7482_v60  ;;  %4634 = vmatpush1.bf16.msra.mxu1 %v6652_v1  ;;  %v3961_v15 = vrot.slane %v3959_v40, 1 }
 0x61e   :  { %v3994_v4 = vsel %vm270_vm1, %v3992_v62, %v3993_v6  ;;  %v3957_v46 = vrot.slane %v3955_v0, 1  ;;  %4635 = vmatprep.subr.bf16.mxu1 %v6652_v1 }
 0x61f   :  { %v3897_v2 = vpack.c.bf16 %v8017_v9, %v8014_v7  ;;  %4173 = vmatmul.mubr.bf16.gmra.mrb[252].mxu0 %v3994_v4 }
 0x620   :  { %v3958_v14 = vor.u32 %v3957_v46, %v3953_v12  ;;  %4180 = vmatprep.mubr.bf16.mxu0 %v6652_v1 }
 0x621   :  { %v3907_v19 = vrot.slane %v3897_v2, 7  ;;  %4636 = vmatpush1.bf16.msra.mxu1 %v6652_v1 }
 0x622   :  { %v3962_v11 = vsel %vm209_vm2, %v3958_v14, %v3961_v15  ;;  %4637 = vmatprep.subr.bf16.mxu1 %v6652_v1 }
 0x623   :  { %4059 = vmatprep.mubr.bf16.mxu1 %v3962_v11  ;;  %v3921_v28 = vsel %vm192_vm0, 0, %v3907_v19  ;;  %v3996_v10 = vrot.slane %v3907_v19, 1  ;;  %v3969_v8 = vshll.u32 %v3907_v19, 16 }
 0x624   :  { %v3995_v27 = vrot.slane %v3921_v28, 1  ;;  %v3965_v30 = vshll.u32 %v3921_v28, 16  ;;  %6116 = vmatmul.mubr.msk.bf16.gmra.mrb[252].mxu1 %vm6865_vm3, %v8004_v49  ;;  %v3963_v17 = vshrl.u32 %v3921_v28, 16 }
 0x625   :  { %4638 = vmatpush1.bf16.msra.mxu1 %v6652_v1  ;;  %v3971_v38 = vrot.slane %v3969_v8, 1 }
 0x626   :  { %v3997_v5 = vsel %vm270_vm1, %v3995_v27, %v3996_v10  ;;  %v3967_v50 = vrot.slane %v3965_v30, 1  ;;  %4639 = vmatprep.subr.bf16.mxu1 %v6652_v1 }
 0x627   :  { %4181 = vmatmul.mubr.bf16.gmra.mrb[0].mxu0 %v3997_v5 }
 0x628   :  { %v3968_v13 = vor.u32 %v3967_v50, %v3963_v17  ;;  %4188 = vmatprep.mubr.bf16.mxu0 %v6652_v1 }
 0x629   :  { %4640 = vmatpush1.bf16.msra.mxu1 %v6652_v1 }
 0x62a   :  { %v3972_v63 = vsel %vm209_vm2, %v3968_v13, %v3971_v38 }
 0x62b   :  { %4067 = vmatprep.mubr.bf16.mxu1 %v3972_v63 }
 0x62c   :  { %6118 = vmatmul.mubr.msk.bf16.gmra.mrb[0].mxu1 %vm6865_vm3, %v3907_v19 }
 0x62d   :  { %4075 = vmatprep.mubr.bf16.mxu1 %v7940_v32  ;;  %v6440_v32 = vld [vmem:[%s8457_s3 + $0x218] sm:$0xff]  }
 0x62f   :  { %4189 = vmatmul.mubr.bf16.gmra.mrb[4].mxu0 %v7922_v24  ;;  %v6438_v24 = vld [vmem:[%s8457_s3 + $0x210] sm:$0xff]  }
 0x630   :  { %4196 = vmatprep.mubr.bf16.mxu0 %v6652_v1  ;;  %4641 = vmatprep.subr.bf16.mxu1 %v6438_v24 }
 0x634   :  { %6120 = vmatmul.mubr.msk.bf16.gmra.mrb[4].mxu1 %vm6865_vm3, %v7901_v23  ;;  %v6437_v23 = vld [vmem:[%s8458_s1 + $0x238] sm:$0xff]  }
 0x635   :  { %4083 = vmatprep.mubr.bf16.mxu1 %v7980_v58  ;;  %4743 = vmatpush1.bf16.msra.mxu0 %v6437_v23  ;;  %v6443_v58 = vld [vmem:[%s8458_s1 + $0x220] sm:$0xff]   ;;  %v8108_v23 = vld [vmem:[%s8458_s1 + $0x270] sm:$0xff]  }
 0x636   :  { %5360 = vmatprep.subr.bf16.mxu0 %v8094_v39 }
 0x637   :  { %4197 = vmatmul.mubr.bf16.gmra.mrb[8].mxu0 %v7962_v3  ;;  %v6441_v3 = vld [vmem:[%s8458_s1 + $0x218] sm:$0xff]  }
 0x638   :  { %4204 = vmatprep.mubr.bf16.mxu0 %v6652_v1 }
 0x63c   :  { %6122 = vmatmul.mubr.msk.bf16.gmra.mrb[8].mxu1 %vm6865_vm3, %v7931_v25  ;;  %v6439_v25 = vld [vmem:[%s8458_s1 + $0x210] sm:$0xff]  }
 0x63d   :  { %4091 = vmatprep.mubr.bf16.mxu1 %v3952_v53  ;;  %4642 = vmatpush1.bf16.msra.mxu1 %v6439_v25  ;;  %v8100_v53 = vld [vmem:[%s8460_s2 + $0x6] ss:$0 sm:$0xff] }
 0x63e   :  { %4643 = vmatprep.subr.bf16.mxu1 %v6440_v32 }
 0x63f   :  { %4205 = vmatmul.mubr.bf16.gmra.mrb[12].mxu0 %v7997_v37  ;;  %v6444_v37 = vld [vmem:[%s8457_s3 + $0x240] sm:$0xff]  }
 0x640   :  { %4212 = vmatprep.mubr.bf16.mxu0 %v6652_v1 }
 0x641   :  { %4644 = vmatpush1.bf16.msra.mxu1 %v6441_v3 }
 0x644   :  { %6124 = vmatmul.mubr.msk.bf16.gmra.mrb[12].mxu1 %vm6865_vm3, %v7974_v22  ;;  %v6442_v22 = vld [vmem:[%s8457_s3 + $0x220] sm:$0xff]  }
 0x645   :  { %4099 = vmatprep.mubr.bf16.mxu1 %v3962_v11  ;;  %4645 = vmatprep.subr.bf16.mxu1 %v6442_v22 }
 0x646   :  { %4646 = vmatpush1.bf16.msra.mxu1 %v6443_v58 }
 0x647   :  { %4213 = vmatmul.mubr.bf16.gmra.mrb[16].mxu0 %v3994_v4  ;;  %5247 = vmatprep.subr.bf16.mxu1 %v6444_v37 }
 0x648   :  { %4220 = vmatprep.mubr.bf16.mxu0 %v6652_v1 }
 0x64c   :  { %6126 = vmatmul.mubr.msk.bf16.gmra.mrb[16].mxu1 %vm6865_vm3, %v8004_v49 }
 0x64d   :  { %4107 = vmatprep.mubr.bf16.mxu1 %v3972_v63 }
 0x64f   :  { %4221 = vmatmul.mubr.bf16.gmra.mrb[20].mxu0 %v3997_v5 }
 0x650   :  { %4770 = vmatprep.mubr.bf16.mxu0 %v6652_v1 }
 0x654   :  { %6128 = vmatmul.mubr.msk.bf16.gmra.mrb[20].mxu1 %vm6865_vm3, %v3907_v19 }
 0x6da   :  { %v4150_v44 = vpop.f32.mrb[240].mxu0 }
 0x6db   :  { %v4152_v45 = vpop.f32.mrb[241].mxu0 }
 0x6dc   :  { %v4153_v47 = vpop.f32.mrb[242].mxu0 }
 0x6dd   :  { %v4155_v35 = vpop.f32.mrb[243].mxu0 }
 0x6df   :  { %v4037_v41 = vpop.f32.mrb[240].mxu1 }
 0x6e0   :  { %v4151_v49 = vadd.f32 %v4150_v44, %v4037_v41  ;;  %v4039_v51 = vpop.f32.mrb[241].mxu1 }
 0x6e1   :  { %v4040_v42 = vpop.f32.mrb[242].mxu1  ;;  %v6445_v51 = vld [vmem:[%s8458_s1 + $0x240] sm:$0xff]  }
 0x6e2   :  { %v4158_v54 = vpop.f32.mrb[244].mxu0  ;;  %v4154_v6 = vadd.f32 %v4153_v47, %v4040_v42  ;;  %v4042_v62 = vpop.f32.mrb[243].mxu1  ;;  %v4233_v4 = vadd.f32 %v8100_v53, %v4151_v49 }
 0x6e3   :  { %v4160_v0 = vpop.f32.mrb[245].mxu0  ;;  %v6446_v62 = vld [vmem:[%s8457_s3 + $0x248] sm:$0xff]  }
 0x6e4   :  { %v4161_v40 = vpop.f32.mrb[246].mxu0  ;;  %v4234_v12 = vadd.f32 %v8100_v53, %v4154_v6 }
 0x6e5   :  { %v4163_v46 = vpop.f32.mrb[247].mxu0 }
 0x6e6   :  { %v4405_v2 = vpack.c.bf16 %v4234_v12, %v4233_v4 }
 0x6e7   :  { %v4045_v14 = vpop.f32.mrb[244].mxu1 }
 0x6e8   :  { %v4415_v15 = vrot.slane %v4405_v2, 7  ;;  %v4159_v19 = vadd.f32 %v4158_v54, %v4045_v14  ;;  %v4047_v11 = vpop.f32.mrb[245].mxu1 }
 0x6e9   :  { %v4048_v28 = vpop.f32.mrb[246].mxu1 }
 0x6ea   :  { %v4166_v10 = vpop.f32.mrb[248].mxu0  ;;  %v4421_v27 = vsel %vm192_vm0, 0, %v4415_v15  ;;  %v4496_v30 = vrot.slane %v4415_v15, 1  ;;  %v4162_v8 = vadd.f32 %v4161_v40, %v4048_v28  ;;  %v4050_v5 = vpop.f32.mrb[247].mxu1  ;;  %v4441_v63 = vshll.u32 %v4415_v15, 16 }
 0x6eb   :  { %v4168_v17 = vpop.f32.mrb[249].mxu0  ;;  %v4495_v50 = vrot.slane %v4421_v27, 1  ;;  %v4437_v38 = vshll.u32 %v4421_v27, 16  ;;  %v4235_v24 = vadd.f32 %v8100_v53, %v4159_v19  ;;  %v4435_v22 = vshrl.u32 %v4421_v27, 16 }
 0x6ec   :  { %v4169_v13 = vpop.f32.mrb[250].mxu0  ;;  %v4236_v25 = vadd.f32 %v8100_v53, %v4162_v8  ;;  %v4443_v47 = vrot.slane %v4441_v63, 1 }
 0x6ed   :  { %v4171_v32 = vpop.f32.mrb[251].mxu0  ;;  %v4497_v3 = vsel %vm270_vm1, %v4495_v50, %v4496_v30  ;;  %v4439_v58 = vrot.slane %v4437_v38, 1  ;;  %v6447_v30 = vld [vmem:[%s8458_s1 + $0x248] sm:$0xff]  }
 0x6ee   :  { %v4406_v37 = vpack.c.bf16 %v4236_v25, %v4235_v24  ;;  %4771 = vmatmul.mubr.bf16.vlgmr.msra.gmra.mrb[24].mxu0 %v4497_v3  ;;  %v6449_v3 = vld [vmem:[%s8458_s1 + $0x250] sm:$0xff]  }
 0x6ef   :  { %v4053_v44 = vpop.f32.mrb[248].mxu1  ;;  %v4440_v45 = vor.u32 %v4439_v58, %v4435_v22  ;;  %4778 = vmatprep.mubr.bf16.mxu0 %v6652_v1  ;;  %5361 = vmatpush1.bf16.msra.mxu0 %v8108_v23 }
 0x6f0   :  { %v4416_v35 = vrot.slane %v4406_v37, 7  ;;  %v4167_v41 = vadd.f32 %v4166_v10, %v4053_v44  ;;  %v4055_v49 = vpop.f32.mrb[249].mxu1 }
 0x6f1   :  { %v4056_v42 = vpop.f32.mrb[250].mxu1  ;;  %v4444_v6 = vsel %vm209_vm2, %v4440_v45, %v4443_v47 }
 0x6f2   :  { %v4174_v54 = vpop.f32.mrb[252].mxu0  ;;  %v4424_v0 = vsel %vm192_vm0, 0, %v4416_v35  ;;  %v4499_v40 = vrot.slane %v4416_v35, 1  ;;  %v4170_v4 = vadd.f32 %v4169_v13, %v4056_v42  ;;  %v4058_v12 = vpop.f32.mrb[251].mxu1  ;;  %4657 = vmatprep.mubr.bf16.mxu1 %v4444_v6  ;;  %v4451_v11 = vshll.u32 %v4416_v35, 16 }
 0x6f3   :  { %v4176_v46 = vpop.f32.mrb[253].mxu0  ;;  %v4498_v2 = vrot.slane %v4424_v0, 1  ;;  %6186 = vmatmul.mubr.msk.bf16.vlgmr.msra.gmra.mrb[24].mxu1 %vm6865_vm3, %v4415_v15  ;;  %v4447_v19 = vshll.u32 %v4424_v0, 16  ;;  %v4237_v28 = vadd.f32 %v8100_v53, %v4167_v41  ;;  %v4445_v5 = vshrl.u32 %v4424_v0, 16  ;;  %v6448_v15 = vld [vmem:[%s8457_s3 + $0x250] sm:$0xff]  }
 0x6f4   :  { %v4177_v14 = vpop.f32.mrb[254].mxu0  ;;  %v4238_v10 = vadd.f32 %v8100_v53, %v4170_v4  ;;  %5248 = vmatpush1.bf16.msra.mxu1 %v6445_v51  ;;  %v4453_v63 = vrot.slane %v4451_v11, 1 }
 0x6f5   :  { %v4179_v27 = vpop.f32.mrb[255].mxu0  ;;  %v4500_v8 = vsel %vm270_vm1, %v4498_v2, %v4499_v40  ;;  %v4449_v17 = vrot.slane %v4447_v19, 1  ;;  %5249 = vmatprep.subr.bf16.mxu1 %v6446_v62 }
 0x6f6   :  { %v4407_v50 = vpack.c.bf16 %v4238_v10, %v4237_v28  ;;  %4779 = vmatmul.mubr.bf16.gmra.mrb[28].mxu0 %v4500_v8 }
 0x6f7   :  { %v4061_v13 = vpop.f32.mrb[252].mxu1  ;;  %v4450_v38 = vor.u32 %v4449_v17, %v4445_v5  ;;  %4786 = vmatprep.mubr.bf16.mxu0 %v6652_v1 }
 0x6f8   :  { %v4417_v24 = vrot.slane %v4407_v50, 7  ;;  %v4175_v25 = vadd.f32 %v4174_v54, %v4061_v13  ;;  %v4063_v32 = vpop.f32.mrb[253].mxu1  ;;  %5250 = vmatpush1.bf16.msra.mxu1 %v6447_v30 }
 0x6f9   :  { %v4064_v22 = vpop.f32.mrb[254].mxu1  ;;  %v4454_v37 = vsel %vm209_vm2, %v4450_v38, %v4453_v63  ;;  %5251 = vmatprep.subr.bf16.mxu1 %v6448_v15 }
 0x6fa   :  { %v4182_v58 = vpop.f32.mrb[0].mxu0  ;;  %v4427_v44 = vsel %vm192_vm0, 0, %v4417_v24  ;;  %v4502_v45 = vrot.slane %v4417_v24, 1  ;;  %v4178_v47 = vadd.f32 %v4177_v14, %v4064_v22  ;;  %v4066_v41 = vpop.f32.mrb[255].mxu1  ;;  %4665 = vmatprep.mubr.bf16.mxu1 %v4454_v37  ;;  %v4461_v6 = vshll.u32 %v4417_v24, 16 }
 0x6fb   :  { %v4184_v49 = vpop.f32.mrb[1].mxu0  ;;  %v4501_v51 = vrot.slane %v4427_v44, 1  ;;  %6188 = vmatmul.mubr.msk.bf16.gmra.mrb[28].mxu1 %vm6865_vm3, %v4416_v35  ;;  %v4457_v54 = vshll.u32 %v4427_v44, 16  ;;  %v4239_v62 = vadd.f32 %v8100_v53, %v4175_v25  ;;  %v4455_v12 = vshrl.u32 %v4427_v44, 16 }
 0x6fc   :  { %v4185_v42 = vpop.f32.mrb[2].mxu0  ;;  %v4240_v0 = vadd.f32 %v8100_v53, %v4178_v47  ;;  %5252 = vmatpush1.bf16.msra.mxu1 %v6449_v3  ;;  %v4463_v35 = vrot.slane %v4461_v6, 1 }
 0x6fd   :  { %v4187_v40 = vpop.f32.mrb[3].mxu0  ;;  %v4503_v4 = vsel %vm270_vm1, %v4501_v51, %v4502_v45  ;;  %v4459_v46 = vrot.slane %v4457_v54, 1  ;;  %5253 = vmatprep.subr.bf16.mxu1 %v6652_v1 }
 0x6fe   :  { %v4408_v2 = vpack.c.bf16 %v4240_v0, %v4239_v62  ;;  %4787 = vmatmul.mubr.bf16.gmra.mrb[32].mxu0 %v4503_v4  ;;  %v8166_v4 = vld [vmem:[%s8461_s4 + $0x6] ss:$0 sm:$0xff] }
 0x6ff   :  { %v4069_v14 = vpop.f32.mrb[0].mxu1  ;;  %v4460_v19 = vor.u32 %v4459_v46, %v4455_v12  ;;  %4794 = vmatprep.mubr.bf16.mxu0 %v6652_v1 }
 0x700   :  { %v4418_v11 = vrot.slane %v4408_v2, 7  ;;  %v4183_v28 = vadd.f32 %v4182_v58, %v4069_v14  ;;  %v4071_v10 = vpop.f32.mrb[1].mxu1  ;;  %5254 = vmatpush1.bf16.msra.mxu1 %v6652_v1 }
 0x701   :  { %v4072_v27 = vpop.f32.mrb[2].mxu1  ;;  %v4464_v8 = vsel %vm209_vm2, %v4460_v19, %v4463_v35  ;;  %5255 = vmatprep.subr.bf16.mxu1 %v6652_v1 }
 0x702   :  { %v4190_v30 = vpop.f32.mrb[4].mxu0  ;;  %v4430_v5 = vsel %vm192_vm0, 0, %v4418_v11  ;;  %v4505_v17 = vrot.slane %v4418_v11, 1  ;;  %v4186_v15 = vadd.f32 %v4185_v42, %v4072_v27  ;;  %v4074_v50 = vpop.f32.mrb[3].mxu1  ;;  %4673 = vmatprep.mubr.bf16.mxu1 %v4464_v8  ;;  %v4471_v32 = vshll.u32 %v4418_v11, 16 }
 0x703   :  { %v4191_v13 = vpop.f32.mrb[5].mxu0  ;;  %v4504_v38 = vrot.slane %v4430_v5, 1  ;;  %6190 = vmatmul.mubr.msk.bf16.gmra.mrb[32].mxu1 %vm6865_vm3, %v4417_v24  ;;  %v4467_v25 = vshll.u32 %v4430_v5, 16  ;;  %v4241_v3 = vadd.f32 %v8100_v53, %v4183_v28  ;;  %v4465_v44 = vshrl.u32 %v4430_v5, 16 }
 0x704   :  { %v4193_v63 = vpop.f32.mrb[6].mxu0  ;;  %v4242_v22 = vadd.f32 %v8100_v53, %v4186_v15  ;;  %5256 = vmatpush1.bf16.msra.mxu1 %v6652_v1  ;;  %v4473_v49 = vrot.slane %v4471_v32, 1 }
 0x705   :  { %v4194_v58 = vpop.f32.mrb[7].mxu0  ;;  %v4506_v37 = vsel %vm270_vm1, %v4504_v38, %v4505_v17  ;;  %v4469_v45 = vrot.slane %v4467_v25, 1  ;;  %5257 = vmatprep.subr.bf16.mxu1 %v6652_v1 }
 0x706   :  { %v4409_v47 = vpack.c.bf16 %v4242_v22, %v4241_v3  ;;  %4795 = vmatmul.mubr.bf16.gmra.mrb[36].mxu0 %v4506_v37 }
 0x707   :  { %v4077_v41 = vpop.f32.mrb[4].mxu1  ;;  %v4470_v24 = vor.u32 %v4469_v45, %v4465_v44  ;;  %4802 = vmatprep.mubr.bf16.mxu0 %v6652_v1 }
 0x708   :  { %v4419_v51 = vrot.slane %v4409_v47, 7  ;;  %v4078_v42 = vpop.f32.mrb[5].mxu1  ;;  %5258 = vmatpush1.bf16.msra.mxu1 %v6652_v1 }
 0x709   :  { %v4192_v53 = vadd.f32 %v4191_v13, %v4078_v42  ;;  %v4080_v54 = vpop.f32.mrb[6].mxu1  ;;  %v4474_v62 = vsel %vm209_vm2, %v4470_v24, %v4473_v49  ;;  %5259 = vmatprep.subr.bf16.mxu1 %v6652_v1 }
 0x70a   :  { %v4198_v6 = vpop.f32.mrb[8].mxu0  ;;  %v4433_v0 = vsel %vm192_vm0, 0, %v4419_v51  ;;  %v4508_v40 = vrot.slane %v4419_v51, 1  ;;  %v4081_v12 = vpop.f32.mrb[7].mxu1  ;;  %4681 = vmatprep.mubr.bf16.mxu1 %v4474_v62  ;;  %v4481_v10 = vshll.u32 %v4419_v51, 16 }
 0x70b   :  { %v4199_v46 = vpop.f32.mrb[9].mxu0  ;;  %v4507_v2 = vrot.slane %v4433_v0, 1  ;;  %v4195_v14 = vadd.f32 %v4194_v58, %v4081_v12  ;;  %6192 = vmatmul.mubr.msk.bf16.gmra.mrb[36].mxu1 %vm6865_vm3, %v4418_v11  ;;  %v4477_v28 = vshll.u32 %v4433_v0, 16  ;;  %v4247_v27 = vadd.f32 %v8166_v4, %v4192_v53 }
 0x70c   :  { %v4201_v19 = vpop.f32.mrb[10].mxu0  ;;  %5260 = vmatpush1.bf16.msra.mxu1 %v6652_v1  ;;  %v4475_v5 = vshrl.u32 %v4433_v0, 16  ;;  %v4483_v38 = vrot.slane %v4481_v10, 1 }
 0x70d   :  { %v4202_v35 = vpop.f32.mrb[11].mxu0  ;;  %v4248_v30 = vadd.f32 %v8166_v4, %v4195_v14  ;;  %v4509_v8 = vsel %vm270_vm1, %v4507_v2, %v4508_v40  ;;  %5261 = vmatprep.subr.bf16.mxu1 %v6652_v1  ;;  %v4479_v17 = vrot.slane %v4477_v28, 1 }
 0x70e   :  { %4803 = vmatmul.mubr.bf16.gmra.mrb[40].mxu0 %v4509_v8 }
 0x70f   :  { %v4515_v15 = vpack.c.bf16 %v4248_v30, %v4247_v27  ;;  %v4085_v50 = vpop.f32.mrb[8].mxu1  ;;  %4810 = vmatprep.mubr.bf16.mxu0 %v6652_v1  ;;  %v4480_v13 = vor.u32 %v4479_v17, %v4475_v5 }
 0x710   :  { %v4086_v11 = vpop.f32.mrb[9].mxu1  ;;  %5262 = vmatpush1.bf16.msra.mxu1 %v6652_v1 }
 0x711   :  { %v4525_v63 = vrot.slane %v4515_v15, 7  ;;  %v4200_v25 = vadd.f32 %v4199_v46, %v4086_v11  ;;  %v4088_v32 = vpop.f32.mrb[10].mxu1  ;;  %v4484_v58 = vsel %vm209_vm2, %v4480_v13, %v4483_v38 }
 0x712   :  { %v4206_v3 = vpop.f32.mrb[12].mxu0  ;;  %v4089_v22 = vpop.f32.mrb[11].mxu1  ;;  %4689 = vmatprep.mubr.bf16.mxu1 %v4484_v58 }
 0x713   :  { %v4207_v37 = vpop.f32.mrb[13].mxu0  ;;  %v4531_v44 = vsel %vm192_vm0, 0, %v4525_v63  ;;  %v4606_v45 = vrot.slane %v4525_v63, 1  ;;  %v4203_v47 = vadd.f32 %v4202_v35, %v4089_v22  ;;  %6194 = vmatmul.mubr.msk.bf16.gmra.mrb[40].mxu1 %vm6865_vm3, %v4419_v51  ;;  %v4551_v53 = vshll.u32 %v4525_v63, 16 }
 0x714   :  { %v4209_v41 = vpop.f32.mrb[14].mxu0  ;;  %v4605_v24 = vrot.slane %v4531_v44, 1  ;;  %v4547_v42 = vshll.u32 %v4531_v44, 16  ;;  %v4249_v54 = vadd.f32 %v8166_v4, %v4200_v25  ;;  %v4545_v0 = vshrl.u32 %v4531_v44, 16 }
 0x715   :  { %v4210_v49 = vpop.f32.mrb[15].mxu0  ;;  %v4250_v6 = vadd.f32 %v8166_v4, %v4203_v47  ;;  %v4553_v19 = vrot.slane %v4551_v53, 1 }
 0x716   :  { %v4607_v62 = vsel %vm270_vm1, %v4605_v24, %v4606_v45  ;;  %v4549_v40 = vrot.slane %v4547_v42, 1 }
 0x717   :  { %v4516_v12 = vpack.c.bf16 %v4250_v6, %v4249_v54  ;;  %v4093_v46 = vpop.f32.mrb[12].mxu1  ;;  %4811 = vmatmul.mubr.bf16.gmra.mrb[44].mxu0 %v4607_v62 }
 0x718   :  { %v4094_v2 = vpop.f32.mrb[13].mxu1  ;;  %v4550_v14 = vor.u32 %v4549_v40, %v4545_v0  ;;  %4818 = vmatprep.mubr.bf16.mxu0 %v6652_v1 }
 0x719   :  { %v4526_v51 = vrot.slane %v4516_v12, 7  ;;  %v4208_v35 = vadd.f32 %v4207_v37, %v4094_v2  ;;  %v4096_v28 = vpop.f32.mrb[14].mxu1 }
 0x71a   :  { %v4214_v10 = vpop.f32.mrb[16].mxu0  ;;  %v4097_v27 = vpop.f32.mrb[15].mxu1  ;;  %v4554_v8 = vsel %vm209_vm2, %v4550_v14, %v4553_v19 }
 0x71b   :  { %v4215_v30 = vpop.f32.mrb[17].mxu0  ;;  %v4534_v5 = vsel %vm192_vm0, 0, %v4526_v51  ;;  %v4609_v17 = vrot.slane %v4526_v51, 1  ;;  %v4211_v15 = vadd.f32 %v4210_v49, %v4097_v27  ;;  %4697 = vmatprep.mubr.bf16.mxu1 %v4554_v8  ;;  %v4561_v25 = vshll.u32 %v4526_v51, 16 }
 0x71c   :  { %v4217_v50 = vpop.f32.mrb[18].mxu0  ;;  %v4608_v11 = vrot.slane %v4534_v5, 1  ;;  %6196 = vmatmul.mubr.msk.bf16.gmra.mrb[44].mxu1 %vm6865_vm3, %v4525_v63  ;;  %v4557_v38 = vshll.u32 %v4534_v5, 16  ;;  %v4251_v32 = vadd.f32 %v8166_v4, %v4208_v35  ;;  %v4555_v58 = vshrl.u32 %v4534_v5, 16 }
 0x71d   :  { %v4218_v13 = vpop.f32.mrb[19].mxu0  ;;  %v4252_v3 = vadd.f32 %v8166_v4, %v4211_v15  ;;  %v4563_v24 = vrot.slane %v4561_v25, 1 }
 0x71e   :  { %v4610_v22 = vsel %vm270_vm1, %v4608_v11, %v4609_v17  ;;  %v4559_v37 = vrot.slane %v4557_v38, 1 }
 0x71f   :  { %v4517_v44 = vpack.c.bf16 %v4252_v3, %v4251_v32  ;;  %v4101_v45 = vpop.f32.mrb[16].mxu1  ;;  %4819 = vmatmul.mubr.bf16.gmra.mrb[48].mxu0 %v4610_v22 }
 0x720   :  { %v4102_v47 = vpop.f32.mrb[17].mxu1  ;;  %v4560_v41 = vor.u32 %v4559_v37, %v4555_v58  ;;  %4826 = vmatprep.mubr.bf16.mxu0 %v6652_v1 }
 0x721   :  { %v4527_v63 = vrot.slane %v4517_v44, 7  ;;  %v4216_v49 = vadd.f32 %v4215_v30, %v4102_v47  ;;  %v4104_v42 = vpop.f32.mrb[18].mxu1 }
 0x722   :  { %v4222_v53 = vpop.f32.mrb[20].mxu0  ;;  %v4105_v54 = vpop.f32.mrb[19].mxu1  ;;  %v4564_v62 = vsel %vm209_vm2, %v4560_v41, %v4563_v24 }
 0x723   :  { %v4223_v6 = vpop.f32.mrb[21].mxu0  ;;  %v4537_v0 = vsel %vm192_vm0, 0, %v4527_v63  ;;  %v4612_v40 = vrot.slane %v4527_v63, 1  ;;  %v4219_v12 = vadd.f32 %v4218_v13, %v4105_v54  ;;  %4705 = vmatprep.mubr.bf16.mxu1 %v4564_v62  ;;  %v4571_v35 = vshll.u32 %v4527_v63, 16 }
 0x724   :  { %v4225_v46 = vpop.f32.mrb[22].mxu0  ;;  %v4611_v2 = vrot.slane %v4537_v0, 1  ;;  %6198 = vmatmul.mubr.msk.bf16.gmra.mrb[48].mxu1 %vm6865_vm3, %v4526_v51  ;;  %v4567_v19 = vshll.u32 %v4537_v0, 16  ;;  %v4253_v28 = vadd.f32 %v8166_v4, %v4216_v49  ;;  %v4565_v30 = vshrl.u32 %v4537_v0, 16 }
 0x725   :  { %v4226_v14 = vpop.f32.mrb[23].mxu0  ;;  %v4254_v10 = vadd.f32 %v8166_v4, %v4219_v12  ;;  %v4573_v11 = vrot.slane %v4571_v35, 1 }
 0x726   :  { %v4613_v27 = vsel %vm270_vm1, %v4611_v2, %v4612_v40  ;;  %v4569_v8 = vrot.slane %v4567_v19, 1 }
 0x727   :  { %v4518_v5 = vpack.c.bf16 %v4254_v10, %v4253_v28  ;;  %v4109_v17 = vpop.f32.mrb[20].mxu1  ;;  %4827 = vmatmul.mubr.bf16.gmra.mrb[52].mxu0 %v4613_v27  ;;  %v6452_v27 = vld [vmem:[%s8457_s3 + $0x258] sm:$0xff]  }
 0x728   :  { %v4110_v15 = vpop.f32.mrb[21].mxu1  ;;  %v4570_v50 = vor.u32 %v4569_v8, %v4565_v30  ;;  %4834 = vmatprep.mubr.bf16.mxu0 %v6652_v1  ;;  %v8224_v30 = vld [vmem:[%s8457_s3 + $0x278] sm:$0xff]   ;;  %5263 = vmatprep.subr.bf16.mxu1 %v6452_v27  ;;  %v8239_v17 = vld [vmem:[%s8457_s3 + $0x280] sm:$0xff]  }
 0x729   :  { %v4528_v51 = vrot.slane %v4518_v5, 7  ;;  %v4224_v13 = vadd.f32 %v4223_v6, %v4110_v15  ;;  %v4112_v38 = vpop.f32.mrb[22].mxu1  ;;  %v6454_v8 = vld [vmem:[%s8458_s1 + $0x258] sm:$0xff]   ;;  %5362 = vmatprep.subr.bf16.mxu0 %v8224_v30  ;;  %v6456_v15 = vld [vmem:[%s8457_s3 + $0x260] sm:$0xff]  }
 0x72a   :  { %v4113_v25 = vpop.f32.mrb[23].mxu1  ;;  %v4574_v32 = vsel %vm209_vm2, %v4570_v50, %v4573_v11  ;;  %v8232_v5 = vld [vmem:[%s8458_s1 + $0x278] sm:$0xff]   ;;  %5264 = vmatpush1.bf16.msra.mxu1 %v6454_v8  ;;  %v8247_v50 = vld [vmem:[%s8458_s1 + $0x280] sm:$0xff]  }
 0x72b   :  { %v4540_v3 = vsel %vm192_vm0, 0, %v4528_v51  ;;  %v4615_v22 = vrot.slane %v4528_v51, 1  ;;  %v4227_v58 = vadd.f32 %v4226_v14, %v4113_v25  ;;  %4713 = vmatprep.mubr.bf16.mxu1 %v4574_v32  ;;  %v4581_v45 = vshll.u32 %v4528_v51, 16  ;;  %5363 = vmatpush1.bf16.msra.mxu0 %v8232_v5  ;;  %v6457_v11 = vld [vmem:[%s8458_s1 + $0x260] sm:$0xff]  }
 0x72c   :  { %v4614_v37 = vrot.slane %v4540_v3, 1  ;;  %6200 = vmatmul.mubr.msk.bf16.gmra.mrb[52].mxu1 %vm6865_vm3, %v4527_v63  ;;  %v4577_v44 = vshll.u32 %v4540_v3, 16  ;;  %v4255_v47 = vadd.f32 %v8166_v4, %v4224_v13  ;;  %v4575_v49 = vshrl.u32 %v4540_v3, 16  ;;  %5364 = vmatprep.subr.bf16.mxu0 %v8239_v17  ;;  %v6461_v13 = vld [vmem:[%s8458_s1 + $0x268] sm:$0xff]  }
 0x72d   :  { %v4256_v41 = vadd.f32 %v8166_v4, %v4227_v58  ;;  %v4583_v6 = vrot.slane %v4581_v45, 1  ;;  %5265 = vmatprep.subr.bf16.mxu1 %v6456_v15 }
 0x72e   :  { %v4616_v24 = vsel %vm270_vm1, %v4614_v37, %v4615_v22  ;;  %v4579_v42 = vrot.slane %v4577_v44, 1  ;;  %5266 = vmatpush1.bf16.msra.mxu1 %v6457_v11  ;;  %v8264_v44 = vld [vmem:[%s8460_s2 + $0x7] ss:$0 sm:$0xff] }
 0x72f   :  { %v4519_v53 = vpack.c.bf16 %v4256_v41, %v4255_v47  ;;  %4835 = vmatmul.mubr.bf16.gmra.mrb[56].mxu0 %v4616_v24 }
 0x730   :  { %v4580_v54 = vor.u32 %v4579_v42, %v4575_v49  ;;  %4842 = vmatprep.mubr.bf16.mxu0 %v6652_v1  ;;  %5365 = vmatpush1.bf16.msra.mxu0 %v8247_v50 }
 0x731   :  { %v4529_v62 = vrot.slane %v4519_v53, 7 }
 0x732   :  { %v4584_v0 = vsel %vm209_vm2, %v4580_v54, %v4583_v6 }
 0x733   :  { %v4543_v63 = vsel %vm192_vm0, 0, %v4529_v62  ;;  %v4618_v40 = vrot.slane %v4529_v62, 1  ;;  %4721 = vmatprep.mubr.bf16.mxu1 %v4584_v0  ;;  %v4591_v46 = vshll.u32 %v4529_v62, 16 }
 0x734   :  { %v4617_v12 = vrot.slane %v4543_v63, 1  ;;  %6202 = vmatmul.mubr.msk.bf16.gmra.mrb[56].mxu1 %vm6865_vm3, %v4528_v51  ;;  %v4587_v4 = vshll.u32 %v4543_v63, 16  ;;  %v4585_v14 = vshrl.u32 %v4543_v63, 16  ;;  %v6460_v51 = vld [vmem:[%s8457_s3 + $0x268] sm:$0xff]  }
 0x735   :  { %v4593_v28 = vrot.slane %v4591_v46, 1  ;;  %5267 = vmatprep.subr.bf16.mxu1 %v6460_v51 }
 0x736   :  { %v4619_v2 = vsel %vm270_vm1, %v4617_v12, %v4618_v40  ;;  %v4589_v19 = vrot.slane %v4587_v4, 1  ;;  %5268 = vmatpush1.bf16.msra.mxu1 %v6461_v13 }
 0x737   :  { %4843 = vmatmul.mubr.bf16.gmra.mrb[60].mxu0 %v4619_v2  ;;  %6293 = vmatprep.subr.bf16.mxu1 %v8094_v39 }
 0x738   :  { %v4590_v35 = vor.u32 %v4589_v19, %v4585_v14  ;;  %5392 = vmatprep.mubr.bf16.mxu0 %v6652_v1 }
 0x73a   :  { %v4594_v10 = vsel %vm209_vm2, %v4590_v35, %v4593_v28 }
 0x73b   :  { %4729 = vmatprep.mubr.bf16.mxu1 %v4594_v10 }
 0x73c   :  { %6204 = vmatmul.mubr.msk.bf16.gmra.mrb[60].mxu1 %vm6865_vm3, %v4529_v62 }
 0x7c1   :  { %v4772_v38 = vpop.f32.mrb[24].mxu0 }
 0x7c2   :  { %v4774_v25 = vpop.f32.mrb[25].mxu0 }
 0x7c3   :  { %v4775_v32 = vpop.f32.mrb[26].mxu0 }
 0x7c4   :  { %v4777_v3 = vpop.f32.mrb[27].mxu0 }
 0x7c6   :  { %v4659_v22 = vpop.f32.mrb[24].mxu1 }
 0x7c7   :  { %v4773_v58 = vadd.f32 %v4772_v38, %v4659_v22  ;;  %v4661_v37 = vpop.f32.mrb[25].mxu1 }
 0x7c8   :  { %v4662_v45 = vpop.f32.mrb[26].mxu1 }
 0x7c9   :  { %v4776_v47 = vadd.f32 %v4775_v32, %v4662_v45  ;;  %v4664_v41 = vpop.f32.mrb[27].mxu1  ;;  %v4780_v24 = vpop.f32.mrb[28].mxu0  ;;  %v4855_v42 = vadd.f32 %v8264_v44, %v4773_v58 }
 0x7ca   :  { %v4782_v49 = vpop.f32.mrb[29].mxu0 }
 0x7cb   :  { %v4856_v39 = vadd.f32 %v8264_v44, %v4776_v47  ;;  %v4783_v53 = vpop.f32.mrb[30].mxu0 }
 0x7cc   :  { %v4785_v54 = vpop.f32.mrb[31].mxu0 }
 0x7cd   :  { %v5027_v6 = vpack.c.bf16 %v4856_v39, %v4855_v42 }
 0x7ce   :  { %v4667_v62 = vpop.f32.mrb[28].mxu1 }
 0x7cf   :  { %v5037_v0 = vrot.slane %v5027_v6, 7  ;;  %v4781_v63 = vadd.f32 %v4780_v24, %v4667_v62  ;;  %v4669_v40 = vpop.f32.mrb[29].mxu1 }
 0x7d0   :  { %v4670_v12 = vpop.f32.mrb[30].mxu1 }
 0x7d1   :  { %v5043_v4 = vsel %vm192_vm0, 0, %v5037_v0  ;;  %v5118_v46 = vrot.slane %v5037_v0, 1  ;;  %v4784_v2 = vadd.f32 %v4783_v53, %v4670_v12  ;;  %v4672_v14 = vpop.f32.mrb[31].mxu1  ;;  %v4788_v19 = vpop.f32.mrb[32].mxu0  ;;  %v5063_v27 = vshll.u32 %v5037_v0, 16 }
 0x7d2   :  { %v5117_v35 = vrot.slane %v5043_v4, 1  ;;  %v4790_v28 = vpop.f32.mrb[33].mxu0  ;;  %v5059_v10 = vshll.u32 %v5043_v4, 16  ;;  %v4857_v8 = vadd.f32 %v8264_v44, %v4781_v63  ;;  %v5057_v38 = vshrl.u32 %v5043_v4, 16 }
 0x7d3   :  { %v4858_v15 = vadd.f32 %v8264_v44, %v4784_v2  ;;  %v4791_v11 = vpop.f32.mrb[34].mxu0  ;;  %v5065_v58 = vrot.slane %v5063_v27, 1 }
 0x7d4   :  { %v5119_v51 = vsel %vm270_vm1, %v5117_v35, %v5118_v46  ;;  %v4793_v13 = vpop.f32.mrb[35].mxu0  ;;  %v5061_v25 = vrot.slane %v5059_v10, 1 }
 0x7d5   :  { %v5028_v32 = vpack.c.bf16 %v4858_v15, %v4857_v8  ;;  %5393 = vmatmul.mubr.bf16.vlgmr.msra.gmra.mrb[64].mxu0 %v5119_v51 }
 0x7d6   :  { %v4675_v3 = vpop.f32.mrb[32].mxu1  ;;  %v5062_v22 = vor.u32 %v5061_v25, %v5057_v38  ;;  %5400 = vmatprep.mubr.bf16.mxu0 %v6652_v1 }
 0x7d7   :  { %v5038_v37 = vrot.slane %v5028_v32, 7  ;;  %v4789_v45 = vadd.f32 %v4788_v19, %v4675_v3  ;;  %v4677_v47 = vpop.f32.mrb[33].mxu1 }
 0x7d8   :  { %v4678_v41 = vpop.f32.mrb[34].mxu1  ;;  %v5066_v24 = vsel %vm209_vm2, %v5062_v22, %v5065_v58 }
 0x7d9   :  { %v5046_v49 = vsel %vm192_vm0, 0, %v5038_v37  ;;  %v5121_v42 = vrot.slane %v5038_v37, 1  ;;  %v4792_v39 = vadd.f32 %v4791_v11, %v4678_v41  ;;  %v4680_v53 = vpop.f32.mrb[35].mxu1  ;;  %v4796_v54 = vpop.f32.mrb[36].mxu0  ;;  %5279 = vmatprep.mubr.bf16.mxu1 %v5066_v24  ;;  %v5073_v40 = vshll.u32 %v5038_v37, 16 }
 0x7da   :  { %v5120_v6 = vrot.slane %v5046_v49, 1  ;;  %v4798_v62 = vpop.f32.mrb[37].mxu0  ;;  %6262 = vmatmul.mubr.msk.bf16.vlgmr.msra.gmra.mrb[64].mxu1 %vm6865_vm3, %v5037_v0  ;;  %v5069_v63 = vshll.u32 %v5046_v49, 16  ;;  %v4859_v12 = vadd.f32 %v8264_v44, %v4789_v45  ;;  %v5067_v19 = vshrl.u32 %v5046_v49, 16 }
 0x7db   :  { %v4860_v4 = vadd.f32 %v8264_v44, %v4792_v39  ;;  %v4799_v46 = vpop.f32.mrb[38].mxu0  ;;  %6296 = vmatpush1.bf16.msra.mxu1 %v8108_v23  ;;  %v5075_v27 = vrot.slane %v5073_v40, 1 }
 0x7dc   :  { %v4801_v2 = vpop.f32.mrb[39].mxu0  ;;  %v5122_v14 = vsel %vm270_vm1, %v5120_v6, %v5121_v42  ;;  %v5071_v35 = vrot.slane %v5069_v63, 1  ;;  %6294 = vmatprep.subr.bf16.mxu1 %v8224_v30 }
 0x7dd   :  { %v5029_v28 = vpack.c.bf16 %v4860_v4, %v4859_v12  ;;  %5401 = vmatmul.mubr.bf16.gmra.mrb[68].mxu0 %v5122_v14 }
 0x7de   :  { %v4683_v10 = vpop.f32.mrb[36].mxu1  ;;  %v5072_v0 = vor.u32 %v5071_v35, %v5067_v19  ;;  %5408 = vmatprep.mubr.bf16.mxu0 %v6652_v1 }
 0x7df   :  { %v5039_v8 = vrot.slane %v5029_v28, 7  ;;  %v4797_v15 = vadd.f32 %v4796_v54, %v4683_v10  ;;  %v4685_v11 = vpop.f32.mrb[37].mxu1  ;;  %6297 = vmatpush1.bf16.msra.mxu1 %v8232_v5 }
 0x7e0   :  { %v4686_v23 = vpop.f32.mrb[38].mxu1  ;;  %v5076_v51 = vsel %vm209_vm2, %v5072_v0, %v5075_v27  ;;  %6295 = vmatprep.subr.bf16.mxu1 %v8239_v17 }
 0x7e1   :  { %v5049_v13 = vsel %vm192_vm0, 0, %v5039_v8  ;;  %v5124_v30 = vrot.slane %v5039_v8, 1  ;;  %v4800_v38 = vadd.f32 %v4799_v46, %v4686_v23  ;;  %v4688_v25 = vpop.f32.mrb[39].mxu1  ;;  %v4804_v32 = vpop.f32.mrb[40].mxu0  ;;  %5287 = vmatprep.mubr.bf16.mxu1 %v5076_v51  ;;  %v5083_v45 = vshll.u32 %v5039_v8, 16 }
 0x7e2   :  { %v5123_v3 = vrot.slane %v5049_v13, 1  ;;  %v4806_v22 = vpop.f32.mrb[41].mxu0  ;;  %6264 = vmatmul.mubr.msk.bf16.gmra.mrb[68].mxu1 %vm6865_vm3, %v5038_v37  ;;  %v5079_v58 = vshll.u32 %v5049_v13, 16  ;;  %v4861_v5 = vadd.f32 %v8264_v44, %v4797_v15  ;;  %v5077_v49 = vshrl.u32 %v5049_v13, 16 }
 0x7e3   :  { %v4862_v47 = vadd.f32 %v8264_v44, %v4800_v38  ;;  %v4807_v41 = vpop.f32.mrb[42].mxu0  ;;  %6298 = vmatpush1.bf16.msra.mxu1 %v8247_v50  ;;  %v5085_v54 = vrot.slane %v5083_v45, 1 }
 0x7e4   :  { %v4809_v17 = vpop.f32.mrb[43].mxu0  ;;  %v5125_v24 = vsel %vm270_vm1, %v5123_v3, %v5124_v30  ;;  %v5081_v42 = vrot.slane %v5079_v58, 1 }
 0x7e5   :  { %v5030_v39 = vpack.c.bf16 %v4862_v47, %v4861_v5  ;;  %5409 = vmatmul.mubr.bf16.gmra.mrb[72].mxu0 %v5125_v24  ;;  %v8307_v47 = vld [vmem:[%s8461_s4 + $0x7] ss:$0 sm:$0xff] }
 0x7e6   :  { %v5082_v53 = vor.u32 %v5081_v42, %v5077_v49  ;;  %5416 = vmatprep.mubr.bf16.mxu0 %v6652_v1  ;;  %v4691_v6 = vpop.f32.mrb[40].mxu1 }
 0x7e7   :  { %v5040_v37 = vrot.slane %v5030_v39, 7  ;;  %v4805_v62 = vadd.f32 %v4804_v32, %v4691_v6  ;;  %v4693_v63 = vpop.f32.mrb[41].mxu1 }
 0x7e8   :  { %v5086_v40 = vsel %vm209_vm2, %v5082_v53, %v5085_v54  ;;  %v4694_v4 = vpop.f32.mrb[42].mxu1 }
 0x7e9   :  { %v5052_v12 = vsel %vm192_vm0, 0, %v5040_v37  ;;  %v5127_v50 = vrot.slane %v5040_v37, 1  ;;  %5295 = vmatprep.mubr.bf16.mxu1 %v5086_v40  ;;  %v4808_v2 = vadd.f32 %v4807_v41, %v4694_v4  ;;  %v4696_v14 = vpop.f32.mrb[43].mxu1  ;;  %v5093_v10 = vshll.u32 %v5040_v37, 16 }
 0x7ea   :  { %v5126_v46 = vrot.slane %v5052_v12, 1  ;;  %v4812_v19 = vpop.f32.mrb[44].mxu0  ;;  %6266 = vmatmul.mubr.msk.bf16.gmra.mrb[72].mxu1 %vm6865_vm3, %v5039_v8  ;;  %v5089_v28 = vshll.u32 %v5052_v12, 16  ;;  %v4863_v0 = vadd.f32 %v8264_v44, %v4805_v62  ;;  %v5087_v51 = vshrl.u32 %v5052_v12, 16 }
 0x7eb   :  { %v4813_v35 = vpop.f32.mrb[45].mxu0  ;;  %v4864_v27 = vadd.f32 %v8264_v44, %v4808_v2  ;;  %v5095_v8 = vrot.slane %v5093_v10, 1 }
 0x7ec   :  { %v4815_v15 = vpop.f32.mrb[46].mxu0  ;;  %v5128_v11 = vsel %vm270_vm1, %v5126_v46, %v5127_v50  ;;  %v5091_v13 = vrot.slane %v5089_v28, 1 }
 0x7ed   :  { %v4816_v23 = vpop.f32.mrb[47].mxu0  ;;  %5417 = vmatmul.mubr.bf16.gmra.mrb[76].mxu0 %v5128_v11  ;;  %v5031_v30 = vpack.c.bf16 %v4864_v27, %v4863_v0 }
 0x7ee   :  { %5424 = vmatprep.mubr.bf16.mxu0 %v6652_v1  ;;  %v5092_v25 = vor.u32 %v5091_v13, %v5087_v51 }
 0x7ef   :  { %v4699_v38 = vpop.f32.mrb[44].mxu1  ;;  %v5041_v32 = vrot.slane %v5031_v30, 7 }
 0x7f0   :  { %v4700_v3 = vpop.f32.mrb[45].mxu1  ;;  %v5096_v45 = vsel %vm209_vm2, %v5092_v25, %v5095_v8 }
 0x7f1   :  { %v4814_v22 = vadd.f32 %v4813_v35, %v4700_v3  ;;  %v4702_v58 = vpop.f32.mrb[46].mxu1  ;;  %v5055_v44 = vsel %vm192_vm0, 0, %v5041_v32  ;;  %v5130_v5 = vrot.slane %v5041_v32, 1  ;;  %5303 = vmatprep.mubr.bf16.mxu1 %v5096_v45  ;;  %v5103_v54 = vshll.u32 %v5041_v32, 16 }
 0x7f2   :  { %v4703_v41 = vpop.f32.mrb[47].mxu1  ;;  %v4820_v17 = vpop.f32.mrb[48].mxu0  ;;  %v5129_v24 = vrot.slane %v5055_v44, 1  ;;  %6268 = vmatmul.mubr.msk.bf16.gmra.mrb[76].mxu1 %vm6865_vm3, %v5040_v37  ;;  %v5099_v53 = vshll.u32 %v5055_v44, 16  ;;  %v5097_v12 = vshrl.u32 %v5055_v44, 16 }
 0x7f3   :  { %v4817_v49 = vadd.f32 %v4816_v23, %v4703_v41  ;;  %v4821_v42 = vpop.f32.mrb[49].mxu0  ;;  %v4869_v6 = vadd.f32 %v8307_v47, %v4814_v22  ;;  %v5105_v14 = vrot.slane %v5103_v54, 1 }
 0x7f4   :  { %v4823_v39 = vpop.f32.mrb[50].mxu0  ;;  %v5131_v40 = vsel %vm270_vm1, %v5129_v24, %v5130_v5  ;;  %v5101_v50 = vrot.slane %v5099_v53, 1 }
 0x7f5   :  { %v4870_v62 = vadd.f32 %v8307_v47, %v4817_v49  ;;  %v4824_v63 = vpop.f32.mrb[51].mxu0  ;;  %5425 = vmatmul.mubr.bf16.gmra.mrb[80].mxu0 %v5131_v40 }
 0x7f6   :  { %5432 = vmatprep.mubr.bf16.mxu0 %v6652_v1  ;;  %v5102_v37 = vor.u32 %v5101_v50, %v5097_v12 }
 0x7f7   :  { %v5137_v4 = vpack.c.bf16 %v4870_v62, %v4869_v6  ;;  %v4707_v46 = vpop.f32.mrb[48].mxu1 }
 0x7f8   :  { %v4708_v2 = vpop.f32.mrb[49].mxu1  ;;  %v5106_v10 = vsel %vm209_vm2, %v5102_v37, %v5105_v14 }
 0x7f9   :  { %v5147_v19 = vrot.slane %v5137_v4, 7  ;;  %v4822_v35 = vadd.f32 %v4821_v42, %v4708_v2  ;;  %v4710_v28 = vpop.f32.mrb[50].mxu1  ;;  %5311 = vmatprep.mubr.bf16.mxu1 %v5106_v10 }
 0x7fa   :  { %v4711_v0 = vpop.f32.mrb[51].mxu1  ;;  %v4828_v27 = vpop.f32.mrb[52].mxu0  ;;  %6270 = vmatmul.mubr.msk.bf16.gmra.mrb[80].mxu1 %vm6865_vm3, %v5041_v32 }
 0x7fb   :  { %v5153_v15 = vsel %vm192_vm0, 0, %v5147_v19  ;;  %v5228_v11 = vrot.slane %v5147_v19, 1  ;;  %v4825_v23 = vadd.f32 %v4824_v63, %v4711_v0  ;;  %v4829_v51 = vpop.f32.mrb[53].mxu0  ;;  %v5173_v25 = vshll.u32 %v5147_v19, 16 }
 0x7fc   :  { %v5227_v13 = vrot.slane %v5153_v15, 1  ;;  %v4831_v30 = vpop.f32.mrb[54].mxu0  ;;  %v5169_v38 = vshll.u32 %v5153_v15, 16  ;;  %v4871_v8 = vadd.f32 %v8307_v47, %v4822_v35  ;;  %v5167_v45 = vshrl.u32 %v5153_v15, 16 }
 0x7fd   :  { %v4872_v3 = vadd.f32 %v8307_v47, %v4825_v23  ;;  %v4832_v22 = vpop.f32.mrb[55].mxu0  ;;  %v5175_v49 = vrot.slane %v5173_v25, 1 }
 0x7fe   :  { %v5229_v58 = vsel %vm270_vm1, %v5227_v13, %v5228_v11  ;;  %v5171_v44 = vrot.slane %v5169_v38, 1 }
 0x7ff   :  { %v5138_v5 = vpack.c.bf16 %v4872_v3, %v4871_v8  ;;  %v4715_v41 = vpop.f32.mrb[52].mxu1  ;;  %5433 = vmatmul.mubr.bf16.gmra.mrb[84].mxu0 %v5229_v58 }
 0x800   :  { %v4716_v17 = vpop.f32.mrb[53].mxu1  ;;  %v5172_v24 = vor.u32 %v5171_v44, %v5167_v45  ;;  %5440 = vmatprep.mubr.bf16.mxu0 %v6652_v1 }
 0x801   :  { %v5148_v32 = vrot.slane %v5138_v5, 7  ;;  %v4830_v42 = vadd.f32 %v4829_v51, %v4716_v17  ;;  %v4718_v39 = vpop.f32.mrb[54].mxu1 }
 0x802   :  { %v4719_v53 = vpop.f32.mrb[55].mxu1  ;;  %v4836_v54 = vpop.f32.mrb[56].mxu0  ;;  %v5176_v6 = vsel %vm209_vm2, %v5172_v24, %v5175_v49 }
 0x803   :  { %v5156_v62 = vsel %vm192_vm0, 0, %v5148_v32  ;;  %v5231_v63 = vrot.slane %v5148_v32, 1  ;;  %v4833_v40 = vadd.f32 %v4832_v22, %v4719_v53  ;;  %v4837_v12 = vpop.f32.mrb[57].mxu0  ;;  %5319 = vmatprep.mubr.bf16.mxu1 %v5176_v6  ;;  %v5183_v2 = vshll.u32 %v5148_v32, 16 }
 0x804   :  { %v5230_v50 = vrot.slane %v5156_v62, 1  ;;  %v4839_v4 = vpop.f32.mrb[58].mxu0  ;;  %6272 = vmatmul.mubr.msk.bf16.gmra.mrb[84].mxu1 %vm6865_vm3, %v5147_v19  ;;  %v5179_v46 = vshll.u32 %v5156_v62, 16  ;;  %v4873_v37 = vadd.f32 %v8307_v47, %v4830_v42  ;;  %v5177_v10 = vshrl.u32 %v5156_v62, 16 }
 0x805   :  { %v4874_v14 = vadd.f32 %v8307_v47, %v4833_v40  ;;  %v4840_v35 = vpop.f32.mrb[59].mxu0  ;;  %v5185_v51 = vrot.slane %v5183_v2, 1 }
 0x806   :  { %v5232_v28 = vsel %vm270_vm1, %v5230_v50, %v5231_v63  ;;  %v5181_v0 = vrot.slane %v5179_v46, 1 }
 0x807   :  { %v5139_v27 = vpack.c.bf16 %v4874_v14, %v4873_v37  ;;  %v4723_v15 = vpop.f32.mrb[56].mxu1  ;;  %5441 = vmatmul.mubr.bf16.gmra.mrb[88].mxu0 %v5232_v28 }
 0x808   :  { %v4724_v11 = vpop.f32.mrb[57].mxu1  ;;  %v5182_v23 = vor.u32 %v5181_v0, %v5177_v10  ;;  %5448 = vmatprep.mubr.bf16.mxu0 %v6652_v1 }
 0x809   :  { %v5149_v19 = vrot.slane %v5139_v27, 7  ;;  %v4838_v13 = vadd.f32 %v4837_v12, %v4724_v11  ;;  %v4726_v30 = vpop.f32.mrb[58].mxu1 }
 0x80a   :  { %v4727_v38 = vpop.f32.mrb[59].mxu1  ;;  %v4844_v25 = vpop.f32.mrb[60].mxu0  ;;  %v5186_v8 = vsel %vm209_vm2, %v5182_v23, %v5185_v51 }
 0x80b   :  { %v5159_v3 = vsel %vm192_vm0, 0, %v5149_v19  ;;  %v5234_v22 = vrot.slane %v5149_v19, 1  ;;  %v4841_v58 = vadd.f32 %v4840_v35, %v4727_v38  ;;  %v4845_v45 = vpop.f32.mrb[61].mxu0  ;;  %5327 = vmatprep.mubr.bf16.mxu1 %v5186_v8  ;;  %v5193_v17 = vshll.u32 %v5149_v19, 16 }
 0x80c   :  { %v5233_v44 = vrot.slane %v5159_v3, 1  ;;  %v4847_v5 = vpop.f32.mrb[62].mxu0  ;;  %6274 = vmatmul.mubr.msk.bf16.gmra.mrb[88].mxu1 %vm6865_vm3, %v5148_v32  ;;  %v5189_v41 = vshll.u32 %v5159_v3, 16  ;;  %v4875_v24 = vadd.f32 %v8307_v47, %v4838_v13  ;;  %v5187_v53 = vshrl.u32 %v5159_v3, 16 }
 0x80d   :  { %v4876_v49 = vadd.f32 %v8307_v47, %v4841_v58  ;;  %v4848_v42 = vpop.f32.mrb[63].mxu0  ;;  %v5195_v12 = vrot.slane %v5193_v17, 1 }
 0x80e   :  { %v5235_v39 = vsel %vm270_vm1, %v5233_v44, %v5234_v22  ;;  %v5191_v54 = vrot.slane %v5189_v41, 1 }
 0x80f   :  { %v5140_v6 = vpack.c.bf16 %v4876_v49, %v4875_v24  ;;  %v4731_v62 = vpop.f32.mrb[60].mxu1  ;;  %5449 = vmatmul.mubr.bf16.gmra.mrb[92].mxu0 %v5235_v39 }
 0x810   :  { %v4732_v63 = vpop.f32.mrb[61].mxu1  ;;  %v5192_v40 = vor.u32 %v5191_v54, %v5187_v53 }
 0x811   :  { %v5150_v50 = vrot.slane %v5140_v6, 7  ;;  %v4846_v4 = vadd.f32 %v4845_v45, %v4732_v63  ;;  %v4734_v32 = vpop.f32.mrb[62].mxu1 }
 0x812   :  { %v4735_v46 = vpop.f32.mrb[63].mxu1  ;;  %v5196_v2 = vsel %vm209_vm2, %v5192_v40, %v5195_v12 }
 0x813   :  { %v4849_v37 = vadd.f32 %v4848_v42, %v4735_v46  ;;  %5335 = vmatprep.mubr.bf16.mxu1 %v5196_v2  ;;  %v5162_v14 = vsel %vm192_vm0, 0, %v5150_v50  ;;  %v5203_v28 = vshll.u32 %v5150_v50, 16  ;;  %v4877_v10 = vadd.f32 %v8307_v47, %v4846_v4 }
 0x814   :  { %6276 = vmatmul.mubr.msk.bf16.gmra.mrb[92].mxu1 %vm6865_vm3, %v5149_v19  ;;  %v5199_v35 = vshll.u32 %v5162_v14, 16  ;;  %v5197_v27 = vshrl.u32 %v5162_v14, 16  ;;  %v5237_v45 = vrot.slane %v5150_v50, 1  ;;  %v5236_v44 = vrot.slane %v5162_v14, 1 }
 0x815   :  { %v4878_v0 = vadd.f32 %v8307_v47, %v4849_v37  ;;  %v5205_v51 = vrot.slane %v5203_v28, 1 }
 0x816   :  { %v5201_v15 = vrot.slane %v5199_v35, 1  ;;  %v5238_v5 = vsel %vm270_vm1, %v5236_v44, %v5237_v45 }
 0x817   :  { %v5141_v11 = vpack.c.bf16 %v4878_v0, %v4877_v10 }
 0x818   :  { %v5202_v23 = vor.u32 %v5201_v15, %v5197_v27 }
 0x819   :  { %v5151_v13 = vrot.slane %v5141_v11, 7  ;;  %v8358_v11 = vld [vmem:[%s8460_s2 + $0x8] ss:$0 sm:$0xff] }
 0x81a   :  { %v5206_v30 = vsel %vm209_vm2, %v5202_v23, %v5205_v51 }
 0x81b   :  { %5343 = vmatprep.mubr.bf16.mxu1 %v5206_v30  ;;  %v5165_v38 = vsel %vm192_vm0, 0, %v5151_v13  ;;  %v5213_v25 = vshll.u32 %v5151_v13, 16  ;;  %v5240_v41 = vrot.slane %v5151_v13, 1 }
 0x81c   :  { %6278 = vmatmul.mubr.msk.bf16.gmra.mrb[96].mxu1 %vm6865_vm3, %v5150_v50  ;;  %v5209_v19 = vshll.u32 %v5165_v38, 16  ;;  %v5207_v8 = vshrl.u32 %v5165_v38, 16  ;;  %v5239_v17 = vrot.slane %v5165_v38, 1 }
 0x81d   :  { %v5215_v47 = vrot.slane %v5213_v25, 1 }
 0x81e   :  { %v5211_v3 = vrot.slane %v5209_v19, 1  ;;  %v5241_v24 = vsel %vm270_vm1, %v5239_v17, %v5240_v41 }
 0x820   :  { %v5212_v22 = vor.u32 %v5211_v3, %v5207_v8 }
 0x822   :  { %v5216_v58 = vsel %vm209_vm2, %v5212_v22, %v5215_v47 }
 0x823   :  { %5351 = vmatprep.mubr.bf16.mxu1 %v5216_v58 }
 0x824   :  { %6280 = vmatmul.mubr.msk.bf16.gmra.mrb[100].mxu1 %vm6865_vm3, %v5151_v13 }
 0x825   :  { %5456 = vmatprep.mubr.bf16.mxu1 %v6652_v1 }
 0x82c   :  { %5457 = vmatmul.mubr.bf16.vlgmr.msra.gmra.mrb[104].mxu1 %v5238_v5 }
 0x82d   :  { %5464 = vmatprep.mubr.bf16.mxu1 %v6652_v1 }
 0x834   :  { %5465 = vmatmul.mubr.bf16.gmra.mrb[108].mxu1 %v5241_v24 }
 0x8a8   :  { %v5394_v49 = vpop.f32.mrb[64].mxu0 }
 0x8a9   :  { %v5396_v42 = vpop.f32.mrb[65].mxu0 }
 0x8aa   :  { %v5397_v39 = vpop.f32.mrb[66].mxu0 }
 0x8ab   :  { %v5399_v53 = vpop.f32.mrb[67].mxu0 }
 0x8ad   :  { %v5281_v26 = vpop.f32.mrb[64].mxu1 }
 0x8ae   :  { %v5395_v54 = vadd.f32 %v5394_v49, %v5281_v26  ;;  %v5283_v6 = vpop.f32.mrb[65].mxu1 }
 0x8af   :  { %v5284_v62 = vpop.f32.mrb[66].mxu1 }
 0x8b0   :  { %v5398_v63 = vadd.f32 %v5397_v39, %v5284_v62  ;;  %v5286_v40 = vpop.f32.mrb[67].mxu1  ;;  %v5402_v12 = vpop.f32.mrb[68].mxu0  ;;  %v5477_v25 = vadd.f32 %v8358_v11, %v5395_v54 }
 0x8b1   :  { %v5404_v50 = vpop.f32.mrb[69].mxu0 }
 0x8b2   :  { %v5405_v4 = vpop.f32.mrb[70].mxu0  ;;  %v6283_v47 = vmul.f32 -1.442695, %v5477_v25  ;;  %v5478_v58 = vadd.f32 %v8358_v11, %v5398_v63 }
 0x8b3   :  { %v5407_v32 = vpop.f32.mrb[71].mxu0 }
 0x8b4   :  { %6582 = vpow2.f32 %v6283_v47  ;;  %v6284_v17 = vmul.f32 -1.442695, %v5478_v58 }
 0x8b5   :  { %v5289_v1 = vpop.f32.mrb[68].mxu1 }
 0x8b6   :  { %v5403_v46 = vadd.f32 %v5402_v12, %v5289_v1  ;;  %v5291_v2 = vpop.f32.mrb[69].mxu1  ;;  %6584 = vpow2.f32 %v6284_v17 }
 0x8b7   :  { %v5292_v37 = vpop.f32.mrb[70].mxu1 }
 0x8b8   :  { %v5406_v14 = vadd.f32 %v5405_v4, %v5292_v37  ;;  %v5294_v35 = vpop.f32.mrb[71].mxu1  ;;  %v5410_v28 = vpop.f32.mrb[72].mxu0  ;;  %v5479_v53 = vadd.f32 %v8358_v11, %v5403_v46 }
 0x8b9   :  { %v5412_v10 = vpop.f32.mrb[73].mxu0 }
 0x8ba   :  { %v5413_v0 = vpop.f32.mrb[74].mxu0  ;;  %v5480_v54 = vadd.f32 %v8358_v11, %v5406_v14  ;;  %v6285_v62 = vmul.f32 -1.442695, %v5479_v53 }
 0x8bb   :  { %v5415_v27 = vpop.f32.mrb[75].mxu0 }
 0x8bc   :  { %v6286_v40 = vmul.f32 -1.442695, %v5480_v54  ;;  %6586 = vpow2.f32 %v6285_v62 }
 0x8bd   :  { %v5297_v15 = vpop.f32.mrb[72].mxu1 }
 0x8be   :  { %v5411_v23 = vadd.f32 %v5410_v28, %v5297_v15  ;;  %v5299_v51 = vpop.f32.mrb[73].mxu1  ;;  %v6583_v37 = vpop.eup %6582  ;;  %6588 = vpow2.f32 %v6286_v40 }
 0x8bf   :  { %v5300_v13 = vpop.f32.mrb[74].mxu1 }
 0x8c0   :  { %v5414_v30 = vadd.f32 %v5413_v0, %v5300_v13  ;;  %v5302_v38 = vpop.f32.mrb[75].mxu1  ;;  %v5418_v19 = vpop.f32.mrb[76].mxu0  ;;  %v5481_v46 = vadd.f32 %v8358_v11, %v5411_v23  ;;  %v5531_v0 = vadd.f32 1.0, %v6583_v37 }
 0x8c1   :  { %v5420_v8 = vpop.f32.mrb[77].mxu0  ;;  %v6585_v27 = vpop.eup %6584  ;;  %v8377_v38 = vld [vmem:[%s8461_s4 + $0x8] ss:$0 sm:$0xff] }
 0x8c2   :  { %v5421_v3 = vpop.f32.mrb[78].mxu0  ;;  %v5482_v14 = vadd.f32 %v8358_v11, %v5414_v30  ;;  %v6287_v15 = vmul.f32 -1.442695, %v5481_v46  ;;  %6590 = vrcp.f32 %v5531_v0  ;;  %v5532_v23 = vadd.f32 1.0, %v6585_v27 }
 0x8c3   :  { %v5423_v22 = vpop.f32.mrb[79].mxu0 }
 0x8c4   :  { %v6288_v13 = vmul.f32 -1.442695, %v5482_v14  ;;  %6592 = vpow2.f32 %v6287_v15 }
 0x8c5   :  { %v5305_v45 = vpop.f32.mrb[76].mxu1 }
 0x8c6   :  { %v8362_v44 = vadd.f32 %v5418_v19, %v5305_v45  ;;  %v5307_v5 = vpop.f32.mrb[77].mxu1  ;;  %6594 = vpow2.f32 %v6288_v13 }
 0x8c7   :  { %v5308_v41 = vpop.f32.mrb[78].mxu1  ;;  %v6587_v5 = vpop.eup %6586 }
 0x8c8   :  { %v8364_v24 = vadd.f32 %v5421_v3, %v5308_v41  ;;  %v5310_v49 = vpop.f32.mrb[79].mxu1  ;;  %v5426_v42 = vpop.f32.mrb[80].mxu0 }
 0x8c9   :  { %v5428_v39 = vpop.f32.mrb[81].mxu0  ;;  %v6589_v49 = vpop.eup %6588 }
 0x8ca   :  { %v5429_v26 = vpop.f32.mrb[82].mxu0  ;;  %v5533_v39 = vadd.f32 1.0, %v6587_v5 }
 0x8cb   :  { %v5431_v6 = vpop.f32.mrb[83].mxu0 }
 0x8cd   :  { %v5313_v63 = vpop.f32.mrb[80].mxu1 }
 0x8ce   :  { %v8368_v12 = vadd.f32 %v5426_v42, %v5313_v63  ;;  %v5315_v50 = vpop.f32.mrb[81].mxu1 }
 0x8cf   :  { %v5316_v4 = vpop.f32.mrb[82].mxu1 }
 0x8d0   :  { %v8370_v32 = vadd.f32 %v5429_v26, %v5316_v4  ;;  %v5318_v1 = vpop.f32.mrb[83].mxu1  ;;  %v5534_v26 = vadd.f32 1.0, %v6589_v49 }
 0x8d1   :  { %v6591_v1 = vpop.eup %6590 }
 0x8d2   :  { %v5434_v2 = vpop.f32.mrb[84].mxu0  ;;  %v6593_v37 = vpop.eup %6592 }
 0x8d3   :  { %v5435_v35 = vpop.f32.mrb[85].mxu0  ;;  %v6595_v14 = vpop.eup %6594  ;;  %v5535_v27 = vadd.f32 1.0, %v6593_v37  ;;  %v5486_v37 = vadd.f32 %v8358_v11, %v8370_v32  ;;  %v3739_v32 = vadd.f32 %v7951_v55, %v7406_v59 }
 0x8d4   :  { %v5437_v28 = vpop.f32.mrb[86].mxu0 }
 0x8d5   :  { %v5438_v10 = vpop.f32.mrb[87].mxu0 }
 0x8d7   :  { %v5321_v51 = vpop.f32.mrb[84].mxu1 }
 0x8d8   :  { %v5322_v19 = vpop.f32.mrb[85].mxu1 }
 0x8d9   :  { %v5436_v25 = vadd.f32 %v5435_v35, %v5322_v19  ;;  %v5324_v8 = vpop.f32.mrb[86].mxu1 }
 0x8da   :  { %v5325_v3 = vpop.f32.mrb[87].mxu1  ;;  %v5442_v22 = vpop.f32.mrb[88].mxu0  ;;  %v5536_v8 = vadd.f32 1.0, %v6595_v14 }
 0x8db   :  { %v5491_v30 = vadd.f32 %v8377_v38, %v5436_v25  ;;  %v5439_v47 = vadd.f32 %v5438_v10, %v5325_v3  ;;  %v5443_v58 = vpop.f32.mrb[89].mxu0 }
 0x8dc   :  { %v5445_v45 = vpop.f32.mrb[90].mxu0 }
 0x8dd   :  { %6596 = vtanh.f32 %v5491_v30  ;;  %v5492_v41 = vadd.f32 %v8377_v38, %v5439_v47  ;;  %v5446_v17 = vpop.f32.mrb[91].mxu0  ;;  %v5483_v47 = vadd.f32 %v8358_v11, %v8362_v44 }
 0x8de   :  { %6598 = vrcp.f32 %v5532_v23  ;;  %v3735_v23 = vadd.f32 %v7893_v29, %v7340_v43  ;;  %v5484_v43 = vadd.f32 %v8358_v11, %v8364_v24 }
 0x8df   :  { %6600 = vtanh.f32 %v5492_v41  ;;  %v5329_v42 = vpop.f32.mrb[88].mxu1  ;;  %v3736_v41 = vadd.f32 %v7896_v20, %v7345_v48 }
 0x8e0   :  { %v5330_v53 = vpop.f32.mrb[89].mxu1  ;;  %6602 = vrcp.f32 %v5533_v39  ;;  %v6289_v39 = vmul.f32 -1.442695, %v5483_v47 }
 0x8e1   :  { %v5444_v54 = vadd.f32 %v5443_v58, %v5330_v53  ;;  %v5332_v6 = vpop.f32.mrb[90].mxu1  ;;  %6604 = vrcp.f32 %v5534_v26  ;;  %v6290_v26 = vmul.f32 -1.442695, %v5484_v43 }
 0x8e2   :  { %v5333_v62 = vpop.f32.mrb[91].mxu1  ;;  %v5450_v63 = vpop.f32.mrb[92].mxu0 }
 0x8e3   :  { %v5493_v40 = vadd.f32 %v8377_v38, %v5444_v54  ;;  %v5447_v50 = vadd.f32 %v5446_v17, %v5333_v62  ;;  %v5451_v4 = vpop.f32.mrb[93].mxu0 }
 0x8e4   :  { %v5453_v2 = vpop.f32.mrb[94].mxu0 }
 0x8e5   :  { %v5494_v46 = vadd.f32 %v8377_v38, %v5447_v50  ;;  %v5454_v35 = vpop.f32.mrb[95].mxu0  ;;  %6606 = vtanh.f32 %v5493_v40  ;;  %v5485_v40 = vadd.f32 %v8358_v11, %v8368_v12  ;;  %v3737_v50 = vadd.f32 %v7911_v56, %v7362_v16 }
 0x8e7   :  { %v6597_v28 = vpop.eup %6596  ;;  %6608 = vtanh.f32 %v5494_v46  ;;  %v5337_v10 = vpop.f32.mrb[92].mxu1 }
 0x8e8   :  { %v6599_v0 = vpop.eup %6598  ;;  %v5571_v15 = vmul.f32 %v6597_v28, %v6591_v1  ;;  %v5338_v51 = vpop.f32.mrb[93].mxu1  ;;  %6610 = vrcp.f32 %v5535_v27  ;;  %v3738_v1 = vadd.f32 %v7914_v21, %v7367_v18  ;;  %v6291_v10 = vmul.f32 -1.442695, %v5485_v40 }
 0x8e9   :  { %v6601_v13 = vpop.eup %6600  ;;  %v5452_v19 = vadd.f32 %v5451_v4, %v5338_v51  ;;  %v5340_v25 = vpop.f32.mrb[94].mxu1  ;;  %v3741_v40 = vadd.f32 %v7987_v52, %v7446_v33 }
 0x8ea   :  { %v5581_v3 = vadd.f32 %v5571_v15, %v7893_v29  ;;  %v5572_v22 = vmul.f32 %v6601_v13, %v6599_v0  ;;  %v5341_v30 = vpop.f32.mrb[95].mxu1  ;;  %v6603_v49 = vpop.eup %6602  ;;  %v6292_v0 = vmul.f32 -1.442695, %v5486_v37 }
 0x8eb   :  { %v5495_v58 = vadd.f32 %v8377_v38, %v5452_v19  ;;  %v5455_v45 = vadd.f32 %v5454_v35, %v5341_v30  ;;  %v6605_v42 = vpop.eup %6604  ;;  %v3740_v19 = vadd.f32 %v7954_v34, %v7411_v61 }
 0x8ec   :  { %v5591_v5 = vadd.f32 %v5581_v3, %v3735_v23  ;;  %v5582_v17 = vadd.f32 %v5572_v22, %v7896_v20 }
 0x8ed   :  { %6612 = vtanh.f32 %v5495_v58  ;;  %v5496_v29 = vadd.f32 %v8377_v38, %v5455_v45 }
 0x8ee   :  { %6614 = vrcp.f32 %v5536_v8  ;;  %5601 = vst [vmem:[%s8462_s5] sm:$0xff] %v5591_v5  ;;  %v5592_v44 = vadd.f32 %v5582_v17, %v3736_v41 }
 0x8ef   :  { %6616 = vtanh.f32 %v5496_v29  ;;  %v5345_v53 = vpop.f32.mrb[96].mxu1  ;;  %v6607_v48 = vpop.eup %6606 }
 0x8f0   :  { %5602 = vst [vmem:[%s8462_s5 + $0x8] sm:$0xff] %v5592_v44  ;;  %v5346_v20 = vpop.f32.mrb[97].mxu1  ;;  %v5573_v54 = vmul.f32 %v6607_v48, %v6603_v49  ;;  %6618 = vpow2.f32 %v6289_v39 }
 0x8f1   :  { %v6609_v24 = vpop.eup %6608  ;;  %v5348_v6 = vpop.f32.mrb[98].mxu1  ;;  %6620 = vpow2.f32 %v6290_v26 }
 0x8f2   :  { %v5574_v62 = vmul.f32 %v6609_v24, %v6605_v42  ;;  %v5349_v63 = vpop.f32.mrb[99].mxu1  ;;  %v5583_v4 = vadd.f32 %v5573_v54, %v7911_v56  ;;  %v6611_v35 = vpop.eup %6610  ;;  %6622 = vpow2.f32 %v6291_v10 }
 0x8f3   :  { %6624 = vpow2.f32 %v6292_v0 }
 0x8f4   :  { %v5584_v2 = vadd.f32 %v5574_v62, %v7914_v21  ;;  %v5593_v46 = vadd.f32 %v5583_v4, %v3737_v50 }
 0x8f6   :  { %v5594_v14 = vadd.f32 %v5584_v2, %v3738_v1  ;;  %5603 = vst [vmem:[%s8462_s5 + $0x10] sm:$0xff] %v5593_v46  ;;  %v3742_v2 = vadd.f32 %v7990_v31, %v7451_v36 }
 0x8f7   :  { %v6613_v28 = vpop.eup %6612  ;;  %v5353_v16 = vpop.f32.mrb[100].mxu1 }
 0x8f8   :  { %v6615_v56 = vpop.eup %6614  ;;  %5604 = vst [vmem:[%s8462_s5 + $0x18] sm:$0xff] %v5594_v14  ;;  %v5575_v18 = vmul.f32 %v6613_v28, %v6611_v35  ;;  %v5354_v21 = vpop.f32.mrb[101].mxu1  ;;  %v3743_v28 = vadd.f32 %v8014_v7, %v7477_v57  ;;  %v3744_v16 = vadd.f32 %v8017_v9, %v7482_v60 }
 0x8f9   :  { %v6617_v12 = vpop.eup %6616  ;;  %v5356_v11 = vpop.f32.mrb[102].mxu1 }
 0x8fa   :  { %v5585_v27 = vadd.f32 %v5575_v18, %v7951_v55  ;;  %v5576_v15 = vmul.f32 %v6617_v12, %v6615_v56  ;;  %v5357_v51 = vpop.f32.mrb[103].mxu1  ;;  %v6619_v8 = vpop.eup %6618 }
 0x8fb   :  { %v6621_v3 = vpop.eup %6620  ;;  %v5537_v22 = vadd.f32 1.0, %v6619_v8 }
 0x8fc   :  { %v5595_v13 = vadd.f32 %v5585_v27, %v3739_v32  ;;  %v5586_v25 = vadd.f32 %v5576_v15, %v7954_v34  ;;  %v5538_v61 = vadd.f32 1.0, %v6621_v3  ;;  %v6623_v5 = vpop.eup %6622 }
 0x8fd   :  { %6626 = vrcp.f32 %v5537_v22  ;;  %v6625_v17 = vpop.eup %6624  ;;  %v5539_v29 = vadd.f32 1.0, %v6623_v5 }
 0x8fe   :  { %5605 = vst [vmem:[%s8462_s5 + $0x20] sm:$0xff] %v5595_v13  ;;  %v5596_v23 = vadd.f32 %v5586_v25, %v3740_v19  ;;  %v5540_v39 = vadd.f32 1.0, %v6625_v17 }
 0x8ff   :  { %v5458_v59 = vpop.f32.mrb[104].mxu1 }
 0x900   :  { %5606 = vst [vmem:[%s8462_s5 + $0x28] sm:$0xff] %v5596_v23  ;;  %v5459_v55 = vpop.f32.mrb[105].mxu1 }
 0x901   :  { %v5460_v30 = vadd.f32 %v5459_v55, %v5346_v20  ;;  %v5461_v47 = vpop.f32.mrb[106].mxu1 }
 0x902   :  { %v5462_v58 = vpop.f32.mrb[107].mxu1 }
 0x903   :  { %v5497_v34 = vadd.f32 %v8377_v38, %v5460_v30  ;;  %v5463_v45 = vadd.f32 %v5462_v58, %v5349_v63 }
 0x905   :  { %6628 = vtanh.f32 %v5497_v34  ;;  %v5498_v41 = vadd.f32 %v8377_v38, %v5463_v45 }
 0x906   :  { %6630 = vrcp.f32 %v5538_v61 }
 0x907   :  { %6632 = vtanh.f32 %v5498_v41  ;;  %v5466_v43 = vpop.f32.mrb[108].mxu1  ;;  %v6627_v26 = vpop.eup %6626 }
 0x908   :  { %v5467_v49 = vpop.f32.mrb[109].mxu1  ;;  %6634 = vrcp.f32 %v5539_v29 }
 0x909   :  { %v5468_v44 = vadd.f32 %v5467_v49, %v5354_v21  ;;  %v5469_v42 = vpop.f32.mrb[110].mxu1 }
 0x90a   :  { %v5470_v53 = vpop.f32.mrb[111].mxu1 }
 0x90b   :  { %v5499_v48 = vadd.f32 %v8377_v38, %v5468_v44  ;;  %v5471_v20 = vadd.f32 %v5470_v53, %v5357_v51 }
 0x90d   :  { %6636 = vtanh.f32 %v5499_v48  ;;  %v5500_v24 = vadd.f32 %v8377_v38, %v5471_v20 }
 0x90e   :  { %6638 = vrcp.f32 %v5540_v39 }
 0x90f   :  { %v6629_v54 = vpop.eup %6628  ;;  %6640 = vtanh.f32 %v5500_v24 }
 0x910   :  { %v6631_v6 = vpop.eup %6630  ;;  %v5577_v62 = vmul.f32 %v6629_v54, %v6627_v26 }
 0x911   :  { %v6633_v63 = vpop.eup %6632 }
 0x912   :  { %v5587_v50 = vadd.f32 %v5577_v62, %v7987_v52  ;;  %v5578_v4 = vmul.f32 %v6633_v63, %v6631_v6  ;;  %v6635_v38 = vpop.eup %6634 }
 0x914   :  { %v5597_v1 = vadd.f32 %v5587_v50, %v3741_v40  ;;  %v5588_v37 = vadd.f32 %v5578_v4, %v7990_v31 }
 0x916   :  { %5607 = vst [vmem:[%s8462_s5 + $0x30] sm:$0xff] %v5597_v1  ;;  %v5598_v46 = vadd.f32 %v5588_v37, %v3742_v2 }
 0x917   :  { %v6637_v35 = vpop.eup %6636 }
 0x918   :  { %v6639_v14 = vpop.eup %6638  ;;  %5608 = vst [vmem:[%s8462_s5 + $0x38] sm:$0xff] %v5598_v46  ;;  %v5579_v33 = vmul.f32 %v6637_v35, %v6635_v38 }
 0x919   :  { %v6641_v52 = vpop.eup %6640 }
 0x91a   :  { %v5589_v36 = vadd.f32 %v5579_v33, %v8014_v7  ;;  %v5580_v31 = vmul.f32 %v6641_v52, %v6639_v14 }
 0x91c   :  { %v5599_v10 = vadd.f32 %v5589_v36, %v3743_v28  ;;  %v5590_v56 = vadd.f32 %v5580_v31, %v8017_v9 }
 0x91e   :  { %5609 = vst [vmem:[%s8462_s5 + $0x40] sm:$0xff] %v5599_v10  ;;  %v5600_v18 = vadd.f32 %v5590_v56, %v3744_v16 }
 0x920   :  { %5610 = vst [vmem:[%s8462_s5 + $0x48] sm:$0xff] %v5600_v18 }

</bundles_post_ra>
